<compile_context>
chip_gen: v7x
topology: tpu7x:2x2x1
jax: 0.10.0
libtpu: 0.0.40
codegen_flags: <defaults>
</compile_context>

<pallas_src>
import jax
import jax.numpy as jnp
from jax.experimental import pallas as pl
from jax.experimental.pallas import tpu as pltpu

_TARGET_TILE_BYTES = 2 * 1024 * 1024     # ~2 MiB per buffer: safe on v5e/v6e/v7x
_SMALL_INPUT_BYTES = 64 * 1024           # below this, fused XLA cos wins
_LANE_CANDIDATES = (1024, 512, 256, 128) # widest lane-dense last dim dividing n
_SUBLANE_QUANTUM = {4: 8, 2: 16, 1: 32}  # rows quantum per dtype itemsize


def _round_up(v, m):
    return ((v + m - 1) // m) * m


def _cos_kernel(x_ref, o_ref):
    # Pure elementwise cosine on the current VMEM tile, in the native dtype.
    o_ref[...] = jnp.cos(x_ref[...])


def _cos_2d(x2d, donate=False):
    """Run the Pallas cos kernel over a lane-dense (rows, lanes) slab."""
    rows, lanes = x2d.shape
    itemsize = jnp.dtype(x2d.dtype).itemsize
    q = _SUBLANE_QUANTUM.get(itemsize, 8)

    # Rows per block from a byte budget, rounded down to the sublane quantum.
    tile_rows = max(q, (_TARGET_TILE_BYTES // (lanes * itemsize)) // q * q)
    if rows <= q:
        # Single full-extent block (block == full dims is allowed even if
        # rows is not a multiple of the quantum).
        tile_rows = rows
    else:
        # Cap at ~half the rows (quantum-aligned) so grid >= 2 steps and both
        # v7x TensorCores get work; no effect for large inputs where the byte
        # budget is the binding constraint.
        half_rows = _round_up((rows + 1) // 2, q)
        tile_rows = min(tile_rows, half_rows)

    grid = (pl.cdiv(rows, tile_rows),)  # last block may overhang; Pallas masks it

    return pl.pallas_call(
        _cos_kernel,
        out_shape=jax.ShapeDtypeStruct((rows, lanes), x2d.dtype),
        grid=grid,
        in_specs=[pl.BlockSpec((tile_rows, lanes), lambda i: (i, 0))],
        out_specs=pl.BlockSpec((tile_rows, lanes), lambda i: (i, 0)),
        compiler_params=pltpu.CompilerParams(
            dimension_semantics=("parallel",),
        ),
        cost_estimate=pl.CostEstimate(
            flops=0,
            transcendentals=rows * lanes,
            bytes_accessed=2 * rows * lanes * itemsize,
        ),
        input_output_aliases=({0: 0} if donate else {}),
    )(x2d)


def cosine_activation(x, donate_input=False):
    """Applies cos(x) elementwise via a Pallas TPU kernel. Preserves shape/dtype.

    donate_input=True enables input_output_aliases={0: 0} on the aligned path;
    only set it if the caller will not reuse `x` afterwards.
    """
    orig_shape = x.shape
    n = int(x.size)
    if n == 0:
        return x
    itemsize = jnp.dtype(x.dtype).itemsize

    # Small-input fast path: launch/step overhead dominates; fused XLA cos is
    # already a single optimal read+write HBM pass at these sizes.
    if n * itemsize <= _SMALL_INPUT_BYTES:
        return jnp.cos(x)

    flat = x.reshape(-1)  # contiguous reshape: free, no copy

    if n % 128 == 0:
        # Aligned path (typical NN tensors): free reshape to a lane-dense slab.
        lanes = next(c for c in _LANE_CANDIDATES if n % c == 0)
        out2d = _cos_2d(flat.reshape(n // lanes, lanes), donate=donate_input)
        return out2d.reshape(orig_shape)

    # Ragged path: aligned bulk through the kernel, tiny (<512 elem) tail
    # through fused XLA cos -- avoids a whole-array pad/copy round trip.
    lanes = 512
    n_main = (n // lanes) * lanes
    main = jax.lax.slice(flat, (0,), (n_main,)).reshape(n_main // lanes, lanes)
    tail = jax.lax.slice(flat, (n_main,), (n,))
    out = jnp.concatenate([_cos_2d(main).reshape(-1), jnp.cos(tail)])
    return out.reshape(orig_shape)


if __name__ == "__main__":
    key = jax.random.PRNGKey(0)
    k1, k2, k3, k4 = jax.random.split(key, 4)

    # 1) Primary small NCHW input from the module spec (small-input fast path).
    x_small = jax.random.normal(k1, (2, 4, 16, 16), dtype=jnp.float32)
    y_small = jax.block_until_ready(cosine_activation(x_small))
    assert y_small.shape == x_small.shape and y_small.dtype == x_small.dtype
    assert jnp.allclose(y_small, jnp.cos(x_small), atol=1e-6, rtol=1e-6)

    # 2) Aligned f32 input large enough to hit the Pallas kernel (grid >= 2).
    x_f32 = jax.random.normal(k2, (2, 4, 64, 128), dtype=jnp.float32)
    y_f32 = jax.block_until_ready(cosine_activation(x_f32))
    assert y_f32.shape == x_f32.shape and y_f32.dtype == x_f32.dtype
    assert jnp.allclose(y_f32, jnp.cos(x_f32), atol=1e-6, rtol=1e-6)

    # 3) bf16 input -- kernel stays in native bf16 (no full-array upcast pass).
    x_bf16 = jax.random.normal(k3, (2, 4, 64, 128), dtype=jnp.bfloat16)
    y_bf16 = jax.block_until_ready(cosine_activation(x_bf16))
    assert y_bf16.shape == x_bf16.shape and y_bf16.dtype == jnp.bfloat16
    assert jnp.allclose(y_bf16.astype(jnp.float32),
                        jnp.cos(x_bf16).astype(jnp.float32), atol=5e-2)

    # 4) Ragged element count -- aligned bulk via kernel, tiny tail via XLA.
    x_rag = jax.random.normal(k4, (7, 3001), dtype=jnp.float32)
    y_rag = jax.block_until_ready(cosine_activation(x_rag))
    assert y_rag.shape == x_rag.shape and y_rag.dtype == x_rag.dtype
    assert jnp.allclose(y_rag, jnp.cos(x_rag), atol=1e-6, rtol=1e-6)

    print("KERNEL_OK")
</pallas_src>

<mosaic_0001>
module attributes {stable_mosaic.version = 11 : i64} {
  func.func @_cos_kernel(%arg0: i32, %arg1: memref<32x1024xf32, #tpu.memory_space<vmem>>, %arg2: memref<32x1024xf32, #tpu.memory_space<vmem>>) attributes {dimension_semantics = [#tpu.dimension_semantics<parallel>], iteration_bounds = array<i64: 2>, scalar_prefetch = 0 : i64, scratch_operands = 0 : i64, tpu.core_type = #tpu.core_type<tc>, window_params = [{transform_indices = @transform_0, window_bounds = array<i64: 32, 1024>}, {transform_indices = @transform_1, window_bounds = array<i64: 32, 1024>}]} {
    %c0 = arith.constant 0 : index
    %c0_0 = arith.constant 0 : index
    %0 = vector.load %arg1[%c0, %c0_0] : memref<32x1024xf32, #tpu.memory_space<vmem>>, vector<32x1024xf32>
    %1 = math.cos %0 : vector<32x1024xf32>
    %c0_1 = arith.constant 0 : index
    %c0_2 = arith.constant 0 : index
    %2 = vector.load %arg2[%c0_1, %c0_2] : memref<32x1024xf32, #tpu.memory_space<vmem>>, vector<32x1024xf32>
    tpu.vector_store %arg2[%c0_1, %c0_2], %1 {strides = array<i32>} : memref<32x1024xf32, #tpu.memory_space<vmem>>, vector<32x1024xf32>,
    return
  }
  func.func @transform_0(%arg0: i32) -> (i32, i32) {
    %c0_i32 = arith.constant 0 : i32
    %c0_i32_0 = arith.constant 0 : i32
    return %arg0, %c0_i32 : i32, i32
  }
  func.func @transform_1(%arg0: i32) -> (i32, i32) {
    %c0_i32 = arith.constant 0 : i32
    %c0_i32_0 = arith.constant 0 : i32
    return %arg0, %c0_i32 : i32, i32
  }
}

</mosaic_0001>

<bundles_post_ra>
// kernel: tpu_custom_call.1
= control target key start
LH: loop header
LB: loop body
LE: loop exit
PB: predicated region body
PF: predicated region fallthrough
CT: control target
= control target key end

     0   :  { %6 = vsyncpa [#allocation3], 0  ;;  %s6967_s0 = inlined_call_operand.hbm [shape: f32[64,1024], index: 0, kind: input, shape index: {}]   ;;  %s6968_s1 = inlined_call_operand.hbm [shape: f32[64,1024], index: 1, kind: output, shape index: {}]  }
   0x1   :  { %8 = vsyncpa [#allocation3 + $0x1], 0 }
   0x2   :  { %9 = vsyncpa [#allocation4], 0 }
   0x3   :  { %11 = vsyncpa [#allocation4 + $0x1], 0  ;;  %s4166_s6 = smov 0   ;;  %s4168_s7 = smov 0  }
   0x4   :  { %s4170_s8 = smov 0   ;;  %s4172_s9 = smov 0  }
   0x5 LB: > { %s4187_s10 = sadd.s32 4294967295, %s4142_s9   ;;  %s3586_s11 = sadd.s32 4294967294, %s4142_s9   ;;  %s4142_s9 = sphi %s4172_s9, %s7041_s9   ;;  %s4138_s8 = sphi %s4170_s8, %s7040_s8   ;;  %s4134_s7 = sphi %s4168_s7, %s7039_s7   ;;  %s4130_s6 = sphi %s4166_s6, %s7038_s6  }
   0x6   : > { %s4191_s12 = sadd.s32 1, %s4142_s9   ;;  %s24_s13 = sadd.s32 1, %s4138_s8 }
   0x7   : > { %s21_s14 = ssub.s32 %s4142_s9, %s4191_s12  ;;  %p31_p0 = scmp.ne.s32.totalorder %s4138_s8, %s4134_s7 }
   0x8   : > { %p22_p1 = scmp.eq.s32.totalorder %s21_s14, 0  ;;  %p32_p2 = scmp.eq.s32.totalorder %s4142_s9, 0 }
   0x9   : > { %p37_p3 = scmp.ne.s32.totalorder %s4134_s7, %s4130_s6  ;;  %p38_p4 = scmp.eq.s32.totalorder %s4187_s10, 0 }
   0xa   : > { %s4203_s15 = scalar_select %p22_p1, %s4138_s8, %s24_s13  }
   0xb   : > { %p4205_p5 = por %p32_p2, %p31_p0  ;;  %p4209_p6 = por %p38_p4, %p37_p3 }
   0xc   : > { %p61_p7 = scmp.eq.s32.totalorder %s4187_s10, 1  ;;  %p67_p8 = scmp.eq.s32.totalorder %s3586_s11, 1 }
   0xd   : > { %p3874_p10 = scmp.lt.s32.totalorder %s4142_s9, 2  ;;  %s87_s20 = sand.u32 1, %s4138_s8  }
   0xe   : > { %p4216_p11 = por %p61_p7, %p31_p0  ;;  %p4220_p12 = por %p67_p8, %p37_p3 }
   0xf   : > { %s3731_s21 = sshll.u32 %s4142_s9, 12  ;;  %s3589_s22 = sshll.u32 %s87_s20, 8 }
  0x10   : > { %s6972_s18 = scalar_select %p4216_p11, 1, 0 }
  0x11   : > { %s6973_s19 = scalar_select %p4220_p12, 1, 0 }
  0x12   : > { %s4229_s25 = scalar_lea.hbm %s6967_s0, %s3731_s21  ;;  %s91_s26 = scalar_lea.vmem [#allocation2], %s3589_s22 }
  0x13   : > { %s99_s27 = sshll.u32 %s91_s26, 4  ;;  %p4233_p13 = pnand %p3874_p10, %p4205_p5  ;;  %s4237_s27 = int_to_ptr.vmem [resolvable:$true] %s99_s27 }
  0x14   : > { %s4239_s29 = scalar_lea.sflag [#allocation3], %s87_s20  ;;  %s4046_s30 = scalar_lea.hbm %s4229_s25, 4096 }
  0x15   : > { %p4047_p0 = scmp.ne.s32.totalorder %s4229_s25, %s4046_s30  ;;  %p4048_p1 = pneg %p4233_p13 }
  0x16   : > { %s4051_s4 = scalar_lea.hbm %s6967_s0, 8192  ;;  %p4052_p4 = scmp.lt.u32.totalorder %s4229_s25, %s6967_s0 }
  0x17   : > { %p4049_p2 = pnand %p4048_p1, %p4047_p0  ;;  %p4053_p5 = scmp.lt.u32.totalorder %s4051_s4, %s4046_s30 }
  0x18   : > { %p4055_p8 = scmp.lt.u32.totalorder %s4046_s30, %s4229_s25 }
  0x19   : > { %p4050_p3 = pneg %p4049_p2  ;;  %p4054_p7 = por %p4053_p5, %p4052_p4 }
  0x1b   : > { %p4056_p10 = por %p4055_p8, %p4054_p7 }
  0x1d   : > { %p4057_p9 = pnand %p4056_p10, %p4050_p3 }
  0x1f   : > { %4060 = shalt.err (!%p4057_p9)
}
  0x20   : > { %s4061_s13 = scalar_lea.vmem %s4237_s27, 4096  ;;  %s4144_s14 = smov [#allocation2]  }
  0x21   : > { %p4062_p0 = scmp.ne.s32.totalorder %s4237_s27, %s4061_s13  ;;  %s4066_s16 = sshll.u32 %s4144_s14, 4  ;;  %s4067_s16 = int_to_ptr.vmem [resolvable:$false] %s4066_s16 }
  0x22   : > { %s4068_s20 = scalar_lea.vmem %s4067_s16, 8192  ;;  %p4069_p11 = scmp.lt.s32.totalorder %s4237_s27, %s4067_s16 }
  0x23   : > { %p4064_p2 = pnand %p4062_p0, %p4048_p1  ;;  %p4070_p4 = scmp.lt.s32.totalorder %s4068_s20, %s4061_s13 }
  0x25   : > { %p4065_p12 = pneg %p4064_p2  ;;  %p4071_p5 = por %p4070_p4, %p4069_p11 }
  0x27   : > { %p4072_p7 = pnand %p4071_p5, %p4065_p12 }
  0x29   : > { %4075 = shalt.err (!%p4072_p7)
}
  0x2a   : > { %s4145_s21 = smov 1024   ;;  %s4146_s22 = smov 64  }
  0x2b   : > { %3869 = dma.hbm_to_vmem [thread:$0]  (!%p4233_p13), %s4229_s25, 4096, %s4237_s27, %s4239_s29, %s4145_s21, %s4145_s21, %s4146_s22  }
  0x2c   : > { %p3593_p9 = scmp.ge.s32.totalorder %s4142_s9, 1  ;;  %p107_p1 = scmp.lt.s32.totalorder %s4142_s9, 3 }
  0x2e   : > { %p108_p3 = pnand %p3593_p9, %p107_p1 }
  0x2f   : > { %s4270_s23 = sand.u32 (!%p108_p3), 1, %s4134_s7  }
  0x30   : > { %111 = sbr.rel (%p108_p3) target bundleno = 888 (0x378), region = 24  ;;  %s3594_s24 = sshll.u32 (!%p108_p3), %s4270_s23, 8 }
  0x31   : > { %s114_s26 = scalar_lea.sflag (!%p108_p3), [#allocation3], %s4270_s23  ;;  %s4276_s30 = scalar_lea.vmem (!%p108_p3), [#allocation2], %s3594_s24 }
  0x37   : > { %4121 = dma.done.wait (%p4209_p6), %s114_s26, 4096  }
  0x38   : > { %4123 = vsyncadd (%p4209_p6), %s114_s26, 4294963200  ;;  %v4283_v0 = vld [vmem:[%s4276_s30] sm:$0xff]  ;;  %v4287_v2 = vld [vmem:[%s4276_s30 + $0x8] sm:$0xff]  ;;  %v4147_v26 = vmov 683565275   ;;  %s4546_s17 = scalar_lea.vmem [#allocation5], %s3594_s24 }
  0x39   : > { %v170_v1 = vand.u32 2147483647, %v4283_v0  ;;  %v173_v3 = vand.u32 2139095040, %v4283_v0  ;;  %v273_v4 = vand.u32 2147483647, %v4287_v2  ;;  %v276_v7 = vand.u32 2139095040, %v4287_v2 }
  0x3a   : > { %v4295_v8 = vld [vmem:[%s4276_s30 + $0x10] sm:$0xff]  ;;  %v4148_v28 = vmov 2475754826   ;;  %v4149_v30 = vmov 2131351028   ;;  %vm172_vm13 = vcmp.lt.s32.totalorder %v4283_v0, 0 }
  0x3b   : > { %v174_v5 = vshrl.u32 %v173_v3, 23  ;;  %v177_v6 = vand.u32 8388607, %v170_v1  ;;  %v277_v10 = vshrl.u32 %v276_v7, 23  ;;  %v280_v11 = vand.u32 8388607, %v273_v4 }
  0x3c   : > { %v379_v16 = vand.u32 2139095040, %v4295_v8  ;;  %v376_v23 = vand.u32 2147483647, %v4295_v8  ;;  %v4150_v32 = vmov 2102212464   ;;  %s3733_s25 = sshll.u32 %s4187_s10, 12 }
  0x3d   : > { %v3596_v9 = vadd.s32 4294967169, %v174_v5  ;;  %v178_v12 = vor.u32 8388608, %v177_v6  ;;  %v3600_v14 = vadd.s32 4294967169, %v277_v10  ;;  %v281_v15 = vor.u32 8388608, %v280_v11  ;;  %s3513_s27 = sshll.u32 %s4546_s17, 4  ;;  %s6920_s2 = scalar_lea.hbm %s6968_s1, %s3733_s25  ;;  %s6922_s27 = int_to_ptr.vmem [resolvable:$true] %s3513_s27 }
  0x3e   : > { %v4305_v24 = vshrl.u32 %v379_v16, 23  ;;  %v4151_v34 = vmov 920167782   ;;  %v4152_v41 = vmov 1326507024   ;;  %s3499_s10 = scalar_lea.sflag [#allocation4], %s4270_s23 }
  0x3f   : > { %v180_v13 = vadd.s32 1, %v3596_v9  ;;  %v283_v18 = vadd.s32 1, %v3600_v14  ;;  %v4300_v21 = vshll.u32 %v178_v12, 8  ;;  %v4302_v22 = vshll.u32 %v281_v15, 8  ;;  %s4076_s3 = scalar_lea.vmem %s6922_s27, 4096  ;;  %p7035_p11 = scmp.ne.s32.totalorder %s6972_s18, 0 }
  0x40   : > { %p4077_p6 = scmp.ne.s32.totalorder %s6922_s27, %s4076_s3  ;;  %s4153_s4 = smov [#allocation5]  }
  0x41   : > { %vm181_vm0 = vcmp.gt.s32.totalorder %v180_v13, 0  ;;  %vm284_vm1 = vcmp.gt.s32.totalorder %v283_v18, 0  ;;  %s4080_s5 = sshll.u32 %s4153_s4, 4  ;;  %s4081_s5 = int_to_ptr.vmem [resolvable:$false] %s4080_s5 }
  0x42   : > { %v182_v17 = vsel %vm181_vm0, %v180_v13, 0  ;;  %v285_v46 = vsel %vm284_vm1, %v283_v18, 0  ;;  %vm4417_vm1 = vcmp.le.f32.partialorder %v170_v1, 0.7853982  ;;  %p4078_p12 = pnand %p4077_p6, %p7035_p11  ;;  %s4082_s11 = scalar_lea.vmem %s4081_s5, 8192 }
  0x43   : > { %v183_v19 = vshrl.u32 %v182_v17, 5  ;;  %v184_v20 = vand.u32 31, %v182_v17  ;;  %v286_v49 = vshrl.u32 %v285_v46, 5  ;;  %v287_v50 = vand.u32 31, %v285_v46  ;;  %p4083_p8 = scmp.lt.s32.totalorder %s6922_s27, %s4081_s5  ;;  %p4084_p10 = scmp.lt.s32.totalorder %s4082_s11, %s4076_s3 }
  0x44   : > { %p4079_p13 = pneg %p4078_p12 }
  0x45   : > { %v185_v25 = vsub.s32 32, %v184_v20  ;;  %v187_v27 = vshll.u32 %v4147_v26, %v184_v20  ;;  %v190_v29 = vshll.u32 %v4148_v28, %v184_v20  ;;  %v193_v31 = vshll.u32 %v4149_v30, %v184_v20  ;;  %p4085_p0 = por %p4084_p10, %p4083_p8 }
  0x46   : > { %v196_v33 = vshll.u32 %v4150_v32, %v184_v20  ;;  %v199_v35 = vshll.u32 %v4151_v34, %v184_v20  ;;  %vm202_vm2 = vcmp.lt.s32.totalorder %v183_v19, 1  ;;  %vm203_vm3 = vcmp.lt.s32.totalorder %v183_v19, 2 }
  0x47   : > { %v186_v36 = vshrl.u32 %v4147_v26, %v185_v25  ;;  %v188_v37 = vshrl.u32 %v4148_v28, %v185_v25  ;;  %v191_v38 = vshrl.u32 %v4149_v30, %v185_v25  ;;  %v194_v39 = vshrl.u32 %v4150_v32, %v185_v25  ;;  %p4086_p2 = pnand %p4085_p0, %p4079_p13 }
  0x48   : > { %v197_v40 = vshrl.u32 %v4151_v34, %v185_v25  ;;  %v200_v42 = vshrl.u32 %v4152_v41, %v185_v25  ;;  %vm204_vm4 = vcmp.lt.s32.totalorder %v183_v19, 3  ;;  %vm205_vm5 = vcmp.lt.s32.totalorder %v183_v19, 4 }
  0x49   : > { %v189_v43 = vor.u32 %v188_v37, %v187_v27  ;;  %v192_v44 = vor.u32 %v191_v38, %v190_v29  ;;  %v195_v45 = vor.u32 %v194_v39, %v193_v31  ;;  %v288_v58 = vsub.s32 32, %v287_v50 }
  0x4a   : > { %v198_v47 = vor.u32 %v197_v40, %v196_v33  ;;  %v201_v48 = vor.u32 %v200_v42, %v199_v35  ;;  %v290_v62 = vshll.u32 %v4147_v26, %v287_v50  ;;  %v293_v13 = vshll.u32 %v4148_v28, %v287_v50 }
  0x4b   : > { %v206_v51 = vsel %vm202_vm2, %v186_v36, %v189_v43  ;;  %v207_v52 = vsel %vm205_vm5, %v195_v45, 2102212464  ;;  %v210_v53 = vsel %vm202_vm2, %v189_v43, %v192_v44  ;;  %v214_v54 = vsel %vm202_vm2, %v192_v44, %v195_v45 }
  0x4c   : > { %v208_v55 = vsel %vm204_vm4, %v192_v44, %v207_v52  ;;  %v211_v56 = vsel %vm205_vm5, %v198_v47, 920167782  ;;  %v215_v57 = vsel %vm205_vm5, %v201_v48, 1326507024  ;;  %v289_v6 = vshrl.u32 %v4147_v26, %v288_v58 }
  0x4d   : > { %v209_v59 = vsel %vm203_vm3, %v206_v51, %v208_v55  ;;  %v212_v60 = vsel %vm204_vm4, %v195_v45, %v211_v56  ;;  %v216_v61 = vsel %vm204_vm4, %v198_v47, %v215_v57  ;;  %v291_v12 = vshrl.u32 %v4148_v28, %v288_v58  ;;  %v4366_v55 = vld [vmem:[%s4276_s30 + $0x18] sm:$0xff] }
  0x4e   : > { %v213_v63 = vsel %vm203_vm3, %v210_v53, %v212_v60  ;;  %v217_v3 = vsel %vm203_vm3, %v214_v54, %v216_v61  ;;  %v225_v5 = vmul.u32 %v4300_v21, %v209_v59  ;;  %v294_v14 = vshrl.u32 %v4149_v30, %v288_v58 }
  0x4f   : > { %v4332_v7 = vmul.u32.u64.low %v4300_v21, %v217_v3  ;;  %v4333_v9 = vmul.u32.u64.high %v4300_v21, %v217_v3, %v4332_v7  ;;  %v4336_v10 = vmul.u32.u64.low %v4300_v21, %v213_v63  ;;  %v4337_v11 = vmul.u32.u64.high %v4300_v21, %v213_v63, %v4336_v10 }
  0x50   : > { %v296_v15 = vshll.u32 %v4149_v30, %v287_v50  ;;  %v297_v16 = vshrl.u32 %v4150_v32, %v288_v58  ;;  %v299_v17 = vshll.u32 %v4150_v32, %v287_v50  ;;  %v300_v18 = vshrl.u32 %v4151_v34, %v288_v58 }
  0x51   : > { %v302_v19 = vshll.u32 %v4151_v34, %v287_v50  ;;  %v292_v20 = vor.u32 %v291_v12, %v290_v62  ;;  %v295_v25 = vor.u32 %v294_v14, %v293_v13  ;;  %v303_v21 = vshrl.u32 %v4152_v41, %v288_v58 }
  0x52   : > { %vm305_vm6 = vcmp.lt.s32.totalorder %v286_v49, 1  ;;  %vm227_vm7 = vc.u32 %v4333_v9, %v4336_v10  ;;  %v228_v27 = vadd.s32 1, %v4337_v11  ;;  %v298_v29 = vor.u32 %v297_v16, %v296_v15 }
  0x53   : > { %v3604_v31 = vadd.s32 4294967169, %v4305_v24  ;;  %v301_v33 = vor.u32 %v300_v18, %v299_v17  ;;  %v304_v35 = vor.u32 %v303_v21, %v302_v19  ;;  %vm306_vm8 = vcmp.lt.s32.totalorder %v286_v49, 2 }
  0x54   : > { %vm307_vm9 = vcmp.lt.s32.totalorder %v286_v49, 3  ;;  %v229_v36 = vsel %vm227_vm7, %v228_v27, %v4337_v11  ;;  %vm308_vm10 = vcmp.lt.s32.totalorder %v286_v49, 4  ;;  %v309_v37 = vsel %vm305_vm6, %v289_v6, %v292_v20 }
  0x55   : > { %v313_v38 = vsel %vm305_vm6, %v292_v20, %v295_v25  ;;  %v230_v39 = vadd.s32 %v229_v36, %v225_v5  ;;  %v310_v40 = vsel %vm308_vm10, %v298_v29, 2102212464  ;;  %v314_v42 = vsel %vm308_vm10, %v301_v33, 920167782 }
  0x56   : > { %v317_v43 = vsel %vm305_vm6, %v295_v25, %v298_v29  ;;  %v311_v44 = vsel %vm307_vm9, %v295_v25, %v310_v40  ;;  %v315_v45 = vsel %vm307_vm9, %v298_v29, %v314_v42  ;;  %v318_v24 = vsel %vm308_vm10, %v304_v35, 1326507024 }
  0x57   : > { %v231_v46 = vadd.s32 536870912, %v230_v39  ;;  %v316_v47 = vsel %vm306_vm8, %v313_v38, %v315_v45  ;;  %v319_v48 = vsel %vm307_vm9, %v301_v33, %v318_v24  ;;  %v383_v50 = vand.u32 8388607, %v376_v23 }
  0x58   : > { %v312_v51 = vsel %vm306_vm8, %v309_v37, %v311_v44  ;;  %v320_v52 = vsel %vm306_vm8, %v317_v43, %v319_v48  ;;  %v4361_v53 = vmul.u32.u64.low %v4302_v22, %v316_v47  ;;  %v4362_v54 = vmul.u32.u64.high %v4302_v22, %v316_v47, %v4361_v53 }
  0x59   : > { %v232_v56 = vshrl.u32 %v231_v46, 30  ;;  %v4369_v57 = vmul.u32.u64.low %v4302_v22, %v320_v52  ;;  %v4370_v58 = vmul.u32.u64.high %v4302_v22, %v320_v52, %v4369_v57  ;;  %v386_v59 = vadd.s32 1, %v3604_v31  ;;  %v4393_v31 = vld [vmem:[%s4276_s30 + $0x20] sm:$0xff] }
  0x5a   : > { %v328_v61 = vmul.u32 %v4302_v22, %v312_v51  ;;  %v331_v49 = vadd.s32 1, %v4362_v54  ;;  %v384_v62 = vor.u32 8388608, %v383_v50  ;;  %v482_v3 = vand.u32 2139095040, %v4366_v55 }
  0x5b   : > { %v233_v60 = vshll.u32 %v232_v56, 30  ;;  %vm387_vm11 = vcmp.gt.s32.totalorder %v386_v59, 0  ;;  %vm330_vm12 = vc.u32 %v4370_v58, %v4361_v53  ;;  %v479_v12 = vand.u32 2147483647, %v4366_v55 }
  0x5c   : > { %v388_v63 = vsel %vm387_vm11, %v386_v59, 0  ;;  %v332_v6 = vsel %vm330_vm12, %v331_v49, %v4362_v54  ;;  %v226_v13 = vadd.s32 %v4336_v10, %v4333_v9  ;;  %v4384_v15 = vshll.u32 %v384_v62, 8 }
  0x5d   : > { %v4375_v5 = vsub.s32 %v230_v39, %v233_v60  ;;  %v390_v7 = vand.u32 31, %v388_v63  ;;  %v333_v11 = vadd.s32 %v332_v6, %v328_v61  ;;  %v483_v16 = vshrl.u32 %v482_v3, 23 }
  0x5e   : > { %v256_v18 = vsub.s32 4, %v232_v56  ;;  %v389_v37 = vshrl.u32 %v388_v63, 5  ;;  %v4402_v38 = vand.u32 8388607, %v479_v12  ;;  %v582_v39 = vand.u32 2147483647, %v4393_v31 }
  0x5f   : > { %v236_v22 = vsub.s32 0, %v4375_v5  ;;  %v391_v14 = vsub.s32 32, %v390_v7  ;;  %v393_v19 = vshll.u32 %v4147_v26, %v390_v7  ;;  %v396_v20 = vshll.u32 %v4148_v28, %v390_v7 }
  0x60   : > { %v334_v25 = vadd.s32 536870912, %v333_v11  ;;  %v399_v29 = vshll.u32 %v4149_v30, %v390_v7  ;;  %v402_v33 = vshll.u32 %v4150_v32, %v390_v7  ;;  %v4407_v42 = vsel %vm172_vm13, %v256_v18, %v232_v56 }
  0x61   : > { %v3597_v17 = vmin.u32 %v236_v22, %v4375_v5  ;;  %v394_v21 = vshrl.u32 %v4148_v28, %v391_v14  ;;  %v397_v27 = vshrl.u32 %v4149_v30, %v391_v14  ;;  %v400_v10 = vshrl.u32 %v4150_v32, %v391_v14 }
  0x62   : > { %v403_v35 = vshrl.u32 %v4151_v34, %v391_v14  ;;  %v4398_v36 = vshrl.u32 %v334_v25, 30  ;;  %v392_v43 = vshrl.u32 %v4147_v26, %v391_v14  ;;  %v3608_v44 = vadd.s32 4294967169, %v483_v16 }
  0x63   : > { %v238_v9 = vclz %v3597_v17  ;;  %v395_v24 = vor.u32 %v394_v21, %v393_v19  ;;  %v405_v46 = vshll.u32 %v4151_v34, %v390_v7  ;;  %v406_v47 = vshrl.u32 %v4152_v41, %v391_v14 }
  0x64   : > { %v336_v45 = vshll.u32 %v4398_v36, 30  ;;  %v398_v48 = vor.u32 %v397_v27, %v396_v20  ;;  %v401_v50 = vor.u32 %v400_v10, %v399_v29  ;;  %v404_v51 = vor.u32 %v403_v35, %v402_v33 }
  0x65   : > { %v3598_v40 = vadd.s32 4294967294, %v238_v9  ;;  %vm408_vm15 = vcmp.lt.s32.totalorder %v389_v37, 1  ;;  %vm411_vm0 = vcmp.lt.s32.totalorder %v389_v37, 4  ;;  %vm409_vm2 = vcmp.lt.s32.totalorder %v389_v37, 2 }
  0x66   : > { %v4413_v54 = vsub.s32 %v333_v11, %v336_v45  ;;  %v407_v49 = vor.u32 %v406_v47, %v405_v46  ;;  %vm410_vm3 = vcmp.lt.s32.totalorder %v389_v37, 3  ;;  %v413_v62 = vsel %vm411_vm0, %v401_v50, 2102212464 }
  0x67   : > { %vm3599_vm14 = vcmp.lt.s32.totalorder %v3598_v40, 0  ;;  %v416_v6 = vsel %vm408_vm15, %v395_v24, %v398_v48  ;;  %v417_v1 = vsel %vm411_vm0, %v404_v51, 920167782  ;;  %v329_v7 = vadd.s32 %v4361_v53, %v4370_v58 }
  0x68   : > { %v241_v52 = vsel %vm3599_vm14, 0, %v3598_v40  ;;  %v339_v61 = vsub.s32 0, %v4413_v54  ;;  %v414_v11 = vsel %vm410_vm3, %v398_v48, %v413_v62  ;;  %v418_v17 = vsel %vm410_vm3, %v401_v50, %v417_v1 }
  0x69   : > { %v242_v57 = vsub.s32 32, %v241_v52  ;;  %v243_v59 = vshll.u32 %v4375_v5, %v241_v52  ;;  %v246_v60 = vsub.s32 4294967266, %v241_v52  ;;  %v412_v5 = vsel %vm408_vm15, %v392_v43, %v395_v24 }
  0x6a   : > { %v3601_v22 = vmin.u32 %v339_v61, %v4413_v54  ;;  %v489_v18 = vadd.s32 1, %v3608_v44  ;;  %vm275_vm4 = vcmp.lt.s32.totalorder %v4287_v2, 0  ;;  %v419_v19 = vsel %vm409_vm2, %v416_v6, %v418_v17 }
  0x6b   : > { %v244_v63 = vshrl.u32 %v226_v13, %v242_v57  ;;  %v247_v3 = vadd.s32 127, %v246_v60  ;;  %v420_v20 = vsel %vm408_vm15, %v398_v48, %v401_v50  ;;  %v421_v53 = vsel %vm411_vm0, %v407_v49, 1326507024 }
  0x6c   : > { %v341_v13 = vclz %v3601_v22  ;;  %v415_v21 = vsel %vm409_vm2, %v412_v5, %v414_v11  ;;  %v422_v27 = vsel %vm410_vm3, %v404_v51, %v421_v53  ;;  %vm490_vm5 = vcmp.gt.s32.totalorder %v489_v18, 0 }
  0x6d   : > { %v245_v14 = vor.u32 %v244_v63, %v243_v59  ;;  %v248_v16 = vshll.u32 %v247_v3, 23  ;;  %v423_v9 = vsel %vm409_vm2, %v420_v20, %v422_v27  ;;  %v259_v44 = vsel %vm4417_vm1, 0, %v4407_v42 }
  0x6e   : > { %v3602_v29 = vadd.s32 4294967294, %v341_v13  ;;  %v4440_v10 = vmul.u32.u64.low %v4384_v15, %v419_v19  ;;  %v4441_v33 = vmul.u32.u64.high %v4384_v15, %v419_v19, %v4440_v10  ;;  %v359_v45 = vsub.s32 4, %v4398_v36 }
  0x6f   : > { %v249_v58 = vor.u32 4788187, %v248_v16  ;;  %v252_v25 = vcvt.s32.f32 %v245_v14  ;;  %v4445_v40 = vmul.u32.u64.low %v4384_v15, %v423_v9  ;;  %v4446_v43 = vmul.u32.u64.high %v4384_v15, %v423_v9, %v4445_v40 }
  0x70   : > { %vm3603_vm6 = vcmp.lt.s32.totalorder %v3602_v29, 0  ;;  %v491_v37 = vsel %vm490_vm5, %v489_v18, 0  ;;  %vm4454_vm7 = vcmp.le.f32.partialorder %v273_v4, 0.7853982  ;;  %v431_v48 = vmul.u32 %v4384_v15, %v415_v21 }
  0x71   : > { %v250_v35 = vand.u32 2147483647, %v249_v58  ;;  %v344_v47 = vsel %vm3603_vm6, 0, %v3602_v29  ;;  %v493_v50 = vand.u32 31, %v491_v37  ;;  %v434_v42 = vadd.s32 1, %v4441_v33 }
  0x72   : > { %v345_v51 = vsub.s32 32, %v344_v47  ;;  %v346_v52 = vshll.u32 %v4413_v54, %v344_v47  ;;  %v349_v57 = vsub.s32 4294967266, %v344_v47  ;;  %vm433_vm8 = vc.u32 %v4446_v43, %v4440_v10 }
  0x73   : > { %v253_v24 = vmul.f32 %v252_v25, %v250_v35  ;;  %v487_v60 = vor.u32 8388608, %v4402_v38  ;;  %v494_v4 = vsub.s32 32, %v493_v50  ;;  %v4464_v61 = vand.u32 3, %v259_v44 }
  0x74   : > { %v347_v49 = vshrl.u32 %v329_v7, %v345_v51  ;;  %v350_v62 = vadd.s32 127, %v349_v57  ;;  %v435_v15 = vsel %vm433_vm8, %v434_v42, %v4441_v33  ;;  %v360_v54 = vsel %vm275_vm4, %v359_v45, %v4398_v36 }
  0x75   : > { %v254_v59 = vxor.u32 2147483648, %v253_v24  ;;  %v436_v3 = vadd.s32 %v435_v15, %v431_v48  ;;  %v496_v6 = vshll.u32 %v4147_v26, %v493_v50  ;;  %v497_v7 = vshrl.u32 %v4148_v28, %v494_v4 }
  0x76   : > { %v348_v1 = vor.u32 %v347_v49, %v346_v52  ;;  %v351_v22 = vshll.u32 %v350_v62, 23  ;;  %v499_v11 = vshll.u32 %v4148_v28, %v493_v50  ;;  %v500_v14 = vshrl.u32 %v4149_v30, %v494_v4 }
  0x77   : > { %v255_v63 = vsel %vm172_vm13, %v254_v59, %v253_v24  ;;  %v437_v5 = vadd.s32 536870912, %v436_v3  ;;  %v502_v17 = vshll.u32 %v4149_v30, %v493_v50  ;;  %v492_v13 = vshrl.u32 %v491_v37, 5 }
  0x78   : > { %v258_v38 = vsel %vm4417_vm1, %v4283_v0, %v255_v63  ;;  %v352_v16 = vor.u32 4788187, %v351_v22  ;;  %v355_v36 = vcvt.s32.f32 %v348_v1  ;;  %v503_v56 = vshrl.u32 %v4150_v32, %v494_v4 }
  0x79   : > { %3918 = vcosq.f32 %v258_v38  ;;  %v4480_v18 = vshrl.u32 %v437_v5, 30  ;;  %v505_v19 = vshll.u32 %v4150_v32, %v493_v50  ;;  %vm265_vm9 = vcmp.eq.s32.totalorder %v4464_v61, 0 }
  0x7a   : > { %3920 = vsinq.f32 %v258_v38  ;;  %v353_v20 = vand.u32 2147483647, %v352_v16  ;;  %v362_v53 = vsel %vm4454_vm7, 0, %v360_v54  ;;  %v506_v58 = vshrl.u32 %v4151_v34, %v494_v4 }
  0x7b   : > { %vm264_vm10 = vcmp.lt.s32.totalorder %v4464_v61, 2  ;;  %v439_v25 = vshll.u32 %v4480_v18, 30  ;;  %v498_v21 = vor.u32 %v497_v7, %v496_v6  ;;  %v508_v27 = vshll.u32 %v4151_v34, %v493_v50 }
  0x7c   : > { %v509_v29 = vshrl.u32 %v4152_v41, %v494_v4  ;;  %vm262_vm11 = vweird.f32 %v4283_v0  ;;  %v356_v9 = vmul.f32 %v355_v36, %v353_v20  ;;  %v501_v33 = vor.u32 %v500_v14, %v499_v11  ;;  %v4550_v0 = vld [vmem:[%s4276_s30 + $0x28] sm:$0xff] }
  0x7d   : > { %v504_v35 = vor.u32 %v503_v56, %v502_v17  ;;  %v507_v40 = vor.u32 %v506_v58, %v505_v19  ;;  %v4493_v44 = vsub.s32 %v436_v3, %v439_v25  ;;  %v495_v45 = vshrl.u32 %v4147_v26, %v494_v4 }
  0x7e   : > { %vm511_vm12 = vcmp.lt.s32.totalorder %v492_v13, 1  ;;  %vm514_vm13 = vcmp.lt.s32.totalorder %v492_v13, 4  ;;  %vm268_vm14 = vcmp.eq.s32.totalorder %v4464_v61, 2  ;;  %v357_v37 = vxor.u32 2147483648, %v356_v9 }
  0x7f   : > { %v4497_v24 = vand.u32 3, %v362_v53  ;;  %v516_v47 = vsel %vm514_vm13, %v504_v35, 2102212464  ;;  %v442_v48 = vsub.s32 0, %v4493_v44  ;;  %v510_v50 = vor.u32 %v509_v29, %v508_v27 }
  0x80   : > { %vm513_vm15 = vcmp.lt.s32.totalorder %v492_v13, 3  ;;  %v4501_v51 = vshll.u32 %v487_v60, 8  ;;  %v358_v52 = vsel %vm275_vm4, %v357_v37, %v356_v9  ;;  %vm512_vm0 = vcmp.lt.s32.totalorder %v492_v13, 2 }
  0x81   : > { %v519_v57 = vsel %vm511_vm12, %v498_v21, %v501_v33  ;;  %v520_v42 = vsel %vm514_vm13, %v507_v40, 920167782  ;;  %v361_v4 = vsel %vm4454_vm7, %v4287_v2, %v358_v52  ;;  %v3605_v49 = vmin.u32 %v442_v48, %v4493_v44 }
  0x82   : > { %v515_v62 = vsel %vm511_vm12, %v495_v45, %v498_v21  ;;  %v517_v60 = vsel %vm513_vm15, %v501_v33, %v516_v47  ;;  %3922 = vcosq.f32 %v361_v4  ;;  %v521_v54 = vsel %vm513_vm15, %v504_v35, %v520_v42 }
  0x83   : > { %v3919_v59 = vpop.eup %3918  ;;  %v523_v3 = vsel %vm511_vm12, %v501_v33, %v504_v35  ;;  %3924 = vsinq.f32 %v361_v4  ;;  %vm378_vm1 = vcmp.lt.s32.totalorder %v4295_v8, 0  ;;  %v444_v38 = vclz %v3605_v49 }
  0x84   : > { %v3921_v15 = vpop.eup %3920  ;;  %v269_v63 = vxor.u32 2147483648, %v3919_v59  ;;  %v522_v46 = vsel %vm512_vm0, %v519_v57, %v521_v54  ;;  %v524_v22 = vsel %vm514_vm13, %v510_v50, 1326507024  ;;  %v432_v14 = vadd.s32 %v4440_v10, %v4446_v43 }
  0x85   : > { %v266_v6 = vxor.u32 2147483648, %v3921_v15  ;;  %v4521_v7 = vmul.u32.u64.low %v4501_v51, %v522_v46  ;;  %v4522_v5 = vmul.u32.u64.high %v4501_v51, %v522_v46, %v4521_v7  ;;  %v3606_v16 = vadd.s32 4294967294, %v444_v38 }
  0x86   : > { %v270_v1 = vsel %vm268_vm14, %v269_v63, %v3921_v15  ;;  %v525_v36 = vsel %vm513_vm15, %v507_v40, %v524_v22  ;;  %v518_v56 = vsel %vm512_vm0, %v515_v62, %v517_v60  ;;  %v585_v20 = vand.u32 2139095040, %v4393_v31 }
  0x87   : > { %v267_v11 = vsel %vm265_vm9, %v3919_v59, %v266_v6  ;;  %v526_v19 = vsel %vm512_vm0, %v523_v3, %v525_v36  ;;  %vm365_vm2 = vweird.f32 %v4287_v2  ;;  %vm3607_vm3 = vcmp.lt.s32.totalorder %v3606_v16, 0 }
  0x88   : > { %v271_v17 = vsel %vm264_vm10, %v267_v11, %v270_v1  ;;  %v4539_v10 = vmul.u32.u64.low %v4501_v51, %v526_v19  ;;  %v4540_v43 = vmul.u32.u64.high %v4501_v51, %v526_v19, %v4539_v10  ;;  %v447_v58 = vsel %vm3607_vm3, 0, %v3606_v16 }
  0x89   : > { %v272_v53 = vsel %vm262_vm11, nan, %v271_v17  ;;  %v462_v61 = vsub.s32 4, %v4480_v18  ;;  %v537_v25 = vadd.s32 1, %v4522_v5  ;;  %v586_v21 = vshrl.u32 %v585_v20, 23 }
  0x8a   : > { %3466 = vst [vmem:[%s4546_s17] sm:$0xff] %v272_v53  ;;  %v448_v13 = vsub.s32 32, %v447_v58  ;;  %v449_v27 = vshll.u32 %v4493_v44, %v447_v58  ;;  %v452_v29 = vsub.s32 4294967266, %v447_v58  ;;  %v534_v9 = vmul.u32 %v4501_v51, %v518_v56 }
  0x8b   : > { %vm368_vm4 = vcmp.eq.s32.totalorder %v4497_v24, 0  ;;  %vm4557_vm5 = vcmp.le.f32.partialorder %v376_v23, 0.7853982  ;;  %v3612_v35 = vadd.s32 4294967169, %v586_v21  ;;  %v589_v40 = vand.u32 8388607, %v582_v39 }
  0x8c   : > { %vm371_vm6 = vcmp.eq.s32.totalorder %v4497_v24, 2  ;;  %v450_v45 = vshrl.u32 %v432_v14, %v448_v13  ;;  %v453_v37 = vadd.s32 127, %v452_v29  ;;  %vm536_vm7 = vc.u32 %v4540_v43, %v4521_v7  ;;  %v3923_v44 = vpop.eup %3922 }
  0x8d   : > { %v463_v47 = vsel %vm378_vm1, %v462_v61, %v4480_v18  ;;  %v538_v23 = vsel %vm536_vm7, %v537_v25, %v4522_v5  ;;  %v592_v48 = vadd.s32 1, %v3612_v35  ;;  %v688_v50 = vand.u32 2139095040, %v4550_v0  ;;  %v3925_v51 = vpop.eup %3924 }
  0x8e   : > { %v372_v52 = vxor.u32 2147483648, %v3923_v44  ;;  %v451_v57 = vor.u32 %v450_v45, %v449_v27  ;;  %v454_v42 = vshll.u32 %v453_v37, 23  ;;  %v539_v59 = vadd.s32 %v538_v23, %v534_v9 }
  0x8f   : > { %vm367_vm8 = vcmp.lt.s32.totalorder %v4497_v24, 2  ;;  %v369_v4 = vxor.u32 2147483648, %v3925_v51  ;;  %v590_v49 = vor.u32 8388608, %v589_v40  ;;  %vm593_vm9 = vcmp.gt.s32.totalorder %v592_v48, 0 }
  0x90   : > { %v373_v62 = vsel %vm371_vm6, %v372_v52, %v3925_v51  ;;  %v455_v60 = vor.u32 4788187, %v454_v42  ;;  %v458_v18 = vcvt.s32.f32 %v451_v57  ;;  %v540_v15 = vadd.s32 536870912, %v539_v59 }
  0x91   : > { %v370_v63 = vsel %vm368_vm4, %v3923_v44, %v369_v4  ;;  %v465_v54 = vsel %vm4557_vm5, 0, %v463_v47  ;;  %v594_v3 = vsel %vm593_vm9, %v592_v48, 0  ;;  %v689_v1 = vshrl.u32 %v688_v50, 23 }
  0x92   : > { %v374_v6 = vsel %vm367_vm8, %v370_v63, %v373_v62  ;;  %v456_v38 = vand.u32 2147483647, %v455_v60  ;;  %v4578_v46 = vshrl.u32 %v540_v15, 30  ;;  %v596_v5 = vand.u32 31, %v594_v3 }
  0x93   : > { %v375_v22 = vsel %vm365_vm2, nan, %v374_v6  ;;  %v4582_v14 = vand.u32 3, %v465_v54  ;;  %v4585_v24 = vshll.u32 %v590_v49, 8  ;;  %v685_v19 = vand.u32 2147483647, %v4550_v0 }
  0x94   : > { %v459_v11 = vmul.f32 %v458_v18, %v456_v38  ;;  %v542_v16 = vshll.u32 %v4578_v46, 30  ;;  %3467 = vst [vmem:[%s4546_s17 + $0x8] sm:$0xff] %v375_v22  ;;  %v597_v36 = vsub.s32 32, %v596_v5  ;;  %v599_v17 = vshll.u32 %v4147_v26, %v596_v5 }
  0x95   : > { %v602_v56 = vshll.u32 %v4148_v28, %v596_v5  ;;  %v595_v2 = vshrl.u32 %v594_v3, 5  ;;  %v3616_v10 = vadd.s32 4294967169, %v689_v1  ;;  %v605_v25 = vshll.u32 %v4149_v30, %v596_v5 }
  0x96   : > { %v460_v20 = vxor.u32 2147483648, %v459_v11  ;;  %v4591_v53 = vsub.s32 %v539_v59, %v542_v16  ;;  %v600_v58 = vshrl.u32 %v4148_v28, %v597_v36  ;;  %v603_v61 = vshrl.u32 %v4149_v30, %v597_v36 }
  0x97   : > { %v608_v21 = vshll.u32 %v4150_v32, %v596_v5  ;;  %v598_v29 = vshrl.u32 %v4147_v26, %v597_v36  ;;  %v606_v9 = vshrl.u32 %v4150_v32, %v597_v36  ;;  %v609_v37 = vshrl.u32 %v4151_v34, %v597_v36 }
  0x98   : > { %v461_v13 = vsel %vm378_vm1, %v460_v20, %v459_v11  ;;  %v545_v27 = vsub.s32 0, %v4591_v53  ;;  %v601_v40 = vor.u32 %v600_v58, %v599_v17  ;;  %v604_v45 = vor.u32 %v603_v61, %v602_v56 }
  0x99   : > { %v464_v35 = vsel %vm4557_vm5, %v4295_v8, %v461_v13  ;;  %v535_v44 = vadd.s32 %v4521_v7, %v4540_v43  ;;  %vm614_vm10 = vcmp.lt.s32.totalorder %v595_v2, 1  ;;  %v607_v23 = vor.u32 %v606_v9, %v605_v25 }
  0x9a   : > { %3926 = vcosq.f32 %v464_v35  ;;  %v3609_v47 = vmin.u32 %v545_v27, %v4591_v53  ;;  %v610_v48 = vor.u32 %v609_v37, %v608_v21  ;;  %v695_v50 = vadd.s32 1, %v3616_v10 }
  0x9b   : > { %3928 = vsinq.f32 %v464_v35  ;;  %v611_v52 = vshll.u32 %v4151_v34, %v596_v5  ;;  %v612_v33 = vshrl.u32 %v4152_v41, %v597_v36  ;;  %vm615_vm11 = vcmp.lt.s32.totalorder %v595_v2, 2 }
  0x9c   : > { %v547_v51 = vclz %v3609_v47  ;;  %vm616_vm12 = vcmp.lt.s32.totalorder %v595_v2, 3  ;;  %vm617_vm13 = vcmp.lt.s32.totalorder %v595_v2, 4  ;;  %v618_v57 = vsel %vm614_vm10, %v598_v29, %v601_v40 }
  0x9d   : > { %v622_v42 = vsel %vm614_vm10, %v601_v40, %v604_v45  ;;  %vm470_vm14 = vcmp.lt.s32.totalorder %v4582_v14, 2  ;;  %v613_v43 = vor.u32 %v612_v33, %v611_v52  ;;  %v619_v59 = vsel %vm617_vm13, %v607_v23, 2102212464 }
  0x9e   : > { %v3610_v7 = vadd.s32 4294967294, %v547_v51  ;;  %v623_v4 = vsel %vm617_vm13, %v610_v48, 920167782  ;;  %vm468_vm15 = vweird.f32 %v4295_v8  ;;  %v620_v49 = vsel %vm616_vm12, %v604_v45, %v619_v59 }
  0x9f   : > { %v624_v62 = vsel %vm616_vm12, %v607_v23, %v623_v4  ;;  %v626_v60 = vsel %vm614_vm10, %v604_v45, %v607_v23  ;;  %vm696_vm0 = vcmp.gt.s32.totalorder %v695_v50, 0  ;;  %v621_v18 = vsel %vm615_vm11, %v618_v57, %v620_v49 }
  0xa0   : > { %vm3611_vm1 = vcmp.lt.s32.totalorder %v3610_v7, 0  ;;  %v625_v15 = vsel %vm615_vm11, %v622_v42, %v624_v62  ;;  %v627_v63 = vsel %vm617_vm13, %v613_v43, 1326507024  ;;  %v692_v17 = vand.u32 8388607, %v685_v19 }
  0xa1   : > { %v550_v54 = vsel %vm3611_vm1, 0, %v3610_v7  ;;  %v628_v3 = vsel %vm616_vm12, %v610_v48, %v627_v63  ;;  %v4625_v6 = vmul.u32.u64.low %v4585_v24, %v625_v15  ;;  %v4626_v38 = vmul.u32.u64.high %v4585_v24, %v625_v15, %v4625_v6 }
  0xa2   : > { %v551_v1 = vsub.s32 32, %v550_v54  ;;  %v552_v22 = vshll.u32 %v4591_v53, %v550_v54  ;;  %v555_v5 = vsub.s32 4294967266, %v550_v54  ;;  %v629_v11 = vsel %vm615_vm11, %v626_v60, %v628_v3 }
  0xa3   : > { %v4632_v16 = vmul.u32.u64.low %v4585_v24, %v629_v11  ;;  %v4633_v36 = vmul.u32.u64.high %v4585_v24, %v629_v11, %v4632_v16  ;;  %v697_v56 = vsel %vm696_vm0, %v695_v50, 0  ;;  %vm474_vm2 = vcmp.eq.s32.totalorder %v4582_v14, 2 }
  0xa4   : > { %v3927_v20 = vpop.eup %3926  ;;  %v553_v10 = vshrl.u32 %v535_v44, %v551_v1  ;;  %v556_v58 = vadd.s32 127, %v555_v5  ;;  %v699_v61 = vand.u32 31, %v697_v56  ;;  %vm471_vm3 = vcmp.eq.s32.totalorder %v4582_v14, 0 }
  0xa5   : > { %v3929_v25 = vpop.eup %3928  ;;  %v475_v53 = vxor.u32 2147483648, %v3927_v20  ;;  %v637_v2 = vmul.u32 %v4585_v24, %v621_v18  ;;  %v640_v21 = vadd.s32 1, %v4626_v38  ;;  %vm481_vm4 = vcmp.lt.s32.totalorder %v4366_v55, 0 }
  0xa6   : > { %v472_v13 = vxor.u32 2147483648, %v3929_v25  ;;  %v554_v27 = vor.u32 %v553_v10, %v552_v22  ;;  %v557_v29 = vshll.u32 %v556_v58, 23  ;;  %v700_v9 = vsub.s32 32, %v699_v61 }
  0xa7   : > { %v476_v35 = vsel %vm474_vm2, %v475_v53, %v3929_v25  ;;  %vm639_vm5 = vc.u32 %v4633_v36, %v4625_v6  ;;  %v693_v40 = vor.u32 8388608, %v692_v17  ;;  %v565_v23 = vsub.s32 4, %v4578_v46 }
  0xa8   : > { %v473_v45 = vsel %vm471_vm3, %v3927_v20, %v472_v13  ;;  %v558_v37 = vor.u32 4788187, %v557_v29  ;;  %v561_v44 = vcvt.s32.f32 %v554_v27  ;;  %v641_v47 = vsel %vm639_vm5, %v640_v21, %v4626_v38  ;;  %v4690_v13 = vld [vmem:[%s4276_s30 + $0x30] sm:$0xff] }
  0xa9   : > { %v477_v24 = vsel %vm470_vm14, %v473_v45, %v476_v35  ;;  %v642_v48 = vadd.s32 %v641_v47, %v637_v2  ;;  %v702_v50 = vshll.u32 %v4147_v26, %v699_v61  ;;  %v703_v33 = vshrl.u32 %v4148_v28, %v700_v9 }
  0xaa   : > { %v478_v51 = vsel %vm468_vm15, nan, %v477_v24  ;;  %v559_v52 = vand.u32 2147483647, %v558_v37  ;;  %v705_v57 = vshll.u32 %v4148_v28, %v699_v61  ;;  %v706_v7 = vshrl.u32 %v4149_v30, %v700_v9 }
  0xab   : > { %v643_v42 = vadd.s32 536870912, %v642_v48  ;;  %v708_v43 = vshll.u32 %v4149_v30, %v699_v61  ;;  %v709_v14 = vshrl.u32 %v4150_v32, %v700_v9  ;;  %3468 = vst [vmem:[%s4546_s17 + $0x10] sm:$0xff] %v478_v51  ;;  %v698_v4 = vshrl.u32 %v697_v56, 5 }
  0xac   : > { %v562_v59 = vmul.f32 %v561_v44, %v559_v52  ;;  %v711_v49 = vshll.u32 %v4150_v32, %v699_v61  ;;  %v712_v8 = vshrl.u32 %v4151_v34, %v700_v9  ;;  %vm4661_vm6 = vcmp.le.f32.partialorder %v479_v12, 0.7853982 }
  0xad   : > { %v4665_v60 = vshrl.u32 %v643_v42, 30  ;;  %v714_v18 = vshll.u32 %v4151_v34, %v699_v61  ;;  %v715_v15 = vshrl.u32 %v4152_v41, %v700_v9  ;;  %v566_v54 = vsel %vm481_vm4, %v565_v23, %v4578_v46 }
  0xae   : > { %v563_v63 = vxor.u32 2147483648, %v562_v59  ;;  %v713_v3 = vor.u32 %v712_v8, %v711_v49  ;;  %v4672_v38 = vshll.u32 %v693_v40, 8  ;;  %v704_v12 = vor.u32 %v703_v33, %v702_v50 }
  0xaf   : > { %v645_v1 = vshll.u32 %v4665_v60, 30  ;;  %v707_v22 = vor.u32 %v706_v7, %v705_v57  ;;  %v710_v5 = vor.u32 %v709_v14, %v708_v43  ;;  %v716_v16 = vor.u32 %v715_v15, %v714_v18  ;;  %v4720_v43 = vld [vmem:[%s4276_s30 + $0x38] sm:$0xff] }
  0xb0   : > { %v564_v11 = vsel %vm481_vm4, %v563_v63, %v562_v59  ;;  %vm717_vm7 = vcmp.lt.s32.totalorder %v698_v4, 1  ;;  %vm720_vm8 = vcmp.lt.s32.totalorder %v698_v4, 4  ;;  %v701_v56 = vshrl.u32 %v4147_v26, %v700_v9 }
  0xb1   : > { %v567_v17 = vsel %vm4661_vm6, %v4366_v55, %v564_v11  ;;  %v4680_v46 = vsub.s32 %v642_v48, %v645_v1  ;;  %vm719_vm9 = vcmp.lt.s32.totalorder %v698_v4, 3  ;;  %v568_v20 = vsel %vm4661_vm6, 0, %v566_v54 }
  0xb2   : > { %3930 = vcosq.f32 %v567_v17  ;;  %v722_v10 = vsel %vm720_vm8, %v710_v5, 2102212464  ;;  %v726_v58 = vsel %vm720_vm8, %v713_v3, 920167782  ;;  %vm718_vm10 = vcmp.lt.s32.totalorder %v698_v4, 2 }
  0xb3   : > { %3932 = vsinq.f32 %v567_v17  ;;  %v648_v61 = vsub.s32 0, %v4680_v46  ;;  %v725_v25 = vsel %vm717_vm7, %v704_v12, %v707_v22  ;;  %v727_v53 = vsel %vm719_vm9, %v710_v5, %v726_v58 }
  0xb4   : > { %v729_v2 = vsel %vm717_vm7, %v707_v22, %v710_v5  ;;  %v730_v21 = vsel %vm720_vm8, %v716_v16, 1326507024  ;;  %v572_v27 = vand.u32 3, %v568_v20  ;;  %v721_v9 = vsel %vm717_vm7, %v701_v56, %v704_v12 }
  0xb5   : > { %v3613_v29 = vmin.u32 %v648_v61, %v4680_v46  ;;  %v723_v35 = vsel %vm719_vm9, %v707_v22, %v722_v10  ;;  %v668_v40 = vsub.s32 4, %v4665_v60  ;;  %v728_v45 = vsel %vm718_vm10, %v725_v25, %v727_v53 }
  0xb6   : > { %v731_v37 = vsel %vm719_vm9, %v713_v3, %v730_v21  ;;  %vm571_vm11 = vweird.f32 %v4366_v55  ;;  %v4701_v24 = vmul.u32.u64.low %v4672_v38, %v728_v45  ;;  %v4702_v23 = vmul.u32.u64.high %v4672_v38, %v728_v45, %v4701_v24 }
  0xb7   : > { %v650_v44 = vclz %v3613_v29  ;;  %v732_v47 = vsel %vm718_vm10, %v729_v2, %v731_v37  ;;  %v724_v48 = vsel %vm718_vm10, %v721_v9, %v723_v35  ;;  %v791_v52 = vand.u32 2139095040, %v4690_v13 }
  0xb8   : > { %v4707_v50 = vmul.u32.u64.low %v4672_v38, %v732_v47  ;;  %v4708_v51 = vmul.u32.u64.high %v4672_v38, %v732_v47, %v4707_v50  ;;  %vm573_vm12 = vcmp.lt.s32.totalorder %v572_v27, 2  ;;  %vm4713_vm13 = vcmp.le.f32.partialorder %v582_v39, 0.7853982 }
  0xb9   : > { %vm584_vm14 = vcmp.lt.s32.totalorder %v4393_v31, 0  ;;  %v3614_v57 = vadd.s32 4294967294, %v650_v44  ;;  %vm574_vm15 = vcmp.eq.s32.totalorder %v572_v27, 0  ;;  %vm577_vm0 = vcmp.eq.s32.totalorder %v572_v27, 2 }
  0xba   : > { %v788_v42 = vand.u32 2147483647, %v4690_v13  ;;  %v792_v7 = vshrl.u32 %v791_v52, 23  ;;  %v638_v14 = vadd.s32 %v4625_v6, %v4633_v36  ;;  %v740_v59 = vmul.u32 %v4672_v38, %v724_v48 }
  0xbb   : > { %vm3615_vm1 = vcmp.lt.s32.totalorder %v3614_v57, 0  ;;  %v743_v39 = vadd.s32 1, %v4702_v23  ;;  %v669_v8 = vsel %vm584_vm14, %v668_v40, %v4665_v60  ;;  %vm742_vm2 = vc.u32 %v4708_v51, %v4701_v24 }
  0xbc   : > { %v3931_v4 = vpop.eup %3930  ;;  %v653_v49 = vsel %vm3615_vm1, 0, %v3614_v57  ;;  %v3620_v62 = vadd.s32 4294967169, %v792_v7  ;;  %v894_v1 = vand.u32 2139095040, %v4720_v43  ;;  %v671_v16 = vsel %vm4713_vm13, 0, %v669_v8 }
  0xbd   : > { %v3933_v18 = vpop.eup %3932  ;;  %v578_v15 = vxor.u32 2147483648, %v3931_v4  ;;  %v654_v63 = vsub.s32 32, %v653_v49  ;;  %v655_v6 = vshll.u32 %v4680_v46, %v653_v49  ;;  %v658_v36 = vsub.s32 4294967266, %v653_v49 }
  0xbe   : > { %v575_v54 = vxor.u32 2147483648, %v3933_v18  ;;  %v744_v3 = vsel %vm742_vm2, %v743_v39, %v4702_v23  ;;  %v798_v38 = vadd.s32 1, %v3620_v62  ;;  %v4740_v17 = vand.u32 8388607, %v788_v42 }
  0xbf   : > { %v579_v12 = vsel %vm577_vm0, %v578_v15, %v3933_v18  ;;  %v656_v22 = vshrl.u32 %v638_v14, %v654_v63  ;;  %v659_v60 = vadd.s32 127, %v658_v36  ;;  %v745_v5 = vadd.s32 %v744_v3, %v740_v59 }
  0xc0   : > { %v576_v11 = vsel %vm574_vm15, %v3931_v4, %v575_v54  ;;  %vm799_vm3 = vcmp.gt.s32.totalorder %v798_v38, 0  ;;  %v891_v25 = vand.u32 2147483647, %v4720_v43  ;;  %v895_v53 = vshrl.u32 %v894_v1, 23 }
  0xc1   : > { %v580_v46 = vsel %vm573_vm12, %v576_v11, %v579_v12  ;;  %v657_v56 = vor.u32 %v656_v22, %v655_v6  ;;  %v660_v20 = vshll.u32 %v659_v60, 23  ;;  %v746_v10 = vadd.s32 536870912, %v745_v5 }
  0xc2   : > { %v581_v58 = vsel %vm571_vm11, nan, %v580_v46  ;;  %v800_v61 = vsel %vm799_vm3, %v798_v38, 0  ;;  %v4749_v40 = vand.u32 3, %v671_v16  ;;  %v796_v45 = vor.u32 8388608, %v4740_v17 }
  0xc3   : > { %v661_v2 = vor.u32 4788187, %v660_v20  ;;  %v664_v21 = vcvt.s32.f32 %v657_v56  ;;  %v4746_v29 = vshrl.u32 %v746_v10, 30  ;;  %3469 = vst [vmem:[%s4546_s17 + $0x18] sm:$0xff] %v581_v58  ;;  %v802_v9 = vand.u32 31, %v800_v61 }
  0xc4   : > { %v3624_v44 = vadd.s32 4294967169, %v895_v53  ;;  %v4756_v47 = vand.u32 8388607, %v891_v25  ;;  %v801_v50 = vshrl.u32 %v800_v61, 5  ;;  %v741_v4 = vadd.s32 %v4701_v24, %v4708_v51 }
  0xc5   : > { %v662_v35 = vand.u32 2147483647, %v661_v2  ;;  %v748_v27 = vshll.u32 %v4746_v29, 30  ;;  %v803_v37 = vsub.s32 32, %v802_v9  ;;  %v805_v55 = vshll.u32 %v4147_v26, %v802_v9 }
  0xc6   : > { %v808_v52 = vshll.u32 %v4148_v28, %v802_v9  ;;  %v811_v14 = vshll.u32 %v4149_v30, %v802_v9  ;;  %v814_v59 = vshll.u32 %v4150_v32, %v802_v9  ;;  %v901_v63 = vadd.s32 1, %v3624_v44 }
  0xc7   : > { %v665_v23 = vmul.f32 %v664_v21, %v662_v35  ;;  %v4758_v48 = vsub.s32 %v745_v5, %v748_v27  ;;  %v806_v57 = vshrl.u32 %v4148_v28, %v803_v37  ;;  %v809_v7 = vshrl.u32 %v4149_v30, %v803_v37 }
  0xc8   : > { %v812_v8 = vshrl.u32 %v4150_v32, %v803_v37  ;;  %v804_v62 = vshrl.u32 %v4147_v26, %v803_v37  ;;  %v815_v15 = vshrl.u32 %v4151_v34, %v803_v37  ;;  %v817_v3 = vshll.u32 %v4151_v34, %v802_v9 }
  0xc9   : > { %v666_v39 = vxor.u32 2147483648, %v665_v23  ;;  %v751_v49 = vsub.s32 0, %v4758_v48  ;;  %v807_v18 = vor.u32 %v806_v57, %v805_v55  ;;  %v810_v54 = vor.u32 %v809_v7, %v808_v52 }
  0xca   : > { %v813_v51 = vor.u32 %v812_v8, %v811_v14  ;;  %v816_v38 = vor.u32 %v815_v15, %v814_v59  ;;  %vm820_vm4 = vcmp.lt.s32.totalorder %v801_v50, 1  ;;  %v818_v12 = vshrl.u32 %v4152_v41, %v803_v37 }
  0xcb   : > { %v667_v6 = vsel %vm584_vm14, %v666_v39, %v665_v23  ;;  %v3617_v36 = vmin.u32 %v751_v49, %v4758_v48  ;;  %vm821_vm5 = vcmp.lt.s32.totalorder %v801_v50, 2  ;;  %vm822_vm6 = vcmp.lt.s32.totalorder %v801_v50, 3 }
  0xcc   : > { %v670_v24 = vsel %vm4713_vm13, %v4393_v31, %v667_v6  ;;  %vm823_vm7 = vcmp.lt.s32.totalorder %v801_v50, 4  ;;  %v824_v22 = vsel %vm820_vm4, %v804_v62, %v807_v18  ;;  %v819_v5 = vor.u32 %v818_v12, %v817_v3 }
  0xcd   : > { %3934 = vcosq.f32 %v670_v24  ;;  %v753_v1 = vclz %v3617_v36  ;;  %v825_v11 = vsel %vm823_vm7, %v813_v51, 2102212464  ;;  %v828_v16 = vsel %vm820_vm4, %v807_v18, %v810_v54 }
  0xce   : > { %3936 = vsinq.f32 %v670_v24  ;;  %v826_v17 = vsel %vm822_vm6, %v810_v54, %v825_v11  ;;  %v829_v33 = vsel %vm823_vm7, %v816_v38, 920167782  ;;  %v832_v46 = vsel %vm820_vm4, %v810_v54, %v813_v51 }
  0xcf   : > { %v3618_v60 = vadd.s32 4294967294, %v753_v1  ;;  %v836_v56 = vshll.u32 %v796_v45, 8  ;;  %v830_v20 = vsel %vm822_vm6, %v813_v51, %v829_v33  ;;  %v833_v10 = vsel %vm823_vm7, %v819_v5, 1326507024 }
  0xd0   : > { %vm902_vm9 = vcmp.gt.s32.totalorder %v901_v63, 0  ;;  %v827_v61 = vsel %vm821_vm5, %v824_v22, %v826_v17  ;;  %v831_v53 = vsel %vm821_vm5, %v828_v16, %v830_v20  ;;  %v834_v2 = vsel %vm822_vm6, %v816_v38, %v833_v10 }
  0xd1   : > { %vm3619_vm8 = vcmp.lt.s32.totalorder %v3618_v60, 0  ;;  %v835_v27 = vsel %vm821_vm5, %v832_v46, %v834_v2  ;;  %v4789_v55 = vmul.u32.u64.low %v836_v56, %v831_v53  ;;  %v4790_v44 = vmul.u32.u64.high %v836_v56, %v831_v53, %v4789_v55 }
  0xd2   : > { %v756_v58 = vsel %vm3619_vm8, 0, %v3618_v60  ;;  %v4786_v37 = vmul.u32.u64.low %v836_v56, %v835_v27  ;;  %v4787_v45 = vmul.u32.u64.high %v836_v56, %v835_v27, %v4786_v37  ;;  %vm674_vm10 = vweird.f32 %v4393_v31 }
  0xd3   : > { %v757_v21 = vsub.s32 32, %v756_v58  ;;  %v758_v9 = vshll.u32 %v4758_v48, %v756_v58  ;;  %v761_v35 = vsub.s32 4294967266, %v756_v58  ;;  %v903_v57 = vsel %vm902_vm9, %v901_v63, 0 }
  0xd4   : > { %vm676_vm11 = vcmp.lt.s32.totalorder %v4749_v40, 2  ;;  %vm677_vm12 = vcmp.eq.s32.totalorder %v4749_v40, 0  ;;  %vm687_vm13 = vcmp.lt.s32.totalorder %v4550_v0, 0  ;;  %v905_v48 = vand.u32 31, %v903_v57 }
  0xd5   : > { %v759_v23 = vshrl.u32 %v741_v4, %v757_v21  ;;  %v762_v52 = vadd.s32 127, %v761_v35  ;;  %vm680_vm14 = vcmp.eq.s32.totalorder %v4749_v40, 2  ;;  %v843_v59 = vmul.u32 %v836_v56, %v827_v61  ;;  %v4835_v21 = vld [vmem:[%s4276_s30 + $0x40] sm:$0xff] }
  0xd6   : > { %vm845_vm15 = vc.u32 %v4787_v45, %v4789_v55  ;;  %v846_v4 = vadd.s32 1, %v4790_v44  ;;  %v899_v8 = vor.u32 8388608, %v4756_v47  ;;  %v906_v63 = vsub.s32 32, %v905_v48 }
  0xd7   : > { %v3935_v50 = vpop.eup %3934  ;;  %v760_v7 = vor.u32 %v759_v23, %v758_v9  ;;  %v763_v14 = vshll.u32 %v762_v52, 23  ;;  %v771_v36 = vsub.s32 4, %v4746_v29  ;;  %v908_v3 = vshll.u32 %v4147_v26, %v905_v48 }
  0xd8   : > { %v3937_v39 = vpop.eup %3936  ;;  %v681_v49 = vxor.u32 2147483648, %v3935_v50  ;;  %v847_v54 = vsel %vm845_vm15, %v846_v4, %v4790_v44  ;;  %v911_v1 = vshll.u32 %v4148_v28, %v905_v48  ;;  %v909_v12 = vshrl.u32 %v4148_v28, %v906_v63 }
  0xd9   : > { %v678_v62 = vxor.u32 2147483648, %v3937_v39  ;;  %v764_v18 = vor.u32 4788187, %v763_v14  ;;  %v767_v15 = vcvt.s32.f32 %v760_v7  ;;  %v848_v38 = vadd.s32 %v847_v54, %v843_v59 }
  0xda   : > { %v682_v6 = vsel %vm680_vm14, %v681_v49, %v3937_v39  ;;  %v912_v22 = vshrl.u32 %v4149_v30, %v906_v63  ;;  %v914_v60 = vshll.u32 %v4149_v30, %v905_v48  ;;  %v915_v17 = vshrl.u32 %v4150_v32, %v906_v63 }
  0xdb   : > { %v679_v24 = vsel %vm677_vm12, %v3935_v50, %v678_v62  ;;  %v765_v51 = vand.u32 2147483647, %v764_v18  ;;  %v849_v16 = vadd.s32 536870912, %v848_v38  ;;  %vm4818_vm0 = vcmp.le.f32.partialorder %v685_v19, 0.7853982 }
  0xdc   : > { %v683_v47 = vsel %vm676_vm11, %v679_v24, %v682_v6  ;;  %v904_v40 = vshrl.u32 %v903_v57, 5  ;;  %v917_v46 = vshll.u32 %v4150_v32, %v905_v48  ;;  %v918_v56 = vshrl.u32 %v4151_v34, %v906_v63  ;;  %v4862_v6 = vld [vmem:[%s4276_s30 + $0x48] sm:$0xff] }
  0xdd   : > { %v684_v5 = vsel %vm674_vm10, nan, %v683_v47  ;;  %v768_v11 = vmul.f32 %v767_v15, %v765_v51  ;;  %v4825_v31 = vshrl.u32 %v849_v16, 30  ;;  %v920_v10 = vshll.u32 %v4151_v34, %v905_v48 }
  0xde   : > { %3470 = vst [vmem:[%s4546_s17 + $0x20] sm:$0xff] %v684_v5  ;;  %v4828_v58 = vshll.u32 %v899_v8, 8  ;;  %v772_v19 = vsel %vm687_vm13, %v771_v36, %v4746_v29  ;;  %v910_v61 = vor.u32 %v909_v12, %v908_v3  ;;  %v913_v53 = vor.u32 %v912_v22, %v911_v1 }
  0xdf   : > { %v769_v20 = vxor.u32 2147483648, %v768_v11  ;;  %v921_v2 = vshrl.u32 %v4152_v41, %v906_v63  ;;  %v851_v35 = vshll.u32 %v4825_v31, 30  ;;  %v916_v27 = vor.u32 %v915_v17, %v914_v60 }
  0xe0   : > { %v919_v37 = vor.u32 %v918_v56, %v917_v46  ;;  %vm923_vm1 = vcmp.lt.s32.totalorder %v904_v40, 1  ;;  %vm926_vm2 = vcmp.lt.s32.totalorder %v904_v40, 4  ;;  %v907_v52 = vshrl.u32 %v4147_v26, %v906_v63 }
  0xe1   : > { %v770_v9 = vsel %vm687_vm13, %v769_v20, %v768_v11  ;;  %v922_v23 = vor.u32 %v921_v2, %v920_v10  ;;  %v4843_v29 = vsub.s32 %v848_v38, %v851_v35  ;;  %vm925_vm3 = vcmp.lt.s32.totalorder %v904_v40, 3 }
  0xe2   : > { %v773_v44 = vsel %vm4818_vm0, %v4550_v0, %v770_v9  ;;  %v774_v57 = vsel %vm4818_vm0, 0, %v772_v19  ;;  %v928_v48 = vsel %vm926_vm2, %v916_v27, 2102212464  ;;  %v997_v50 = vand.u32 2139095040, %v4835_v21 }
  0xe3   : > { %3938 = vcosq.f32 %v773_v44  ;;  %vm790_vm4 = vcmp.lt.s32.totalorder %v4690_v13, 0  ;;  %v854_v7 = vsub.s32 0, %v4843_v29  ;;  %vm924_vm5 = vcmp.lt.s32.totalorder %v904_v40, 2 }
  0xe4   : > { %3940 = vsinq.f32 %v773_v44  ;;  %v931_v14 = vsel %vm923_vm1, %v910_v61, %v913_v53  ;;  %v932_v59 = vsel %vm926_vm2, %v919_v37, 920167782  ;;  %v935_v49 = vsel %vm923_vm1, %v913_v53, %v916_v27 }
  0xe5   : > { %v933_v39 = vsel %vm925_vm3, %v916_v27, %v932_v59  ;;  %v936_v4 = vsel %vm926_vm2, %v922_v23, 1326507024  ;;  %v994_v8 = vand.u32 2147483647, %v4835_v21  ;;  %v778_v62 = vand.u32 3, %v774_v57 }
  0xe6   : > { %v3621_v18 = vmin.u32 %v854_v7, %v4843_v29  ;;  %v927_v15 = vsel %vm923_vm1, %v907_v52, %v910_v61  ;;  %v929_v63 = vsel %vm925_vm3, %v913_v53, %v928_v48  ;;  %vm777_vm6 = vweird.f32 %v4550_v0 }
  0xe7   : > { %v874_v36 = vsub.s32 4, %v4825_v31  ;;  %v934_v54 = vsel %vm924_vm5, %v931_v14, %v933_v39  ;;  %v937_v3 = vsel %vm925_vm3, %v919_v37, %v936_v4  ;;  %v998_v24 = vshrl.u32 %v997_v50, 23 }
  0xe8   : > { %vm4870_vm7 = vcmp.le.f32.partialorder %v788_v42, 0.7853982  ;;  %v856_v38 = vclz %v3621_v18  ;;  %v938_v1 = vsel %vm924_vm5, %v935_v49, %v937_v3  ;;  %v930_v22 = vsel %vm924_vm5, %v927_v15, %v929_v63 }
  0xe9   : > { %v4876_v47 = vmul.u32.u64.low %v4828_v58, %v934_v54  ;;  %v4877_v12 = vmul.u32.u64.high %v4828_v58, %v934_v54, %v4876_v47  ;;  %v4882_v60 = vmul.u32.u64.low %v4828_v58, %v938_v1  ;;  %v4883_v5 = vmul.u32.u64.high %v4828_v58, %v938_v1, %v4882_v60 }
  0xea   : > { %v3628_v11 = vadd.s32 4294967169, %v998_v24  ;;  %vm779_vm8 = vcmp.lt.s32.totalorder %v778_v62, 2  ;;  %vm780_vm9 = vcmp.eq.s32.totalorder %v778_v62, 0  ;;  %v3622_v42 = vadd.s32 4294967294, %v856_v38 }
  0xeb   : > { %v1100_v16 = vand.u32 2139095040, %v4862_v6  ;;  %vm783_vm10 = vcmp.eq.s32.totalorder %v778_v62, 2  ;;  %v844_v17 = vadd.s32 %v4789_v55, %v4787_v45  ;;  %v1001_v33 = vand.u32 8388607, %v994_v8 }
  0xec   : > { %v1004_v46 = vadd.s32 1, %v3628_v11  ;;  %vm3623_vm11 = vcmp.lt.s32.totalorder %v3622_v42, 0  ;;  %v946_v56 = vmul.u32 %v4828_v58, %v930_v22  ;;  %v949_v20 = vadd.s32 1, %v4877_v12 }
  0xed   : > { %v3939_v40 = vpop.eup %3938  ;;  %v1101_v10 = vshrl.u32 %v1100_v16, 23  ;;  %v859_v53 = vsel %vm3623_vm11, 0, %v3622_v42  ;;  %v875_v2 = vsel %vm790_vm4, %v874_v36, %v4825_v31  ;;  %vm948_vm12 = vc.u32 %v4883_v5, %v4876_v47 }
  0xee   : > { %v3941_v19 = vpop.eup %3940  ;;  %v784_v61 = vxor.u32 2147483648, %v3939_v40  ;;  %v860_v55 = vsub.s32 32, %v859_v53  ;;  %v861_v9 = vshll.u32 %v4843_v29, %v859_v53  ;;  %v864_v35 = vsub.s32 4294967266, %v859_v53 }
  0xef   : > { %v781_v45 = vxor.u32 2147483648, %v3941_v19  ;;  %v950_v27 = vsel %vm948_vm12, %v949_v20, %v4877_v12  ;;  %vm1005_vm13 = vcmp.gt.s32.totalorder %v1004_v46, 0  ;;  %v3632_v37 = vadd.s32 4294967169, %v1101_v10 }
  0xf0   : > { %v785_v58 = vsel %vm783_vm10, %v784_v61, %v3941_v19  ;;  %v862_v23 = vshrl.u32 %v844_v17, %v860_v55  ;;  %v865_v52 = vadd.s32 127, %v864_v35  ;;  %v951_v31 = vadd.s32 %v950_v27, %v946_v56 }
  0xf1   : > { %v782_v44 = vsel %vm780_vm9, %v3939_v40, %v781_v45  ;;  %v877_v48 = vsel %vm4870_vm7, 0, %v875_v2  ;;  %v1006_v50 = vsel %vm1005_vm13, %v1004_v46, 0  ;;  %v1107_v29 = vadd.s32 1, %v3632_v37 }
  0xf2   : > { %v786_v57 = vsel %vm779_vm8, %v782_v44, %v785_v58  ;;  %v863_v14 = vor.u32 %v862_v23, %v861_v9  ;;  %v866_v59 = vshll.u32 %v865_v52, 23  ;;  %v952_v39 = vadd.s32 536870912, %v951_v31 }
  0xf3   : > { %v787_v7 = vsel %vm777_vm6, nan, %v786_v57  ;;  %v1008_v49 = vand.u32 31, %v1006_v50  ;;  %v1097_v4 = vand.u32 2147483647, %v4862_v6  ;;  %v4908_v63 = vand.u32 3, %v877_v48 }
  0xf4   : > { %3471 = vst [vmem:[%s4546_s17 + $0x28] sm:$0xff] %v787_v7  ;;  %v867_v18 = vor.u32 4788187, %v866_v59  ;;  %v870_v15 = vcvt.s32.f32 %v863_v14  ;;  %v4910_v62 = vshrl.u32 %v952_v39, 30  ;;  %v1002_v36 = vor.u32 8388608, %v1001_v33 }
  0xf5   : > { %v1007_v54 = vshrl.u32 %v1006_v50, 5  ;;  %v1009_v3 = vsub.s32 32, %v1008_v49  ;;  %vm1108_vm14 = vcmp.gt.s32.totalorder %v1107_v29, 0  ;;  %v1011_v38 = vshll.u32 %v4147_v26, %v1008_v49 }
  0xf6   : > { %v868_v24 = vand.u32 2147483647, %v867_v18  ;;  %v954_v0 = vshll.u32 %v4910_v62, 30  ;;  %v1014_v1 = vshll.u32 %v4148_v28, %v1008_v49  ;;  %v1017_v60 = vshll.u32 %v4149_v30, %v1008_v49 }
  0xf7   : > { %v1012_v12 = vshrl.u32 %v4148_v28, %v1009_v3  ;;  %v1015_v22 = vshrl.u32 %v4149_v30, %v1009_v3  ;;  %v1020_v11 = vshll.u32 %v4150_v32, %v1008_v49  ;;  %v1018_v17 = vshrl.u32 %v4150_v32, %v1009_v3 }
  0xf8   : > { %v871_v42 = vmul.f32 %v870_v15, %v868_v24  ;;  %v4919_v16 = vsub.s32 %v951_v31, %v954_v0  ;;  %v1021_v33 = vshrl.u32 %v4151_v34, %v1009_v3  ;;  %v947_v46 = vadd.s32 %v4876_v47, %v4883_v5 }
  0xf9   : > { %v4925_v40 = vshll.u32 %v1002_v36, 8  ;;  %v4929_v56 = vand.u32 8388607, %v1097_v4  ;;  %v1109_v20 = vsel %vm1108_vm14, %v1107_v29, 0  ;;  %v1010_v61 = vshrl.u32 %v4147_v26, %v1009_v3 }
  0xfa   : > { %v872_v10 = vxor.u32 2147483648, %v871_v42  ;;  %v957_v19 = vsub.s32 0, %v4919_v16  ;;  %v1013_v53 = vor.u32 %v1012_v12, %v1011_v38  ;;  %v1016_v2 = vor.u32 %v1015_v22, %v1014_v1 }
  0xfb   : > { %v1022_v45 = vor.u32 %v1021_v33, %v1020_v11  ;;  %v1023_v55 = vshll.u32 %v4151_v34, %v1008_v49  ;;  %v1024_v47 = vshrl.u32 %v4152_v41, %v1009_v3  ;;  %v1019_v35 = vor.u32 %v1018_v17, %v1017_v60 }
  0xfc   : > { %v873_v5 = vsel %vm790_vm4, %v872_v10, %v871_v42  ;;  %v3625_v9 = vmin.u32 %v957_v19, %v4919_v16  ;;  %vm1026_vm15 = vcmp.lt.s32.totalorder %v1007_v54, 1  ;;  %vm1027_vm0 = vcmp.lt.s32.totalorder %v1007_v54, 2 }
  0xfd   : > { %v876_v58 = vsel %vm4870_vm7, %v4690_v13, %v873_v5  ;;  %v1025_v27 = vor.u32 %v1024_v47, %v1023_v55  ;;  %vm1028_vm1 = vcmp.lt.s32.totalorder %v1007_v54, 3  ;;  %vm1029_vm2 = vcmp.lt.s32.totalorder %v1007_v54, 4 }
  0xfe   : > { %3942 = vcosq.f32 %v876_v58  ;;  %v959_v37 = vclz %v3625_v9  ;;  %v1030_v44 = vsel %vm1026_vm15, %v1010_v61, %v1013_v53  ;;  %v1031_v23 = vsel %vm1029_vm2, %v1019_v35, 2102212464 }
  0xff   : > { %3944 = vsinq.f32 %v876_v58  ;;  %v1034_v52 = vsel %vm1026_vm15, %v1013_v53, %v1016_v2  ;;  %v1035_v31 = vsel %vm1029_vm2, %v1022_v45, 920167782  ;;  %vm886_vm3 = vcmp.eq.s32.totalorder %v4908_v63, 2 }
 0x100   : > { %v3626_v57 = vadd.s32 4294967294, %v959_v37  ;;  %v1032_v48 = vsel %vm1028_vm1, %v1016_v2, %v1031_v23  ;;  %v1036_v51 = vsel %vm1028_vm1, %v1019_v35, %v1035_v31  ;;  %v1038_v50 = vsel %vm1026_vm15, %v1016_v2, %v1019_v35 }
 0x101   : > { %vm883_vm4 = vcmp.eq.s32.totalorder %v4908_v63, 0  ;;  %v1033_v29 = vsel %vm1027_vm0, %v1030_v44, %v1032_v48  ;;  %v1037_v7 = vsel %vm1027_vm0, %v1034_v52, %v1036_v51  ;;  %v1039_v14 = vsel %vm1029_vm2, %v1025_v27, 1326507024 }
 0x102   : > { %v4951_v59 = vshrl.u32 %v1109_v20, 5  ;;  %vm882_vm5 = vcmp.lt.s32.totalorder %v4908_v63, 2  ;;  %vm3627_vm6 = vcmp.lt.s32.totalorder %v3626_v57, 0  ;;  %v1040_v39 = vsel %vm1028_vm1, %v1022_v45, %v1039_v14 }
 0x103   : > { %v4956_v49 = vmul.u32.u64.low %v4925_v40, %v1037_v7  ;;  %v4957_v18 = vmul.u32.u64.high %v4925_v40, %v1037_v7, %v4956_v49  ;;  %vm880_vm7 = vweird.f32 %v4690_v13  ;;  %v962_v15 = vsel %vm3627_vm6, 0, %v3626_v57 }
 0x104   : > { %v1041_v36 = vsel %vm1027_vm0, %v1038_v50, %v1040_v39  ;;  %v1105_v3 = vor.u32 8388608, %v4929_v56  ;;  %v1111_v24 = vand.u32 31, %v1109_v20  ;;  %v963_v0 = vsub.s32 32, %v962_v15 }
 0x105   : > { %v964_v38 = vshll.u32 %v4919_v16, %v962_v15  ;;  %v967_v1 = vsub.s32 4294967266, %v962_v15  ;;  %v977_v12 = vsub.s32 4, %v4910_v62  ;;  %v1049_v11 = vmul.u32 %v4925_v40, %v1033_v29 }
 0x106   : > { %v4966_v22 = vmul.u32.u64.low %v4925_v40, %v1041_v36  ;;  %v4967_v60 = vmul.u32.u64.high %v4925_v40, %v1041_v36, %v4966_v22  ;;  %v1112_v42 = vsub.s32 32, %v1111_v24  ;;  %v965_v17 = vshrl.u32 %v947_v46, %v963_v0 }
 0x107   : > { %v968_v33 = vadd.s32 127, %v967_v1  ;;  %v1052_v54 = vadd.s32 1, %v4957_v18  ;;  %vm1129_vm8 = vcmp.lt.s32.totalorder %v4951_v59, 1  ;;  %vm893_vm9 = vcmp.lt.s32.totalorder %v4720_v43, 0 }
 0x108   : > { %v1114_v16 = vshll.u32 %v4147_v26, %v1111_v24  ;;  %v1115_v20 = vshrl.u32 %v4148_v28, %v1112_v42  ;;  %v1117_v10 = vshll.u32 %v4148_v28, %v1111_v24  ;;  %v1118_v19 = vshrl.u32 %v4149_v30, %v1112_v42  ;;  %v3943_v61 = vpop.eup %3942 }
 0x109   : > { %vm4979_vm10 = vcmp.le.f32.partialorder %v891_v25, 0.7853982  ;;  %v966_v40 = vor.u32 %v965_v17, %v964_v38  ;;  %v969_v53 = vshll.u32 %v968_v33, 23  ;;  %v1113_v2 = vshrl.u32 %v4147_v26, %v1112_v42  ;;  %v3945_v55 = vpop.eup %3944 }
 0x10a   : > { %v1120_v45 = vshll.u32 %v4149_v30, %v1111_v24  ;;  %v887_v47 = vxor.u32 2147483648, %v3943_v61  ;;  %vm1051_vm11 = vc.u32 %v4967_v60, %v4956_v49  ;;  %v1121_v5 = vshrl.u32 %v4150_v32, %v1112_v42 }
 0x10b   : > { %v1123_v9 = vshll.u32 %v4150_v32, %v1111_v24  ;;  %v884_v35 = vxor.u32 2147483648, %v3945_v55  ;;  %v970_v25 = vor.u32 4788187, %v969_v53  ;;  %v973_v58 = vcvt.s32.f32 %v966_v40 }
 0x10c   : > { %v1053_v27 = vsel %vm1051_vm11, %v1052_v54, %v4957_v18  ;;  %v888_v37 = vsel %vm886_vm3, %v887_v47, %v3945_v55  ;;  %v1116_v23 = vor.u32 %v1115_v20, %v1114_v16  ;;  %v1119_v52 = vor.u32 %v1118_v19, %v1117_v10  ;;  %v5040_v19 = vld [vmem:[%s4276_s30 + $0x50] sm:$0xff]  ;;  %v5055_v47 = vld [vmem:[%s4276_s30 + $0x58] sm:$0xff] }
 0x10d   : > { %v1054_v44 = vadd.s32 %v1053_v27, %v1049_v11  ;;  %v885_v31 = vsel %vm883_vm4, %v3943_v61, %v884_v35  ;;  %v971_v57 = vand.u32 2147483647, %v970_v25  ;;  %v1124_v48 = vshrl.u32 %v4151_v34, %v1112_v42 }
 0x10e   : > { %v1126_v51 = vshll.u32 %v4151_v34, %v1111_v24  ;;  %v889_v50 = vsel %vm882_vm5, %v885_v31, %v888_v37  ;;  %v1122_v7 = vor.u32 %v1121_v5, %v1120_v45  ;;  %v1127_v14 = vshrl.u32 %v4152_v41, %v1112_v42 }
 0x10f   : > { %v1055_v29 = vadd.s32 536870912, %v1054_v44  ;;  %v890_v39 = vsel %vm880_vm7, nan, %v889_v50  ;;  %v974_v18 = vmul.f32 %v973_v58, %v971_v57  ;;  %v1125_v15 = vor.u32 %v1124_v48, %v1123_v9 }
 0x110   : > { %vm1131_vm12 = vcmp.lt.s32.totalorder %v4951_v59, 3  ;;  %v1128_v0 = vor.u32 %v1127_v14, %v1126_v51  ;;  %vm1130_vm13 = vcmp.lt.s32.totalorder %v4951_v59, 2  ;;  %vm1132_vm14 = vcmp.lt.s32.totalorder %v4951_v59, 4  ;;  %3472 = vst [vmem:[%s4546_s17 + $0x30] sm:$0xff] %v890_v39 }
 0x111   : > { %v1056_v36 = vshrl.u32 %v1055_v29, 30  ;;  %v975_v63 = vxor.u32 2147483648, %v974_v18  ;;  %v1134_v24 = vsel %vm1132_vm14, %v1122_v7, 2102212464  ;;  %v1137_v38 = vsel %vm1129_vm8, %v1116_v23, %v1119_v52 }
 0x112   : > { %v1138_v13 = vsel %vm1132_vm14, %v1125_v15, 920167782  ;;  %v978_v1 = vsel %vm893_vm9, %v977_v12, %v4910_v62  ;;  %v1145_v42 = vshll.u32 %v1105_v3, 8  ;;  %v1133_v33 = vsel %vm1129_vm8, %v1113_v2, %v1116_v23 }
 0x113   : > { %v1057_v22 = vshll.u32 %v1056_v36, 30  ;;  %v1139_v11 = vsel %vm1131_vm12, %v1122_v7, %v1138_v13  ;;  %v976_v17 = vsel %vm893_vm9, %v975_v63, %v974_v18  ;;  %v1135_v54 = vsel %vm1131_vm12, %v1119_v52, %v1134_v24 }
 0x114   : > { %v1141_v62 = vsel %vm1129_vm8, %v1119_v52, %v1122_v7  ;;  %v979_v12 = vsel %vm4979_vm10, %v4720_v43, %v976_v17  ;;  %v1140_v56 = vsel %vm1130_vm13, %v1137_v38, %v1139_v11  ;;  %v1142_v3 = vsel %vm1132_vm14, %v1128_v0, 1326507024 }
 0x115   : > { %v5029_v16 = vsub.s32 %v1054_v44, %v1057_v22  ;;  %v980_v20 = vsel %vm4979_vm10, 0, %v978_v1  ;;  %3946 = vcosq.f32 %v979_v12  ;;  %v1143_v10 = vsel %vm1131_vm12, %v1125_v15, %v1142_v3 }
 0x116   : > { %3948 = vsinq.f32 %v979_v12  ;;  %v1136_v40 = vsel %vm1130_vm13, %v1133_v33, %v1135_v54  ;;  %v1144_v53 = vsel %vm1130_vm13, %v1141_v62, %v1143_v10  ;;  %v1080_v9 = vsub.s32 4, %v1056_v36 }
 0x117   : > { %v1060_v61 = vsub.s32 0, %v5029_v16  ;;  %v5047_v2 = vmul.u32.u64.low %v1145_v42, %v1144_v53  ;;  %v5048_v45 = vmul.u32.u64.high %v1145_v42, %v1144_v53, %v5047_v2  ;;  %v984_v35 = vand.u32 3, %v980_v20 }
 0x118   : > { %v5050_v46 = vmul.u32.u64.low %v1145_v42, %v1140_v56  ;;  %v5051_v55 = vmul.u32.u64.high %v1145_v42, %v1140_v56, %v5050_v46  ;;  %v1203_v25 = vand.u32 2139095040, %v5040_v19  ;;  %vm983_vm15 = vweird.f32 %v4720_v43 }
 0x119   : > { %v3629_v5 = vmin.u32 %v1060_v61, %v5029_v16  ;;  %vm996_vm0 = vcmp.lt.s32.totalorder %v4835_v21, 0  ;;  %v1152_v58 = vmul.u32 %v1145_v42, %v1136_v40  ;;  %v1306_v44 = vand.u32 2139095040, %v5055_v47 }
 0x11a   : > { %vm1154_vm1 = vc.u32 %v5048_v45, %v5050_v46  ;;  %v1155_v27 = vadd.s32 1, %v5051_v55  ;;  %v1204_v37 = vshrl.u32 %v1203_v25, 23  ;;  %vm5067_vm2 = vcmp.le.f32.partialorder %v994_v8, 0.7853982 }
 0x11b   : > { %v1062_v59 = vclz %v3629_v5  ;;  %v1081_v31 = vsel %vm996_vm0, %v1080_v9, %v1056_v36  ;;  %v1200_v57 = vand.u32 2147483647, %v5040_v19  ;;  %vm985_vm3 = vcmp.lt.s32.totalorder %v984_v35, 2 }
 0x11c   : > { %vm986_vm4 = vcmp.eq.s32.totalorder %v984_v35, 0  ;;  %v1156_v48 = vsel %vm1154_vm1, %v1155_v27, %v5051_v55  ;;  %v3636_v51 = vadd.s32 4294967169, %v1204_v37  ;;  %vm989_vm5 = vcmp.eq.s32.totalorder %v984_v35, 2 }
 0x11d   : > { %v3630_v52 = vadd.s32 4294967294, %v1062_v59  ;;  %v1050_v50 = vadd.s32 %v4956_v49, %v4967_v60  ;;  %v1157_v8 = vadd.s32 %v1156_v48, %v1152_v58  ;;  %v1083_v14 = vsel %vm5067_vm2, 0, %v1081_v31 }
 0x11e   : > { %v1210_v39 = vadd.s32 1, %v3636_v51  ;;  %v1307_v18 = vshrl.u32 %v1306_v44, 23  ;;  %v1207_v49 = vand.u32 8388607, %v1200_v57  ;;  %v5089_v3 = vand.u32 3, %v1083_v14 }
 0x11f   : > { %vm3631_vm6 = vcmp.lt.s32.totalorder %v3630_v52, 0  ;;  %v3947_v29 = vpop.eup %3946  ;;  %v1158_v13 = vadd.s32 536870912, %v1157_v8  ;;  %v1303_v2 = vand.u32 2147483647, %v5055_v47  ;;  %v1153_v25 = vadd.s32 %v5050_v46, %v5048_v45 }
 0x120   : > { %v1065_v7 = vsel %vm3631_vm6, 0, %v3630_v52  ;;  %v3949_v15 = vpop.eup %3948  ;;  %v990_v36 = vxor.u32 2147483648, %v3947_v29  ;;  %vm1211_vm7 = vcmp.gt.s32.totalorder %v1210_v39, 0  ;;  %v3640_v54 = vadd.s32 4294967169, %v1307_v18 }
 0x121   : > { %v1066_v0 = vsub.s32 32, %v1065_v7  ;;  %v1067_v63 = vshll.u32 %v5029_v16, %v1065_v7  ;;  %v1070_v24 = vsub.s32 4294967266, %v1065_v7  ;;  %v987_v38 = vxor.u32 2147483648, %v3949_v15 }
 0x122   : > { %v991_v60 = vsel %vm989_vm5, %v990_v36, %v3949_v15  ;;  %v1212_v11 = vsel %vm1211_vm7, %v1210_v39, 0  ;;  %v5084_v17 = vshrl.u32 %v1158_v13, 30  ;;  %v1208_v53 = vor.u32 8388608, %v1207_v49 }
 0x123   : > { %v1068_v1 = vshrl.u32 %v1050_v50, %v1066_v0  ;;  %v1071_v22 = vadd.s32 127, %v1070_v24  ;;  %v988_v42 = vsel %vm986_vm4, %v3947_v29, %v987_v38  ;;  %v1214_v33 = vand.u32 31, %v1212_v11 }
 0x124   : > { %v992_v62 = vsel %vm985_vm3, %v988_v42, %v991_v60  ;;  %v1160_v20 = vshll.u32 %v5084_v17, 30  ;;  %v1313_v35 = vadd.s32 1, %v3640_v54  ;;  %v1213_v37 = vshrl.u32 %v1212_v11, 5 }
 0x125   : > { %v1069_v12 = vor.u32 %v1068_v1, %v1067_v63  ;;  %v1072_v16 = vshll.u32 %v1071_v22, 23  ;;  %v993_v56 = vsel %vm983_vm15, nan, %v992_v62  ;;  %v1215_v10 = vsub.s32 32, %v1214_v33 }
 0x126   : > { %3473 = vst [vmem:[%s4546_s17 + $0x38] sm:$0xff] %v993_v56  ;;  %v5094_v55 = vsub.s32 %v1157_v8, %v1160_v20  ;;  %v1217_v5 = vshll.u32 %v4147_v26, %v1214_v33  ;;  %v1220_v59 = vshll.u32 %v4148_v28, %v1214_v33  ;;  %v1223_v44 = vshll.u32 %v4149_v30, %v1214_v33 }
 0x127   : > { %v1073_v61 = vor.u32 4788187, %v1072_v16  ;;  %v1076_v40 = vcvt.s32.f32 %v1069_v12  ;;  %v1218_v9 = vshrl.u32 %v4148_v28, %v1215_v10  ;;  %v1221_v58 = vshrl.u32 %v4149_v30, %v1215_v10 }
 0x128   : > { %v1163_v27 = vsub.s32 0, %v5094_v55  ;;  %v1224_v52 = vshrl.u32 %v4150_v32, %v1215_v10  ;;  %v1226_v48 = vshll.u32 %v4150_v32, %v1214_v33  ;;  %v1227_v51 = vshrl.u32 %v4151_v34, %v1215_v10 }
 0x129   : > { %v1074_v43 = vand.u32 2147483647, %v1073_v61  ;;  %v5107_v50 = vshll.u32 %v1208_v53, 8  ;;  %v1183_v46 = vsub.s32 4, %v5084_v17  ;;  %v1216_v8 = vshrl.u32 %v4147_v26, %v1215_v10 }
 0x12a   : > { %v3633_v45 = vmin.u32 %v1163_v27, %v5094_v55  ;;  %v1219_v29 = vor.u32 %v1218_v9, %v1217_v5  ;;  %vm1314_vm8 = vcmp.gt.s32.totalorder %v1313_v35, 0  ;;  %v1222_v14 = vor.u32 %v1221_v58, %v1220_v59 }
 0x12b   : > { %v1077_v31 = vmul.f32 %v1076_v40, %v1074_v43  ;;  %v1228_v39 = vor.u32 %v1227_v51, %v1226_v48  ;;  %v1229_v18 = vshll.u32 %v4151_v34, %v1214_v33  ;;  %v1225_v36 = vor.u32 %v1224_v52, %v1223_v44 }
 0x12c   : > { %v1165_v15 = vclz %v3633_v45  ;;  %v1230_v0 = vshrl.u32 %v4152_v41, %v1215_v10  ;;  %vm1232_vm9 = vcmp.lt.s32.totalorder %v1213_v37, 1  ;;  %vm1233_vm10 = vcmp.lt.s32.totalorder %v1213_v37, 2 }
 0x12d   : > { %v1078_v7 = vxor.u32 2147483648, %v1077_v31  ;;  %vm1234_vm11 = vcmp.lt.s32.totalorder %v1213_v37, 3  ;;  %vm1235_vm12 = vcmp.lt.s32.totalorder %v1213_v37, 4  ;;  %v1236_v60 = vsel %vm1232_vm9, %v1216_v8, %v1219_v29 }
 0x12e   : > { %v3634_v38 = vadd.s32 4294967294, %v1165_v15  ;;  %v1231_v13 = vor.u32 %v1230_v0, %v1229_v18  ;;  %v1237_v49 = vsel %vm1235_vm12, %v1225_v36, 2102212464  ;;  %v1240_v1 = vsel %vm1232_vm9, %v1219_v29, %v1222_v14 }
 0x12f   : > { %v1079_v63 = vsel %vm996_vm0, %v1078_v7, %v1077_v31  ;;  %v1241_v22 = vsel %vm1235_vm12, %v1228_v39, 920167782  ;;  %v1238_v11 = vsel %vm1234_vm11, %v1222_v14, %v1237_v49  ;;  %v1244_v54 = vsel %vm1232_vm9, %v1222_v14, %v1225_v36 }
 0x130   : > { %v1082_v24 = vsel %vm5067_vm2, %v4835_v21, %v1079_v63  ;;  %vm3635_vm13 = vcmp.lt.s32.totalorder %v3634_v38, 0  ;;  %v1242_v42 = vsel %vm1234_vm11, %v1225_v36, %v1241_v22  ;;  %v1245_v62 = vsel %vm1235_vm12, %v1231_v13, 1326507024 }
 0x131   : > { %3950 = vcosq.f32 %v1082_v24  ;;  %v1168_v33 = vsel %vm3635_vm13, 0, %v3634_v38  ;;  %v1243_v23 = vsel %vm1233_vm10, %v1240_v1, %v1242_v42  ;;  %v1246_v20 = vsel %vm1234_vm11, %v1228_v39, %v1245_v62 }
 0x132   : > { %3952 = vsinq.f32 %v1082_v24  ;;  %v1169_v12 = vsub.s32 32, %v1168_v33  ;;  %v1170_v16 = vshll.u32 %v5094_v55, %v1168_v33  ;;  %v1173_v56 = vsub.s32 4294967266, %v1168_v33 }
 0x133   : > { %v1239_v10 = vsel %vm1233_vm10, %v1236_v60, %v1238_v11  ;;  %v1247_v61 = vsel %vm1233_vm10, %v1244_v54, %v1246_v20  ;;  %v5133_v40 = vmul.u32.u64.low %v5107_v50, %v1243_v23  ;;  %v5134_v53 = vmul.u32.u64.high %v5107_v50, %v1243_v23, %v5133_v40 }
 0x134   : > { %v1171_v5 = vshrl.u32 %v1153_v25, %v1169_v12  ;;  %v1174_v9 = vadd.s32 127, %v1173_v56  ;;  %v5138_v43 = vmul.u32.u64.low %v5107_v50, %v1247_v61  ;;  %v5139_v59 = vmul.u32.u64.high %v5107_v50, %v1247_v61, %v5138_v43 }
 0x135   : > { %vm1086_vm14 = vweird.f32 %v4835_v21  ;;  %vm1099_vm15 = vcmp.lt.s32.totalorder %v4862_v6, 0  ;;  %v1310_v55 = vand.u32 8388607, %v1303_v2  ;;  %v1315_v58 = vsel %vm1314_vm8, %v1313_v35, 0 }
 0x136   : > { %v1172_v27 = vor.u32 %v1171_v5, %v1170_v16  ;;  %v1175_v37 = vshll.u32 %v1174_v9, 23  ;;  %v1255_v44 = vmul.u32 %v5107_v50, %v1239_v10  ;;  %v1317_v52 = vand.u32 31, %v1315_v58  ;;  %v5184_v16 = vld [vmem:[%s4276_s30 + $0x60] sm:$0xff] }
 0x137   : > { %vm1088_vm0 = vcmp.lt.s32.totalorder %v5089_v3, 2  ;;  %vm5150_vm1 = vcmp.le.f32.partialorder %v1097_v4, 0.7853982  ;;  %v1184_v31 = vsel %vm1099_vm15, %v1183_v46, %v5084_v17  ;;  %v1258_v48 = vadd.s32 1, %v5134_v53 }
 0x138   : > { %vm1089_vm2 = vcmp.eq.s32.totalorder %v5089_v3, 0  ;;  %v1176_v35 = vor.u32 4788187, %v1175_v37  ;;  %v1179_v51 = vcvt.s32.f32 %v1172_v27  ;;  %vm1257_vm3 = vc.u32 %v5139_v59, %v5133_v40 }
 0x139   : > { %vm1092_vm4 = vcmp.eq.s32.totalorder %v5089_v3, 2  ;;  %v1259_v4 = vsel %vm1257_vm3, %v1258_v48, %v5134_v53  ;;  %v1311_v45 = vor.u32 8388608, %v1310_v55  ;;  %v1318_v8 = vsub.s32 32, %v1317_v52 }
 0x13a   : > { %v1177_v14 = vand.u32 2147483647, %v1176_v35  ;;  %v1186_v17 = vsel %vm5150_vm1, 0, %v1184_v31  ;;  %v1260_v46 = vadd.s32 %v1259_v4, %v1255_v44  ;;  %v1320_v18 = vshll.u32 %v4147_v26, %v1317_v52 }
 0x13b   : > { %v3951_v50 = vpop.eup %3950  ;;  %v1321_v15 = vshrl.u32 %v4148_v28, %v1318_v8  ;;  %v1323_v36 = vshll.u32 %v4148_v28, %v1317_v52  ;;  %v1324_v38 = vshrl.u32 %v4149_v30, %v1318_v8  ;;  %v1326_v49 = vshll.u32 %v4149_v30, %v1317_v52 }
 0x13c   : > { %v3953_v29 = vpop.eup %3952  ;;  %v1093_v7 = vxor.u32 2147483648, %v3951_v50  ;;  %v1180_v63 = vmul.f32 %v1179_v51, %v1177_v14  ;;  %v1261_v24 = vadd.s32 536870912, %v1260_v46  ;;  %v1327_v60 = vshrl.u32 %v4150_v32, %v1318_v8 }
 0x13d   : > { %v1090_v39 = vxor.u32 2147483648, %v3953_v29  ;;  %v1329_v1 = vshll.u32 %v4150_v32, %v1317_v52  ;;  %v1316_v33 = vshrl.u32 %v1315_v58, 5  ;;  %v1330_v54 = vshrl.u32 %v4151_v34, %v1318_v8 }
 0x13e   : > { %v1094_v0 = vsel %vm1092_vm4, %v1093_v7, %v3953_v29  ;;  %v1181_v11 = vxor.u32 2147483648, %v1180_v63  ;;  %v5176_v42 = vshrl.u32 %v1261_v24, 30  ;;  %v1332_v62 = vshll.u32 %v4151_v34, %v1317_v52 }
 0x13f   : > { %v1091_v13 = vsel %vm1089_vm2, %v3951_v50, %v1090_v39  ;;  %v1333_v12 = vshrl.u32 %v4152_v41, %v1318_v8  ;;  %v1322_v20 = vor.u32 %v1321_v15, %v1320_v18  ;;  %v1325_v10 = vor.u32 %v1324_v38, %v1323_v36 }
 0x140   : > { %v1095_v22 = vsel %vm1088_vm0, %v1091_v13, %v1094_v0  ;;  %v1182_v56 = vsel %vm1099_vm15, %v1181_v11, %v1180_v63  ;;  %v1263_v3 = vshll.u32 %v5176_v42, 30  ;;  %v1328_v61 = vor.u32 %v1327_v60, %v1326_v49 }
 0x141   : > { %v1096_v23 = vsel %vm1086_vm14, nan, %v1095_v22  ;;  %v1185_v21 = vsel %vm5150_vm1, %v4862_v6, %v1182_v56  ;;  %v1331_v53 = vor.u32 %v1330_v54, %v1329_v1  ;;  %v1334_v5 = vor.u32 %v1333_v12, %v1332_v62 }
 0x142   : > { %3474 = vst [vmem:[%s4546_s17 + $0x40] sm:$0xff] %v1096_v23  ;;  %3954 = vcosq.f32 %v1185_v21  ;;  %v5193_v9 = vsub.s32 %v1260_v46, %v1263_v3  ;;  %v1319_v43 = vshrl.u32 %v4147_v26, %v1318_v8  ;;  %vm1335_vm5 = vcmp.lt.s32.totalorder %v1316_v33, 1 }
 0x143   : > { %3956 = vsinq.f32 %v1185_v21  ;;  %vm1338_vm6 = vcmp.lt.s32.totalorder %v1316_v33, 4  ;;  %v1351_v55 = vshll.u32 %v1311_v45, 8  ;;  %v1409_v58 = vand.u32 2139095040, %v5184_v16 }
 0x144   : > { %v1266_v27 = vsub.s32 0, %v5193_v9  ;;  %vm1336_vm7 = vcmp.lt.s32.totalorder %v1316_v33, 2  ;;  %vm1337_vm8 = vcmp.lt.s32.totalorder %v1316_v33, 3  ;;  %v1340_v37 = vsel %vm1338_vm6, %v1328_v61, 2102212464 }
 0x145   : > { %v1343_v44 = vsel %vm1335_vm5, %v1322_v20, %v1325_v10  ;;  %v1344_v52 = vsel %vm1338_vm6, %v1331_v53, 920167782  ;;  %v1347_v25 = vsel %vm1335_vm5, %v1325_v10, %v1328_v61  ;;  %v1348_v31 = vsel %vm1338_vm6, %v1334_v5, 1326507024 }
 0x146   : > { %v1190_v48 = vand.u32 3, %v1186_v17  ;;  %v3637_v35 = vmin.u32 %v1266_v27, %v5193_v9  ;;  %v1339_v51 = vsel %vm1335_vm5, %v1319_v43, %v1322_v20  ;;  %v1341_v50 = vsel %vm1337_vm8, %v1325_v10, %v1340_v37 }
 0x147   : > { %v1345_v4 = vsel %vm1337_vm8, %v1328_v61, %v1344_v52  ;;  %v1349_v8 = vsel %vm1337_vm8, %v1331_v53, %v1348_v31  ;;  %v1410_v29 = vshrl.u32 %v1409_v58, 23  ;;  %v1342_v36 = vsel %vm1336_vm7, %v1339_v51, %v1341_v50  ;;  %v5236_v52 = vld [vmem:[%s4276_s30 + $0x68] sm:$0xff] }
 0x148   : > { %v1268_v45 = vclz %v3637_v35  ;;  %v1346_v7 = vsel %vm1336_vm7, %v1343_v44, %v1345_v4  ;;  %v1350_v14 = vsel %vm1336_vm7, %v1347_v25, %v1349_v8  ;;  %vm1189_vm9 = vweird.f32 %v4862_v6 }
 0x149   : > { %v5201_v46 = vmul.u32.u64.low %v1351_v55, %v1350_v14  ;;  %v5202_v39 = vmul.u32.u64.high %v1351_v55, %v1350_v14, %v5201_v46  ;;  %v5204_v18 = vmul.u32.u64.low %v1351_v55, %v1346_v7  ;;  %v5205_v15 = vmul.u32.u64.high %v1351_v55, %v1346_v7, %v5204_v18 }
 0x14a   : > { %v3638_v17 = vadd.s32 4294967294, %v1268_v45  ;;  %v3644_v0 = vadd.s32 4294967169, %v1410_v29  ;;  %vm1191_vm10 = vcmp.lt.s32.totalorder %v1190_v48, 2  ;;  %vm1192_vm11 = vcmp.eq.s32.totalorder %v1190_v48, 0 }
 0x14b   : > { %v1406_v63 = vand.u32 2147483647, %v5184_v16  ;;  %vm1195_vm12 = vcmp.eq.s32.totalorder %v1190_v48, 2  ;;  %v1256_v38 = vadd.s32 %v5133_v40, %v5139_v59  ;;  %v1358_v22 = vmul.u32 %v1351_v55, %v1342_v36 }
 0x14c   : > { %v3955_v24 = vpop.eup %3954  ;;  %vm3639_vm13 = vcmp.lt.s32.totalorder %v3638_v17, 0  ;;  %v1416_v13 = vadd.s32 1, %v3644_v0  ;;  %vm1360_vm14 = vc.u32 %v5202_v39, %v5204_v18  ;;  %vm1202_vm15 = vcmp.lt.s32.totalorder %v5040_v19, 0 }
 0x14d   : > { %v3957_v49 = vpop.eup %3956  ;;  %v1196_v60 = vxor.u32 2147483648, %v3955_v24  ;;  %v1271_v1 = vsel %vm3639_vm13, 0, %v3638_v17  ;;  %v1361_v12 = vadd.s32 1, %v5205_v15  ;;  %v1413_v21 = vand.u32 8388607, %v1406_v63 }
 0x14e   : > { %v1193_v11 = vxor.u32 2147483648, %v3957_v49  ;;  %v1272_v33 = vsub.s32 32, %v1271_v1  ;;  %v1273_v23 = vshll.u32 %v5193_v9, %v1271_v1  ;;  %v1276_v54 = vsub.s32 4294967266, %v1271_v1 }
 0x14f   : > { %v1197_v62 = vsel %vm1195_vm12, %v1196_v60, %v3957_v49  ;;  %vm1417_vm0 = vcmp.gt.s32.totalorder %v1416_v13, 0  ;;  %v1362_v10 = vsel %vm1360_vm14, %v1361_v12, %v5205_v15  ;;  %vm5227_vm1 = vcmp.le.f32.partialorder %v1200_v57, 0.7853982 }
 0x150   : > { %v1194_v40 = vsel %vm1192_vm11, %v3955_v24, %v1193_v11  ;;  %v1274_v59 = vshrl.u32 %v1256_v38, %v1272_v33  ;;  %v1277_v56 = vadd.s32 127, %v1276_v54  ;;  %v1418_v3 = vsel %vm1417_vm0, %v1416_v13, 0 }
 0x151   : > { %v1198_v20 = vsel %vm1191_vm10, %v1194_v40, %v1197_v62  ;;  %v1420_v61 = vand.u32 31, %v1418_v3  ;;  %v1363_v55 = vadd.s32 %v1362_v10, %v1358_v22  ;;  %v1286_v58 = vsub.s32 4, %v5176_v42 }
 0x152   : > { %v1199_v53 = vsel %vm1189_vm9, nan, %v1198_v20  ;;  %v1275_v9 = vor.u32 %v1274_v59, %v1273_v23  ;;  %v1278_v43 = vshll.u32 %v1277_v56, 23  ;;  %v1419_v29 = vshrl.u32 %v1418_v3, 5 }
 0x153   : > { %v1421_v27 = vsub.s32 32, %v1420_v61  ;;  %v1423_v37 = vshll.u32 %v4147_v26, %v1420_v61  ;;  %v1426_v44 = vshll.u32 %v4148_v28, %v1420_v61  ;;  %3475 = vst [vmem:[%s4546_s17 + $0x48] sm:$0xff] %v1199_v53  ;;  %v1364_v31 = vadd.s32 536870912, %v1363_v55 }
 0x154   : > { %v1279_v6 = vor.u32 4788187, %v1278_v43  ;;  %v1282_v25 = vcvt.s32.f32 %v1275_v9  ;;  %v1429_v57 = vshll.u32 %v4149_v30, %v1420_v61  ;;  %v1432_v50 = vshll.u32 %v4150_v32, %v1420_v61 }
 0x155   : > { %v1424_v48 = vshrl.u32 %v4148_v28, %v1421_v27  ;;  %v1427_v35 = vshrl.u32 %v4149_v30, %v1421_v27  ;;  %v1430_v51 = vshrl.u32 %v4150_v32, %v1421_v27  ;;  %v5243_v8 = vshrl.u32 %v1364_v31, 30 }
 0x156   : > { %v1280_v4 = vand.u32 2147483647, %v1279_v6  ;;  %v1433_v45 = vshrl.u32 %v4151_v34, %v1421_v27  ;;  %v1414_v7 = vor.u32 8388608, %v1413_v21  ;;  %v1435_v14 = vshll.u32 %v4151_v34, %v1420_v61 }
 0x157   : > { %v1436_v46 = vshrl.u32 %v4152_v41, %v1421_v27  ;;  %v1512_v15 = vand.u32 2139095040, %v5236_v52  ;;  %v1287_v36 = vsel %vm1202_vm15, %v1286_v58, %v5176_v42  ;;  %v1366_v0 = vshll.u32 %v5243_v8, 30 }
 0x158   : > { %v1283_v17 = vmul.f32 %v1282_v25, %v1280_v4  ;;  %v1422_v24 = vshrl.u32 %v4147_v26, %v1421_v27  ;;  %v1425_v38 = vor.u32 %v1424_v48, %v1423_v37  ;;  %v1428_v13 = vor.u32 %v1427_v35, %v1426_v44 }
 0x159   : > { %v1431_v49 = vor.u32 %v1430_v51, %v1429_v57  ;;  %v1434_v60 = vor.u32 %v1433_v45, %v1432_v50  ;;  %v5254_v22 = vsub.s32 %v1363_v55, %v1366_v0  ;;  %vm1438_vm2 = vcmp.lt.s32.totalorder %v1419_v29, 1 }
 0x15a   : > { %v1284_v1 = vxor.u32 2147483648, %v1283_v17  ;;  %vm1441_vm3 = vcmp.lt.s32.totalorder %v1419_v29, 4  ;;  %v1289_v11 = vsel %vm5227_vm1, 0, %v1287_v36  ;;  %v1437_v33 = vor.u32 %v1436_v46, %v1435_v14 }
 0x15b   : > { %v1454_v23 = vshll.u32 %v1414_v7, 8  ;;  %v1513_v54 = vshrl.u32 %v1512_v15, 23  ;;  %v1369_v62 = vsub.s32 0, %v5254_v22  ;;  %vm1440_vm4 = vcmp.lt.s32.totalorder %v1419_v29, 3 }
 0x15c   : > { %v1285_v42 = vsel %vm1202_vm15, %v1284_v1, %v1283_v17  ;;  %v1443_v12 = vsel %vm1441_vm3, %v1431_v49, 2102212464  ;;  %vm1439_vm5 = vcmp.lt.s32.totalorder %v1419_v29, 2  ;;  %v1446_v59 = vsel %vm1438_vm2, %v1425_v38, %v1428_v13  ;;  %v5306_v17 = vld [vmem:[%s4276_s30 + $0x70] sm:$0xff] }
 0x15d   : > { %v1288_v40 = vsel %vm5227_vm1, %v5040_v19, %v1285_v42  ;;  %v1447_v56 = vsel %vm1441_vm3, %v1434_v60, 920167782  ;;  %v3641_v3 = vmin.u32 %v1369_v62, %v5254_v22  ;;  %v1442_v20 = vsel %vm1438_vm2, %v1422_v24, %v1425_v38 }
 0x15e   : > { %3958 = vcosq.f32 %v1288_v40  ;;  %v1450_v10 = vsel %vm1438_vm2, %v1428_v13, %v1431_v49  ;;  %v1444_v21 = vsel %vm1440_vm4, %v1428_v13, %v1443_v12  ;;  %v1448_v61 = vsel %vm1440_vm4, %v1431_v49, %v1447_v56 }
 0x15f   : > { %3960 = vsinq.f32 %v1288_v40  ;;  %v1451_v53 = vsel %vm1441_vm3, %v1437_v33, 1326507024  ;;  %v1293_v5 = vand.u32 3, %v1289_v11  ;;  %v1371_v9 = vclz %v3641_v3 }
 0x160   : > { %v1449_v43 = vsel %vm1439_vm5, %v1446_v59, %v1448_v61  ;;  %v1452_v55 = vsel %vm1440_vm4, %v1434_v60, %v1451_v53  ;;  %v3648_v44 = vadd.s32 4294967169, %v1513_v54  ;;  %v1445_v25 = vsel %vm1439_vm5, %v1442_v20, %v1444_v21 }
 0x161   : > { %v1453_v58 = vsel %vm1439_vm5, %v1450_v10, %v1452_v55  ;;  %v5276_v27 = vmul.u32.u64.low %v1454_v23, %v1449_v43  ;;  %v5277_v37 = vmul.u32.u64.high %v1454_v23, %v1449_v43, %v5276_v27  ;;  %v3642_v6 = vadd.s32 4294967294, %v1371_v9 }
 0x162   : > { %v5281_v31 = vmul.u32.u64.low %v1454_v23, %v1453_v58  ;;  %v5282_v57 = vmul.u32.u64.high %v1454_v23, %v1453_v58, %v5281_v31  ;;  %vm1292_vm6 = vweird.f32 %v5040_v19  ;;  %vm5287_vm7 = vcmp.le.f32.partialorder %v1303_v2, 0.7853982 }
 0x163   : > { %vm1305_vm8 = vcmp.lt.s32.totalorder %v5055_v47, 0  ;;  %v1389_v35 = vsub.s32 4, %v5243_v8  ;;  %v1519_v51 = vadd.s32 1, %v3648_v44  ;;  %vm1294_vm9 = vcmp.lt.s32.totalorder %v1293_v5, 2 }
 0x164   : > { %v1359_v50 = vadd.s32 %v5204_v18, %v5202_v39  ;;  %vm3643_vm10 = vcmp.lt.s32.totalorder %v3642_v6, 0  ;;  %v1509_v4 = vand.u32 2147483647, %v5236_v52  ;;  %v1461_v45 = vmul.u32 %v1454_v23, %v1445_v25 }
 0x165   : > { %v1374_v29 = vsel %vm3643_vm10, 0, %v3642_v6  ;;  %v1464_v2 = vadd.s32 1, %v5277_v37  ;;  %vm1520_vm11 = vcmp.gt.s32.totalorder %v1519_v51, 0  ;;  %vm1295_vm12 = vcmp.eq.s32.totalorder %v1293_v5, 0 }
 0x166   : > { %v1375_v7 = vsub.s32 32, %v1374_v29  ;;  %v1376_v14 = vshll.u32 %v5254_v22, %v1374_v29  ;;  %v1379_v46 = vsub.s32 4294967266, %v1374_v29  ;;  %vm1298_vm13 = vcmp.eq.s32.totalorder %v1293_v5, 2 }
 0x167   : > { %v5301_v15 = vsel %vm1305_vm8, %v1389_v35, %v5243_v8  ;;  %vm1463_vm14 = vc.u32 %v5282_v57, %v5276_v27  ;;  %v1521_v39 = vsel %vm1520_vm11, %v1519_v51, 0  ;;  %v1516_v38 = vand.u32 8388607, %v1509_v4 }
 0x168   : > { %v3959_v18 = vpop.eup %3958  ;;  %v1377_v36 = vshrl.u32 %v1359_v50, %v1375_v7  ;;  %v1380_v0 = vadd.s32 127, %v1379_v46  ;;  %v1465_v24 = vsel %vm1463_vm14, %v1464_v2, %v5277_v37  ;;  %v1523_v1 = vand.u32 31, %v1521_v39 }
 0x169   : > { %v3961_v13 = vpop.eup %3960  ;;  %v1299_v49 = vxor.u32 2147483648, %v3959_v18  ;;  %v1466_v60 = vadd.s32 %v1465_v24, %v1461_v45  ;;  %v1612_v8 = vand.u32 2147483647, %v5306_v17  ;;  %v1392_v23 = vsel %vm5287_vm7, 0, %v5301_v15 }
 0x16a   : > { %v1296_v22 = vxor.u32 2147483648, %v3961_v13  ;;  %v1378_v11 = vor.u32 %v1377_v36, %v1376_v14  ;;  %v1381_v33 = vshll.u32 %v1380_v0, 23  ;;  %v1524_v62 = vsub.s32 32, %v1523_v1 }
 0x16b   : > { %v1300_v54 = vsel %vm1298_vm13, %v1299_v49, %v3961_v13  ;;  %v1467_v42 = vadd.s32 536870912, %v1466_v60  ;;  %v1615_v12 = vand.u32 2139095040, %v5306_v17  ;;  %v1517_v3 = vor.u32 8388608, %v1516_v38 }
 0x16c   : > { %v1297_v40 = vsel %vm1295_vm12, %v3959_v18, %v1296_v22  ;;  %v1382_v59 = vor.u32 4788187, %v1381_v33  ;;  %v1385_v56 = vcvt.s32.f32 %v1378_v11  ;;  %v1526_v21 = vshll.u32 %v4147_v26, %v1523_v1 }
 0x16d   : > { %v1301_v20 = vsel %vm1294_vm9, %v1297_v40, %v1300_v54  ;;  %v5319_v10 = vshrl.u32 %v1467_v42, 30  ;;  %v1529_v61 = vshll.u32 %v4148_v28, %v1523_v1  ;;  %v1527_v43 = vshrl.u32 %v4148_v28, %v1524_v62 }
 0x16e   : > { %v1302_v53 = vsel %vm1292_vm6, nan, %v1301_v20  ;;  %v1383_v9 = vand.u32 2147483647, %v1382_v59  ;;  %v1530_v55 = vshrl.u32 %v4149_v30, %v1524_v62  ;;  %v1522_v37 = vshrl.u32 %v1521_v39, 5 }
 0x16f   : > { %v1469_v58 = vshll.u32 %v5319_v10, 30  ;;  %v1532_v5 = vshll.u32 %v4149_v30, %v1523_v1  ;;  %v1616_v44 = vshrl.u32 %v1615_v12, 23  ;;  %3476 = vst [vmem:[%s4546_s17 + $0x50] sm:$0xff] %v1302_v53  ;;  %v1533_v25 = vshrl.u32 %v4150_v32, %v1524_v62 }
 0x170   : > { %v1386_v6 = vmul.f32 %v1385_v56, %v1383_v9  ;;  %v1535_v31 = vshll.u32 %v4150_v32, %v1523_v1  ;;  %v1536_v19 = vshrl.u32 %v4151_v34, %v1524_v62  ;;  %v1525_v51 = vshrl.u32 %v4147_v26, %v1524_v62 }
 0x171   : > { %v5333_v35 = vsub.s32 %v1466_v60, %v1469_v58  ;;  %v1538_v50 = vshll.u32 %v4151_v34, %v1523_v1  ;;  %v5337_v29 = vshll.u32 %v1517_v3, 8  ;;  %v1528_v2 = vor.u32 %v1527_v43, %v1526_v21 }
 0x172   : > { %v1387_v45 = vxor.u32 2147483648, %v1386_v6  ;;  %v1531_v7 = vor.u32 %v1530_v55, %v1529_v61  ;;  %v1539_v14 = vshrl.u32 %v4152_v41, %v1524_v62  ;;  %v1537_v15 = vor.u32 %v1536_v19, %v1535_v31 }
 0x173   : > { %v1472_v46 = vsub.s32 0, %v5333_v35  ;;  %vm1541_vm15 = vcmp.lt.s32.totalorder %v1522_v37, 1  ;;  %v3652_v39 = vadd.s32 4294967169, %v1616_v44  ;;  %v1534_v36 = vor.u32 %v1533_v25, %v1532_v5 }
 0x174   : > { %v1388_v18 = vsel %vm1305_vm8, %v1387_v45, %v1386_v6  ;;  %v1540_v0 = vor.u32 %v1539_v14, %v1538_v50  ;;  %vm1544_vm0 = vcmp.lt.s32.totalorder %v1522_v37, 4  ;;  %vm1542_vm1 = vcmp.lt.s32.totalorder %v1522_v37, 2 }
 0x175   : > { %v1391_v24 = vsel %vm5287_vm7, %v5055_v47, %v1388_v18  ;;  %v3645_v38 = vmin.u32 %v1472_v46, %v5333_v35  ;;  %vm1543_vm2 = vcmp.lt.s32.totalorder %v1522_v37, 3  ;;  %v1545_v13 = vsel %vm1541_vm15, %v1525_v51, %v1528_v2 }
 0x176   : > { %3962 = vcosq.f32 %v1391_v24  ;;  %v1546_v49 = vsel %vm1544_vm0, %v1534_v36, 2102212464  ;;  %v1549_v60 = vsel %vm1541_vm15, %v1528_v2, %v1531_v7  ;;  %vm1408_vm3 = vcmp.lt.s32.totalorder %v5184_v16, 0 }
 0x177   : > { %3964 = vsinq.f32 %v1391_v24  ;;  %v1474_v1 = vclz %v3645_v38  ;;  %v1547_v22 = vsel %vm1543_vm2, %v1531_v7, %v1546_v49  ;;  %v1550_v48 = vsel %vm1544_vm0, %v1537_v15, 920167782 }
 0x178   : > { %v1396_v11 = vand.u32 3, %v1392_v23  ;;  %v1551_v33 = vsel %vm1543_vm2, %v1534_v36, %v1550_v48  ;;  %v1553_v54 = vsel %vm1541_vm15, %v1531_v7, %v1534_v36  ;;  %v1554_v42 = vsel %vm1544_vm0, %v1540_v0, 1326507024 }
 0x179   : > { %v3646_v62 = vadd.s32 4294967294, %v1474_v1  ;;  %v1548_v12 = vsel %vm1542_vm1, %v1545_v13, %v1547_v22  ;;  %v1552_v40 = vsel %vm1542_vm1, %v1549_v60, %v1551_v33  ;;  %v1555_v59 = vsel %vm1543_vm2, %v1537_v15, %v1554_v42 }
 0x17a   : > { %v1556_v56 = vsel %vm1542_vm1, %v1553_v54, %v1555_v59  ;;  %v5361_v3 = vmul.u32.u64.low %v5337_v29, %v1552_v40  ;;  %v5362_v20 = vmul.u32.u64.high %v5337_v29, %v1552_v40, %v5361_v3  ;;  %v1622_v23 = vadd.s32 1, %v3652_v39 }
 0x17b   : > { %vm1395_vm4 = vweird.f32 %v5055_v47  ;;  %v1462_v21 = vadd.s32 %v5276_v27, %v5282_v57  ;;  %vm3647_vm5 = vcmp.lt.s32.totalorder %v3646_v62, 0  ;;  %v1492_v43 = vsub.s32 4, %v5319_v10 }
 0x17c   : > { %v5369_v61 = vmul.u32.u64.low %v5337_v29, %v1556_v56  ;;  %v5370_v53 = vmul.u32.u64.high %v5337_v29, %v1556_v56, %v5369_v61  ;;  %v1477_v9 = vsel %vm3647_vm5, 0, %v3646_v62  ;;  %v1564_v55 = vmul.u32 %v5337_v29, %v1548_v12 }
 0x17d   : > { %vm1623_vm6 = vcmp.gt.s32.totalorder %v1622_v23, 0  ;;  %v1478_v58 = vsub.s32 32, %v1477_v9  ;;  %v1479_v37 = vshll.u32 %v5333_v35, %v1477_v9  ;;  %v1482_v5 = vsub.s32 4294967266, %v1477_v9 }
 0x17e   : > { %v1624_v44 = vsel %vm1623_vm6, %v1622_v23, 0  ;;  %vm1397_vm7 = vcmp.lt.s32.totalorder %v1396_v11, 2  ;;  %vm1398_vm8 = vcmp.eq.s32.totalorder %v1396_v11, 0  ;;  %vm5377_vm9 = vcmp.le.f32.partialorder %v1406_v63, 0.7853982 }
 0x17f   : > { %v1567_v57 = vadd.s32 1, %v5362_v20  ;;  %v1626_v6 = vand.u32 31, %v1624_v44  ;;  %vm1401_vm10 = vcmp.eq.s32.totalorder %v1396_v11, 2  ;;  %v1480_v25 = vshrl.u32 %v1462_v21, %v1478_v58 }
 0x180   : > { %v1483_v31 = vadd.s32 127, %v1482_v5  ;;  %vm1566_vm11 = vc.u32 %v5370_v53, %v5361_v3  ;;  %v3963_v19 = vpop.eup %3962  ;;  %v1493_v35 = vsel %vm1408_vm3, %v1492_v43, %v5319_v10  ;;  %v1619_v63 = vand.u32 8388607, %v1612_v8 }
 0x181   : > { %v1568_v51 = vsel %vm1566_vm11, %v1567_v57, %v5362_v20  ;;  %v1627_v50 = vsub.s32 32, %v1626_v6  ;;  %v3965_v29 = vpop.eup %3964  ;;  %v1402_v45 = vxor.u32 2147483648, %v3963_v19  ;;  %v1481_v2 = vor.u32 %v1480_v25, %v1479_v37 }
 0x182   : > { %v1484_v7 = vshll.u32 %v1483_v31, 23  ;;  %v1569_v14 = vadd.s32 %v1568_v51, %v1564_v55  ;;  %v1399_v46 = vxor.u32 2147483648, %v3965_v29  ;;  %v5390_v15 = vshrl.u32 %v1624_v44, 5  ;;  %v5437_v51 = vld [vmem:[%s4276_s30 + $0x78] sm:$0xff] }
 0x183   : > { %v1629_v39 = vshll.u32 %v4147_v26, %v1626_v6  ;;  %v1632_v18 = vshll.u32 %v4148_v28, %v1626_v6  ;;  %v1403_v10 = vsel %vm1401_vm10, %v1402_v45, %v3965_v29  ;;  %v1488_v0 = vcvt.s32.f32 %v1481_v2 }
 0x184   : > { %v1485_v36 = vor.u32 4788187, %v1484_v7  ;;  %v1570_v24 = vadd.s32 536870912, %v1569_v14  ;;  %v1400_v38 = vsel %vm1398_vm8, %v3963_v19, %v1399_v46  ;;  %v1630_v13 = vshrl.u32 %v4148_v28, %v1627_v50 }
 0x185   : > { %v1633_v49 = vshrl.u32 %v4149_v30, %v1627_v50  ;;  %v1635_v60 = vshll.u32 %v4149_v30, %v1626_v6  ;;  %v1404_v1 = vsel %vm1397_vm7, %v1400_v38, %v1403_v10  ;;  %v1636_v33 = vshrl.u32 %v4150_v32, %v1627_v50 }
 0x186   : > { %v1486_v22 = vand.u32 2147483647, %v1485_v36  ;;  %v5400_v48 = vshrl.u32 %v1570_v24, 30  ;;  %v1405_v54 = vsel %vm1395_vm4, nan, %v1404_v1  ;;  %v1620_v42 = vor.u32 8388608, %v1619_v63  ;;  %v5475_v1 = vld [vmem:[%s4276_s30 + $0x80] sm:$0xff] }
 0x187   : > { %v1638_v62 = vshll.u32 %v4150_v32, %v1626_v6  ;;  %v1639_v12 = vshrl.u32 %v4151_v34, %v1627_v50  ;;  %v1495_v59 = vsel %vm5377_vm9, 0, %v1493_v35  ;;  %v1641_v56 = vshll.u32 %v4151_v34, %v1626_v6  ;;  %3477 = vst [vmem:[%s4546_s17 + $0x58] sm:$0xff] %v1405_v54 }
 0x188   : > { %v1489_v40 = vmul.f32 %v1488_v0, %v1486_v22  ;;  %v1572_v11 = vshll.u32 %v5400_v48, 30  ;;  %v1631_v20 = vor.u32 %v1630_v13, %v1629_v39  ;;  %v1634_v23 = vor.u32 %v1633_v49, %v1632_v18 }
 0x189   : > { %v1640_v21 = vor.u32 %v1639_v12, %v1638_v62  ;;  %v1642_v47 = vshrl.u32 %v4152_v41, %v1627_v50  ;;  %v1637_v43 = vor.u32 %v1636_v33, %v1635_v60  ;;  %vm1644_vm12 = vcmp.lt.s32.totalorder %v5390_v15, 1 }
 0x18a   : > { %v1490_v61 = vxor.u32 2147483648, %v1489_v40  ;;  %v5413_v9 = vsub.s32 %v1569_v14, %v1572_v11  ;;  %v1628_v55 = vshrl.u32 %v4147_v26, %v1627_v50  ;;  %vm1646_vm13 = vcmp.lt.s32.totalorder %v5390_v15, 3 }
 0x18b   : > { %vm1647_vm14 = vcmp.lt.s32.totalorder %v5390_v15, 4  ;;  %v1660_v58 = vshll.u32 %v1620_v42, 8  ;;  %v1643_v44 = vor.u32 %v1642_v47, %v1641_v56  ;;  %vm1645_vm15 = vcmp.lt.s32.totalorder %v5390_v15, 2 }
 0x18c   : > { %v1491_v37 = vsel %vm1408_vm3, %v1490_v61, %v1489_v40  ;;  %v1575_v5 = vsub.s32 0, %v5413_v9  ;;  %v1649_v57 = vsel %vm1647_vm14, %v1637_v43, 2102212464  ;;  %v1652_v25 = vsel %vm1644_vm12, %v1631_v20, %v1634_v23 }
 0x18d   : > { %v1494_v6 = vsel %vm5377_vm9, %v5184_v16, %v1491_v37  ;;  %v1653_v31 = vsel %vm1647_vm14, %v1640_v21, 920167782  ;;  %v5432_v19 = vand.u32 3, %v1495_v59  ;;  %vm1511_vm0 = vcmp.lt.s32.totalorder %v5236_v52, 0 }
 0x18e   : > { %3966 = vcosq.f32 %v1494_v6  ;;  %v3649_v35 = vmin.u32 %v1575_v5, %v5413_v9  ;;  %v1648_v27 = vsel %vm1644_vm12, %v1628_v55, %v1631_v20  ;;  %v1650_v63 = vsel %vm1646_vm13, %v1634_v23, %v1649_v57 }
 0x18f   : > { %3968 = vsinq.f32 %v1494_v6  ;;  %v1654_v50 = vsel %vm1646_vm13, %v1637_v43, %v1653_v31  ;;  %v1656_v2 = vsel %vm1644_vm12, %v1634_v23, %v1637_v43  ;;  %v1657_v7 = vsel %vm1647_vm14, %v1643_v44, 1326507024 }
 0x190   : > { %v1577_v29 = vclz %v3649_v35  ;;  %v1655_v45 = vsel %vm1645_vm15, %v1652_v25, %v1654_v50  ;;  %v1595_v14 = vsub.s32 4, %v5400_v48  ;;  %v1658_v46 = vsel %vm1646_vm13, %v1640_v21, %v1657_v7 }
 0x191   : > { %v5454_v39 = vmul.u32.u64.low %v1660_v58, %v1655_v45  ;;  %v5455_v18 = vmul.u32.u64.high %v1660_v58, %v1655_v45, %v5454_v39  ;;  %v1651_v36 = vsel %vm1645_vm15, %v1648_v27, %v1650_v63  ;;  %v1659_v0 = vsel %vm1645_vm15, %v1656_v2, %v1658_v46 }
 0x192   : > { %v3650_v10 = vadd.s32 4294967294, %v1577_v29  ;;  %v1718_v24 = vand.u32 2139095040, %v5437_v51  ;;  %vm1498_vm1 = vweird.f32 %v5184_v16  ;;  %vm5466_vm2 = vcmp.le.f32.partialorder %v1509_v4, 0.7853982 }
 0x193   : > { %v5470_v13 = vmul.u32.u64.low %v1660_v58, %v1659_v0  ;;  %v5471_v49 = vmul.u32.u64.high %v1660_v58, %v1659_v0, %v5470_v13  ;;  %v1715_v60 = vand.u32 2147483647, %v5437_v51  ;;  %vm1500_vm3 = vcmp.lt.s32.totalorder %v5432_v19, 2 }
 0x194   : > { %v1565_v15 = vadd.s32 %v5361_v3, %v5370_v53  ;;  %vm3651_vm4 = vcmp.lt.s32.totalorder %v3650_v10, 0  ;;  %v1719_v22 = vshrl.u32 %v1718_v24, 23  ;;  %v1596_v4 = vsel %vm1511_vm0, %v1595_v14, %v5400_v48 }
 0x195   : > { %v1580_v33 = vsel %vm3651_vm4, 0, %v3650_v10  ;;  %v1667_v54 = vmul.u32 %v1660_v58, %v1651_v36  ;;  %v1670_v42 = vadd.s32 1, %v5455_v18  ;;  %vm1504_vm5 = vcmp.eq.s32.totalorder %v5432_v19, 2 }
 0x196   : > { %v1581_v62 = vsub.s32 32, %v1580_v33  ;;  %v1582_v12 = vshll.u32 %v5413_v9, %v1580_v33  ;;  %v1585_v40 = vsub.s32 4294967266, %v1580_v33  ;;  %v3656_v59 = vadd.s32 4294967169, %v1719_v22 }
 0x197   : > { %vm1669_vm6 = vc.u32 %v5471_v49, %v5454_v39  ;;  %v1722_v3 = vand.u32 8388607, %v1715_v60  ;;  %v1821_v53 = vand.u32 2139095040, %v5475_v1  ;;  %vm1501_vm7 = vcmp.eq.s32.totalorder %v5432_v19, 0 }
 0x198   : > { %v3967_v11 = vpop.eup %3966  ;;  %v1583_v48 = vshrl.u32 %v1565_v15, %v1581_v62  ;;  %v1586_v56 = vadd.s32 127, %v1585_v40  ;;  %v1671_v20 = vsel %vm1669_vm6, %v1670_v42, %v5455_v18  ;;  %v1725_v23 = vadd.s32 1, %v3656_v59 }
 0x199   : > { %v3969_v21 = vpop.eup %3968  ;;  %v1505_v47 = vxor.u32 2147483648, %v3967_v11  ;;  %v1598_v61 = vsel %vm5466_vm2, 0, %v1596_v4  ;;  %v1672_v9 = vadd.s32 %v1671_v20, %v1667_v54  ;;  %v1822_v57 = vshrl.u32 %v1821_v53, 23 }
 0x19a   : > { %v1502_v43 = vxor.u32 2147483648, %v3969_v21  ;;  %v1584_v55 = vor.u32 %v1583_v48, %v1582_v12  ;;  %v1587_v58 = vshll.u32 %v1586_v56, 23  ;;  %vm1726_vm8 = vcmp.gt.s32.totalorder %v1725_v23, 0 }
 0x19b   : > { %v1506_v37 = vsel %vm1504_vm5, %v1505_v47, %v3969_v21  ;;  %v1673_v5 = vadd.s32 536870912, %v1672_v9  ;;  %v1727_v44 = vsel %vm1726_vm8, %v1725_v23, 0  ;;  %v1723_v35 = vor.u32 8388608, %v1722_v3 }
 0x19c   : > { %v1503_v6 = vsel %vm1501_vm7, %v3967_v11, %v1502_v43  ;;  %v1588_v25 = vor.u32 4788187, %v1587_v58  ;;  %v1591_v31 = vcvt.s32.f32 %v1584_v55  ;;  %v1729_v50 = vand.u32 31, %v1727_v44 }
 0x19d   : > { %v1507_v27 = vsel %vm1500_vm3, %v1503_v6, %v1506_v37  ;;  %v5499_v63 = vshrl.u32 %v1673_v5, 30  ;;  %v5503_v2 = vand.u32 3, %v1598_v61  ;;  %v1818_v46 = vand.u32 2147483647, %v5475_v1 }
 0x19e   : > { %v1508_v29 = vsel %vm1498_vm1, nan, %v1507_v27  ;;  %v1589_v45 = vand.u32 2147483647, %v1588_v25  ;;  %v1730_v14 = vsub.s32 32, %v1729_v50  ;;  %v3660_v18 = vadd.s32 4294967169, %v1822_v57 }
 0x19f   : > { %v1675_v7 = vshll.u32 %v5499_v63, 30  ;;  %3478 = vst [vmem:[%s4546_s17 + $0x60] sm:$0xff] %v1508_v29  ;;  %v1732_v19 = vshll.u32 %v4147_v26, %v1729_v50  ;;  %v1735_v36 = vshll.u32 %v4148_v28, %v1729_v50  ;;  %v5510_v0 = vshll.u32 %v1723_v35, 8 }
 0x1a0   : > { %v1592_v10 = vmul.f32 %v1591_v31, %v1589_v45  ;;  %v1728_v16 = vshrl.u32 %v1727_v44, 5  ;;  %v1733_v13 = vshrl.u32 %v4148_v28, %v1730_v14  ;;  %v1738_v15 = vshll.u32 %v4149_v30, %v1729_v50 }
 0x1a1   : > { %v5512_v24 = vsub.s32 %v1672_v9, %v1675_v7  ;;  %v1736_v33 = vshrl.u32 %v4149_v30, %v1730_v14  ;;  %v1739_v4 = vshrl.u32 %v4150_v32, %v1730_v14  ;;  %v1741_v54 = vshll.u32 %v4150_v32, %v1729_v50 }
 0x1a2   : > { %v1593_v22 = vxor.u32 2147483648, %v1592_v10  ;;  %v1731_v62 = vshrl.u32 %v4147_v26, %v1730_v14  ;;  %v1742_v12 = vshrl.u32 %v4151_v34, %v1730_v14  ;;  %v1828_v40 = vadd.s32 1, %v3660_v18 }
 0x1a3   : > { %v1678_v42 = vsub.s32 0, %v5512_v24  ;;  %v1734_v3 = vor.u32 %v1733_v13, %v1732_v19  ;;  %v1737_v53 = vor.u32 %v1736_v33, %v1735_v36  ;;  %v1744_v11 = vshll.u32 %v4151_v34, %v1729_v50 }
 0x1a4   : > { %v1594_v59 = vsel %vm1511_vm0, %v1593_v22, %v1592_v10  ;;  %v1740_v20 = vor.u32 %v1739_v4, %v1738_v15  ;;  %vm1747_vm9 = vcmp.lt.s32.totalorder %v1728_v16, 1  ;;  %v1743_v23 = vor.u32 %v1742_v12, %v1741_v54 }
 0x1a5   : > { %v1597_v48 = vsel %vm5466_vm2, %v5236_v52, %v1594_v59  ;;  %v3653_v56 = vmin.u32 %v1678_v42, %v5512_v24  ;;  %v1745_v21 = vshrl.u32 %v4152_v41, %v1730_v14  ;;  %vm1748_vm10 = vcmp.lt.s32.totalorder %v1728_v16, 2 }
 0x1a6   : > { %3970 = vcosq.f32 %v1597_v48  ;;  %vm1749_vm11 = vcmp.lt.s32.totalorder %v1728_v16, 3  ;;  %vm1750_vm12 = vcmp.lt.s32.totalorder %v1728_v16, 4  ;;  %v1751_v9 = vsel %vm1747_vm9, %v1731_v62, %v1734_v3 }
 0x1a7   : > { %3972 = vsinq.f32 %v1597_v48  ;;  %v1680_v47 = vclz %v3653_v56  ;;  %v1746_v61 = vor.u32 %v1745_v21, %v1744_v11  ;;  %v1752_v43 = vsel %vm1750_vm12, %v1740_v20, 2102212464 }
 0x1a8   : > { %v1755_v38 = vsel %vm1747_vm9, %v1734_v3, %v1737_v53  ;;  %vm1604_vm13 = vcmp.eq.s32.totalorder %v5503_v2, 0  ;;  %v1753_v58 = vsel %vm1749_vm11, %v1737_v53, %v1752_v43  ;;  %v1756_v37 = vsel %vm1750_vm12, %v1743_v23, 920167782 }
 0x1a9   : > { %v3654_v55 = vadd.s32 4294967294, %v1680_v47  ;;  %v1759_v5 = vsel %vm1747_vm9, %v1737_v53, %v1740_v20  ;;  %vm1603_vm14 = vcmp.lt.s32.totalorder %v5503_v2, 2  ;;  %v1668_v44 = vadd.s32 %v5454_v39, %v5471_v49 }
 0x1aa   : > { %v1757_v57 = vsel %vm1749_vm11, %v1740_v20, %v1756_v37  ;;  %v1760_v6 = vsel %vm1750_vm12, %v1746_v61, 1326507024  ;;  %vm1829_vm15 = vcmp.gt.s32.totalorder %v1828_v40, 0  ;;  %vm1601_vm0 = vweird.f32 %v5236_v52 }
 0x1ab   : > { %vm3655_vm1 = vcmp.lt.s32.totalorder %v3654_v55, 0  ;;  %v1754_v25 = vsel %vm1748_vm10, %v1751_v9, %v1753_v58  ;;  %v1758_v31 = vsel %vm1748_vm10, %v1755_v38, %v1757_v57  ;;  %v1761_v35 = vsel %vm1749_vm11, %v1743_v23, %v1760_v6 }
 0x1ac   : > { %v1683_v27 = vsel %vm3655_vm1, 0, %v3654_v55  ;;  %v1762_v50 = vsel %vm1748_vm10, %v1759_v5, %v1761_v35  ;;  %v5545_v29 = vmul.u32.u64.low %v5510_v0, %v1758_v31  ;;  %v5546_v45 = vmul.u32.u64.high %v5510_v0, %v1758_v31, %v5545_v29 }
 0x1ad   : > { %v1684_v39 = vsub.s32 32, %v1683_v27  ;;  %v1685_v49 = vshll.u32 %v5512_v24, %v1683_v27  ;;  %v1688_v7 = vsub.s32 4294967266, %v1683_v27  ;;  %v1830_v14 = vsel %vm1829_vm15, %v1828_v40, 0 }
 0x1ae   : > { %vm1607_vm2 = vcmp.eq.s32.totalorder %v5503_v2, 2  ;;  %v5552_v18 = vmul.u32.u64.low %v5510_v0, %v1762_v50  ;;  %v5553_v10 = vmul.u32.u64.high %v5510_v0, %v1762_v50, %v5552_v18  ;;  %v1832_v19 = vand.u32 31, %v1830_v14 }
 0x1af   : > { %vm1614_vm3 = vcmp.lt.s32.totalorder %v5306_v17, 0  ;;  %v1686_v36 = vshrl.u32 %v1668_v44, %v1684_v39  ;;  %v1689_v16 = vadd.s32 127, %v1688_v7  ;;  %v1698_v13 = vsub.s32 4, %v5499_v63 }
 0x1b0   : > { %v1825_v15 = vand.u32 8388607, %v1818_v46  ;;  %v3971_v22 = vpop.eup %3970  ;;  %v1770_v24 = vmul.u32 %v5510_v0, %v1754_v25  ;;  %v1773_v33 = vadd.s32 1, %v5546_v45  ;;  %v5561_v4 = vshrl.u32 %v1830_v14, 5 }
 0x1b1   : > { %v1833_v54 = vsub.s32 32, %v1832_v19  ;;  %v3973_v42 = vpop.eup %3972  ;;  %v1608_v62 = vxor.u32 2147483648, %v3971_v22  ;;  %vm5565_vm4 = vcmp.le.f32.partialorder %v1612_v8, 0.7853982  ;;  %v1687_v40 = vor.u32 %v1686_v36, %v1685_v49 }
 0x1b2   : > { %v1690_v59 = vshll.u32 %v1689_v16, 23  ;;  %v1835_v3 = vshll.u32 %v4147_v26, %v1832_v19  ;;  %v1605_v53 = vxor.u32 2147483648, %v3973_v42  ;;  %vm1772_vm5 = vc.u32 %v5553_v10, %v5545_v29 }
 0x1b3   : > { %v1838_v0 = vshll.u32 %v4148_v28, %v1832_v19  ;;  %v1841_v11 = vshll.u32 %v4149_v30, %v1832_v19  ;;  %v1609_v48 = vsel %vm1607_vm2, %v1608_v62, %v3973_v42  ;;  %v1694_v8 = vcvt.s32.f32 %v1687_v40  ;;  %v5622_v42 = vld [vmem:[%s4276_s30 + $0x88] sm:$0xff] }
 0x1b4   : > { %v1691_v56 = vor.u32 4788187, %v1690_v59  ;;  %v1774_v20 = vsel %vm1772_vm5, %v1773_v33, %v5546_v45  ;;  %v1606_v23 = vsel %vm1604_vm13, %v3971_v22, %v1605_v53  ;;  %v1836_v47 = vshrl.u32 %v4148_v28, %v1833_v54 }
 0x1b5   : > { %v1775_v21 = vadd.s32 %v1774_v20, %v1770_v24  ;;  %v1839_v61 = vshrl.u32 %v4149_v30, %v1833_v54  ;;  %v1610_v9 = vsel %vm1603_vm14, %v1606_v23, %v1609_v48  ;;  %v1842_v38 = vshrl.u32 %v4150_v32, %v1833_v54  ;;  %v5642_v48 = vld [vmem:[%s4276_s30 + $0x90] sm:$0xff] }
 0x1b6   : > { %v1692_v43 = vand.u32 2147483647, %v1691_v56  ;;  %v1844_v55 = vshll.u32 %v4150_v32, %v1832_v19  ;;  %v1611_v58 = vsel %vm1601_vm0, nan, %v1610_v9  ;;  %v1826_v5 = vor.u32 8388608, %v1825_v15 }
 0x1b7   : > { %v1776_v37 = vadd.s32 536870912, %v1775_v21  ;;  %v1837_v44 = vor.u32 %v1836_v47, %v1835_v3  ;;  %v1840_v6 = vor.u32 %v1839_v61, %v1838_v0  ;;  %v1845_v25 = vshrl.u32 %v4151_v34, %v1833_v54  ;;  %3479 = vst [vmem:[%s4546_s17 + $0x68] sm:$0xff] %v1611_v58 }
 0x1b8   : > { %v1695_v57 = vmul.f32 %v1694_v8, %v1692_v43  ;;  %v1847_v31 = vshll.u32 %v4151_v34, %v1832_v19  ;;  %v1699_v2 = vsel %vm1614_vm3, %v1698_v13, %v5499_v63  ;;  %v1848_v27 = vshrl.u32 %v4152_v41, %v1833_v54 }
 0x1b9   : > { %v1777_v35 = vshrl.u32 %v1776_v37, 30  ;;  %vm1850_vm6 = vcmp.lt.s32.totalorder %v5561_v4, 1  ;;  %v1843_v50 = vor.u32 %v1842_v38, %v1841_v11  ;;  %v1846_v45 = vor.u32 %v1845_v25, %v1844_v55 }
 0x1ba   : > { %v1696_v52 = vxor.u32 2147483648, %v1695_v57  ;;  %vm1853_vm7 = vcmp.lt.s32.totalorder %v5561_v4, 4  ;;  %vm1851_vm8 = vcmp.lt.s32.totalorder %v5561_v4, 2  ;;  %vm1852_vm9 = vcmp.lt.s32.totalorder %v5561_v4, 3 }
 0x1bb   : > { %v1778_v39 = vshll.u32 %v1777_v35, 30  ;;  %v5598_v49 = vshll.u32 %v1826_v5, 8  ;;  %v1849_v7 = vor.u32 %v1848_v27, %v1847_v31  ;;  %v1858_v14 = vsel %vm1850_vm6, %v1837_v44, %v1840_v6 }
 0x1bc   : > { %v1697_v63 = vsel %vm1614_vm3, %v1696_v52, %v1695_v57  ;;  %v1859_v18 = vsel %vm1853_vm7, %v1846_v45, 920167782  ;;  %v1834_v16 = vshrl.u32 %v4147_v26, %v1833_v54  ;;  %v1701_v13 = vsel %vm5565_vm4, 0, %v1699_v2 }
 0x1bd   : > { %v1700_v19 = vsel %vm5565_vm4, %v5306_v17, %v1697_v63  ;;  %v5609_v36 = vsub.s32 %v1775_v21, %v1778_v39  ;;  %v1855_v15 = vsel %vm1853_vm7, %v1843_v50, 2102212464  ;;  %v1860_v22 = vsel %vm1852_vm9, %v1843_v50, %v1859_v18 }
 0x1be   : > { %3974 = vcosq.f32 %v1700_v19  ;;  %v1861_v33 = vsel %vm1851_vm8, %v1858_v14, %v1860_v22  ;;  %v1862_v54 = vsel %vm1850_vm6, %v1840_v6, %v1843_v50  ;;  %v1863_v62 = vsel %vm1853_vm7, %v1849_v7, 1326507024 }
 0x1bf   : > { %3976 = vsinq.f32 %v1700_v19  ;;  %v1781_v24 = vsub.s32 0, %v5609_v36  ;;  %v5629_v12 = vmul.u32.u64.low %v5598_v49, %v1861_v33  ;;  %v5630_v40 = vmul.u32.u64.high %v5598_v49, %v1861_v33, %v5629_v12 }
 0x1c0   : > { %v1705_v59 = vand.u32 3, %v1701_v13  ;;  %v1854_v53 = vsel %vm1850_vm6, %v1834_v16, %v1837_v44  ;;  %v1856_v0 = vsel %vm1852_vm9, %v1840_v6, %v1855_v15  ;;  %vm1717_vm10 = vcmp.lt.s32.totalorder %v5437_v51, 0 }
 0x1c1   : > { %v3657_v3 = vmin.u32 %v1781_v24, %v5609_v36  ;;  %v1864_v11 = vsel %vm1852_vm9, %v1846_v45, %v1863_v62  ;;  %vm1704_vm11 = vweird.f32 %v5306_v17  ;;  %v1801_v8 = vsub.s32 4, %v1777_v35 }
 0x1c2   : > { %v1865_v20 = vsel %vm1851_vm8, %v1862_v54, %v1864_v11  ;;  %v1924_v23 = vand.u32 2139095040, %v5622_v42  ;;  %v1857_v21 = vsel %vm1851_vm8, %v1854_v53, %v1856_v0  ;;  %v1921_v9 = vand.u32 2147483647, %v5622_v42 }
 0x1c3   : > { %v1783_v56 = vclz %v3657_v3  ;;  %v5651_v47 = vmul.u32.u64.low %v5598_v49, %v1865_v20  ;;  %v5652_v61 = vmul.u32.u64.high %v5598_v49, %v1865_v20, %v5651_v47  ;;  %vm1706_vm12 = vcmp.lt.s32.totalorder %v1705_v59, 2 }
 0x1c4   : > { %vm5657_vm13 = vcmp.le.f32.partialorder %v1715_v60, 0.7853982  ;;  %v1925_v55 = vshrl.u32 %v1924_v23, 23  ;;  %vm1707_vm14 = vcmp.eq.s32.totalorder %v1705_v59, 0  ;;  %vm1710_vm15 = vcmp.eq.s32.totalorder %v1705_v59, 2 }
 0x1c5   : > { %v3658_v38 = vadd.s32 4294967294, %v1783_v56  ;;  %v1876_v4 = vadd.s32 1, %v5630_v40  ;;  %v2027_v58 = vand.u32 2139095040, %v5642_v48  ;;  %v1771_v37 = vadd.s32 %v5545_v29, %v5553_v10 }
 0x1c6   : > { %v1873_v5 = vmul.u32 %v5598_v49, %v1857_v21  ;;  %v3664_v44 = vadd.s32 4294967169, %v1925_v55  ;;  %v1802_v6 = vsel %vm1717_vm10, %v1801_v8, %v1777_v35  ;;  %vm1875_vm1 = vc.u32 %v5652_v61, %v5629_v12 }
 0x1c7   : > { %vm3659_vm0 = vcmp.lt.s32.totalorder %v3658_v38, 0  ;;  %v1928_v25 = vand.u32 8388607, %v1921_v9  ;;  %v1877_v50 = vsel %vm1875_vm1, %v1876_v4, %v5630_v40  ;;  %v2028_v39 = vshrl.u32 %v2027_v58, 23 }
 0x1c8   : > { %v3975_v57 = vpop.eup %3974  ;;  %v1786_v60 = vsel %vm3659_vm0, 0, %v3658_v38  ;;  %v1931_v45 = vadd.s32 1, %v3664_v44  ;;  %v1878_v7 = vadd.s32 %v1877_v50, %v1873_v5  ;;  %v1804_v18 = vsel %vm5657_vm13, 0, %v1802_v6 }
 0x1c9   : > { %v3977_v31 = vpop.eup %3976  ;;  %v1711_v2 = vxor.u32 2147483648, %v3975_v57  ;;  %v1787_v27 = vsub.s32 32, %v1786_v60  ;;  %v1788_v29 = vshll.u32 %v5609_v36, %v1786_v60  ;;  %v1791_v10 = vsub.s32 4294967266, %v1786_v60 }
 0x1ca   : > { %v1708_v52 = vxor.u32 2147483648, %v3977_v31  ;;  %vm1932_vm2 = vcmp.gt.s32.totalorder %v1931_v45, 0  ;;  %v1879_v13 = vadd.s32 536870912, %v1878_v7  ;;  %v1929_v22 = vor.u32 8388608, %v1928_v25 }
 0x1cb   : > { %v1712_v49 = vsel %vm1710_vm15, %v1711_v2, %v3977_v31  ;;  %v1789_v35 = vshrl.u32 %v1771_v37, %v1787_v27  ;;  %v1792_v63 = vadd.s32 127, %v1791_v10  ;;  %v1933_v24 = vsel %vm1932_vm2, %v1931_v45, 0 }
 0x1cc   : > { %v1709_v14 = vsel %vm1707_vm14, %v3975_v57, %v1708_v52  ;;  %v3668_v33 = vadd.s32 4294967169, %v2028_v39  ;;  %v5681_v40 = vshrl.u32 %v1879_v13, 30  ;;  %v5684_v3 = vand.u32 3, %v1804_v18 }
 0x1cd   : > { %v1713_v19 = vsel %vm1706_vm12, %v1709_v14, %v1712_v49  ;;  %v1790_v36 = vor.u32 %v1789_v35, %v1788_v29  ;;  %v1793_v16 = vshll.u32 %v1792_v63, 23  ;;  %v1935_v53 = vand.u32 31, %v1933_v24 }
 0x1ce   : > { %v1714_v15 = vsel %vm1704_vm11, nan, %v1713_v19  ;;  %v1874_v59 = vadd.s32 %v5629_v12, %v5652_v61  ;;  %v1881_v11 = vshll.u32 %v5681_v40, 30  ;;  %v2024_v17 = vand.u32 2147483647, %v5642_v48 }
 0x1cf   : > { %v1794_v54 = vor.u32 4788187, %v1793_v16  ;;  %v1797_v62 = vcvt.s32.f32 %v1790_v36  ;;  %3480 = vst [vmem:[%s4546_s17 + $0x70] sm:$0xff] %v1714_v15  ;;  %v1936_v56 = vsub.s32 32, %v1935_v53  ;;  %v1938_v8 = vshll.u32 %v4147_v26, %v1935_v53 }
 0x1d0   : > { %v5691_v20 = vshll.u32 %v1929_v22, 8  ;;  %v2034_v23 = vadd.s32 1, %v3668_v33  ;;  %v5693_v47 = vsub.s32 %v1878_v7, %v1881_v11  ;;  %v1934_v38 = vshrl.u32 %v1933_v24, 5 }
 0x1d1   : > { %v1795_v0 = vand.u32 2147483647, %v1794_v54  ;;  %v1941_v55 = vshll.u32 %v4148_v28, %v1935_v53  ;;  %v1939_v4 = vshrl.u32 %v4148_v28, %v1936_v56  ;;  %v1942_v12 = vshrl.u32 %v4149_v30, %v1936_v56 }
 0x1d2   : > { %v1944_v61 = vshll.u32 %v4149_v30, %v1935_v53  ;;  %v1947_v58 = vshll.u32 %v4150_v32, %v1935_v53  ;;  %v1884_v5 = vsub.s32 0, %v5693_v47  ;;  %v1945_v44 = vshrl.u32 %v4150_v32, %v1936_v56 }
 0x1d3   : > { %v1798_v21 = vmul.f32 %v1797_v62, %v1795_v0  ;;  %v5704_v57 = vand.u32 8388607, %v2024_v17  ;;  %v1937_v60 = vshrl.u32 %v4147_v26, %v1936_v56  ;;  %v1940_v6 = vor.u32 %v1939_v4, %v1938_v8 }
 0x1d4   : > { %v1948_v25 = vshrl.u32 %v4151_v34, %v1936_v56  ;;  %vm2035_vm3 = vcmp.gt.s32.totalorder %v2034_v23, 0  ;;  %v3661_v2 = vmin.u32 %v1884_v5, %v5693_v47  ;;  %v1943_v27 = vor.u32 %v1942_v12, %v1941_v55 }
 0x1d5   : > { %v1799_v37 = vxor.u32 2147483648, %v1798_v21  ;;  %v1950_v29 = vshll.u32 %v4151_v34, %v1935_v53  ;;  %v1946_v52 = vor.u32 %v1945_v44, %v1944_v61  ;;  %vm1953_vm4 = vcmp.lt.s32.totalorder %v1934_v38, 1 }
 0x1d6   : > { %v1949_v50 = vor.u32 %v1948_v25, %v1947_v58  ;;  %v1886_v45 = vclz %v3661_v2  ;;  %v1951_v39 = vshrl.u32 %v4152_v41, %v1936_v56  ;;  %vm1954_vm5 = vcmp.lt.s32.totalorder %v1934_v38, 2 }
 0x1d7   : > { %v1800_v31 = vsel %vm1717_vm10, %v1799_v37, %v1798_v21  ;;  %vm1955_vm6 = vcmp.lt.s32.totalorder %v1934_v38, 3  ;;  %vm1956_vm7 = vcmp.lt.s32.totalorder %v1934_v38, 4  ;;  %v1957_v49 = vsel %vm1953_vm4, %v1937_v60, %v1940_v6 }
 0x1d8   : > { %v1803_v10 = vsel %vm5657_vm13, %v5437_v51, %v1800_v31  ;;  %v3662_v35 = vadd.s32 4294967294, %v1886_v45  ;;  %v1952_v63 = vor.u32 %v1951_v39, %v1950_v29  ;;  %v1958_v7 = vsel %vm1956_vm7, %v1946_v52, 2102212464 }
 0x1d9   : > { %3978 = vcosq.f32 %v1803_v10  ;;  %v1961_v14 = vsel %vm1953_vm4, %v1940_v6, %v1943_v27  ;;  %v1959_v18 = vsel %vm1955_vm6, %v1943_v27, %v1958_v7  ;;  %v1962_v43 = vsel %vm1956_vm7, %v1949_v50, 920167782  ;;  %v5765_v7 = vld [vmem:[%s4276_s30 + $0x98] sm:$0xff] }
 0x1da   : > { %3980 = vsinq.f32 %v1803_v10  ;;  %v1965_v19 = vsel %vm1953_vm4, %v1943_v27, %v1946_v52  ;;  %v2032_v36 = vor.u32 8388608, %v5704_v57  ;;  %vm3663_vm8 = vcmp.lt.s32.totalorder %v3662_v35, 0 }
 0x1db   : > { %v1963_v16 = vsel %vm1955_vm6, %v1946_v52, %v1962_v43  ;;  %v1966_v13 = vsel %vm1956_vm7, %v1952_v63, 1326507024  ;;  %v2036_v15 = vsel %vm2035_vm3, %v2034_v23, 0  ;;  %v1889_v22 = vsel %vm3663_vm8, 0, %v3662_v35 }
 0x1dc   : > { %v1960_v24 = vsel %vm1954_vm5, %v1957_v49, %v1959_v18  ;;  %v1964_v33 = vsel %vm1954_vm5, %v1961_v14, %v1963_v16  ;;  %v1967_v54 = vsel %vm1955_vm6, %v1949_v50, %v1966_v13  ;;  %v1890_v62 = vsub.s32 32, %v1889_v22 }
 0x1dd   : > { %v1891_v53 = vshll.u32 %v5693_v47, %v1889_v22  ;;  %v1894_v0 = vsub.s32 4294967266, %v1889_v22  ;;  %v1968_v11 = vsel %vm1954_vm5, %v1965_v19, %v1967_v54  ;;  %vm1807_vm9 = vweird.f32 %v5437_v51 }
 0x1de   : > { %v5726_v56 = vmul.u32.u64.low %v5691_v20, %v1968_v11  ;;  %v5727_v8 = vmul.u32.u64.high %v5691_v20, %v1968_v11, %v5726_v56  ;;  %v5730_v21 = vmul.u32.u64.low %v5691_v20, %v1964_v33  ;;  %v5731_v23 = vmul.u32.u64.high %v5691_v20, %v1964_v33, %v5730_v21 }
 0x1df   : > { %v1892_v55 = vshrl.u32 %v1874_v59, %v1890_v62  ;;  %v1895_v4 = vadd.s32 127, %v1894_v0  ;;  %v2038_v12 = vand.u32 31, %v2036_v15  ;;  %vm1809_vm10 = vcmp.lt.s32.totalorder %v5684_v3, 2 }
 0x1e0   : > { %vm1810_vm11 = vcmp.eq.s32.totalorder %v5684_v3, 0  ;;  %vm1813_vm12 = vcmp.eq.s32.totalorder %v5684_v3, 2  ;;  %vm1820_vm13 = vcmp.lt.s32.totalorder %v5475_v1, 0  ;;  %vm5741_vm14 = vcmp.le.f32.partialorder %v1818_v46, 0.7853982 }
 0x1e1   : > { %v1893_v61 = vor.u32 %v1892_v55, %v1891_v53  ;;  %v1896_v58 = vshll.u32 %v1895_v4, 23  ;;  %v1976_v59 = vmul.u32 %v5691_v20, %v1960_v24  ;;  %v2039_v37 = vsub.s32 32, %v2038_v12 }
 0x1e2   : > { %vm1978_vm15 = vc.u32 %v5727_v8, %v5730_v21  ;;  %v1979_v57 = vadd.s32 1, %v5731_v23  ;;  %v5749_v60 = vshll.u32 %v2032_v36, 8  ;;  %v2041_v31 = vshll.u32 %v4147_v26, %v2038_v12 }
 0x1e3   : > { %v3979_v47 = vpop.eup %3978  ;;  %v1897_v46 = vor.u32 4788187, %v1896_v58  ;;  %v1900_v25 = vcvt.s32.f32 %v1893_v61  ;;  %v2042_v27 = vshrl.u32 %v4148_v28, %v2039_v37  ;;  %v2044_v29 = vshll.u32 %v4148_v28, %v2038_v12 }
 0x1e4   : > { %v3981_v5 = vpop.eup %3980  ;;  %v1814_v44 = vxor.u32 2147483648, %v3979_v47  ;;  %v1980_v20 = vsel %vm1978_vm15, %v1979_v57, %v5731_v23  ;;  %v2045_v45 = vshrl.u32 %v4149_v30, %v2039_v37  ;;  %v1904_v49 = vsub.s32 4, %v5681_v40 }
 0x1e5   : > { %v1811_v6 = vxor.u32 2147483648, %v3981_v5  ;;  %v1898_v52 = vand.u32 2147483647, %v1897_v46  ;;  %v1981_v50 = vadd.s32 %v1980_v20, %v1976_v59  ;;  %v2037_v35 = vshrl.u32 %v2036_v15, 5 }
 0x1e6   : > { %v1815_v2 = vsel %vm1813_vm12, %v1814_v44, %v3981_v5  ;;  %v2047_v63 = vshll.u32 %v4149_v30, %v2038_v12  ;;  %v2048_v19 = vshrl.u32 %v4150_v32, %v2039_v37  ;;  %v2043_v36 = vor.u32 %v2042_v27, %v2041_v31 }
 0x1e7   : > { %v1812_v10 = vsel %vm1810_vm11, %v3979_v47, %v1811_v6  ;;  %v1901_v18 = vmul.f32 %v1900_v25, %v1898_v52  ;;  %v1982_v43 = vadd.s32 536870912, %v1981_v50  ;;  %v2050_v16 = vshll.u32 %v4150_v32, %v2038_v12 }
 0x1e8   : > { %v1816_v39 = vsel %vm1809_vm10, %v1812_v10, %v1815_v2  ;;  %v2051_v3 = vshrl.u32 %v4151_v34, %v2039_v37  ;;  %v2053_v13 = vshll.u32 %v4151_v34, %v2038_v12  ;;  %v2046_v24 = vor.u32 %v2045_v45, %v2044_v29 }
 0x1e9   : > { %v1817_v14 = vsel %vm1807_vm9, nan, %v1816_v39  ;;  %v1902_v15 = vxor.u32 2147483648, %v1901_v18  ;;  %v5774_v22 = vshrl.u32 %v1982_v43, 30  ;;  %v2054_v33 = vshrl.u32 %v4152_v41, %v2039_v37 }
 0x1ea   : > { %3481 = vst [vmem:[%s4546_s17 + $0x78] sm:$0xff] %v1817_v14  ;;  %v1905_v51 = vsel %vm1820_vm13, %v1904_v49, %v5681_v40  ;;  %v2052_v54 = vor.u32 %v2051_v3, %v2050_v16  ;;  %vm2056_vm0 = vcmp.lt.s32.totalorder %v2037_v35, 1  ;;  %v2130_v62 = vand.u32 2139095040, %v5765_v7 }
 0x1eb   : > { %v1903_v53 = vsel %vm1820_vm13, %v1902_v15, %v1901_v18  ;;  %v1984_v0 = vshll.u32 %v5774_v22, 30  ;;  %v2049_v11 = vor.u32 %v2048_v19, %v2047_v63  ;;  %vm2059_vm1 = vcmp.lt.s32.totalorder %v2037_v35, 4 }
 0x1ec   : > { %v1906_v56 = vsel %vm5741_vm14, %v5475_v1, %v1903_v53  ;;  %v2040_v23 = vshrl.u32 %v4147_v26, %v2039_v37  ;;  %v2055_v55 = vor.u32 %v2054_v33, %v2053_v13  ;;  %vm2058_vm2 = vcmp.lt.s32.totalorder %v2037_v35, 3 }
 0x1ed   : > { %3982 = vcosq.f32 %v1906_v56  ;;  %v5788_v40 = vsub.s32 %v1981_v50, %v1984_v0  ;;  %vm2057_vm3 = vcmp.lt.s32.totalorder %v2037_v35, 2  ;;  %v2064_v4 = vsel %vm2056_vm0, %v2043_v36, %v2046_v24 }
 0x1ee   : > { %v1907_v12 = vsel %vm5741_vm14, 0, %v1905_v51  ;;  %3984 = vsinq.f32 %v1906_v56  ;;  %v2061_v47 = vsel %vm2059_vm1, %v2049_v11, 2102212464  ;;  %v2065_v61 = vsel %vm2059_vm1, %v2052_v54, 920167782 }
 0x1ef   : > { %v1987_v58 = vsub.s32 0, %v5788_v40  ;;  %v2066_v59 = vsel %vm2058_vm2, %v2049_v11, %v2065_v61  ;;  %v2068_v5 = vsel %vm2056_vm0, %v2046_v24, %v2049_v11  ;;  %v2069_v44 = vsel %vm2059_vm1, %v2055_v55, 1326507024 }
 0x1f0   : > { %v2067_v37 = vsel %vm2057_vm3, %v2064_v4, %v2066_v59  ;;  %v2131_v57 = vshrl.u32 %v2130_v62, 23  ;;  %v1911_v6 = vand.u32 3, %v1907_v12  ;;  %v2060_v46 = vsel %vm2056_vm0, %v2040_v23, %v2043_v36 }
 0x1f1   : > { %v3665_v38 = vmin.u32 %v1987_v58, %v5788_v40  ;;  %v2062_v25 = vsel %vm2058_vm2, %v2046_v24, %v2061_v47  ;;  %v2070_v31 = vsel %vm2058_vm2, %v2052_v54, %v2069_v44  ;;  %vm1910_vm4 = vweird.f32 %v5475_v1 }
 0x1f2   : > { %v5805_v2 = vmul.u32.u64.low %v5749_v60, %v2067_v37  ;;  %v5806_v20 = vmul.u32.u64.high %v5749_v60, %v2067_v37, %v5805_v2  ;;  %v3672_v27 = vadd.s32 4294967169, %v2131_v57  ;;  %v2071_v10 = vsel %vm2057_vm3, %v2068_v5, %v2070_v31 }
 0x1f3   : > { %v1989_v29 = vclz %v3665_v38  ;;  %v2063_v52 = vsel %vm2057_vm3, %v2060_v46, %v2062_v25  ;;  %v5813_v50 = vmul.u32.u64.low %v5749_v60, %v2071_v10  ;;  %v5814_v45 = vmul.u32.u64.high %v5749_v60, %v2071_v10, %v5813_v50  ;;  %v5851_v38 = vld [vmem:[%s4276_s30 + $0xa0] sm:$0xff] }
 0x1f4   : > { %v2137_v39 = vadd.s32 1, %v3672_v27  ;;  %vm1912_vm5 = vcmp.lt.s32.totalorder %v1911_v6, 2  ;;  %vm1923_vm6 = vcmp.lt.s32.totalorder %v5622_v42, 0  ;;  %v2127_v63 = vand.u32 2147483647, %v5765_v7 }
 0x1f5   : > { %v3666_v49 = vadd.s32 4294967294, %v1989_v29  ;;  %vm1913_vm7 = vcmp.eq.s32.totalorder %v1911_v6, 0  ;;  %vm1916_vm8 = vcmp.eq.s32.totalorder %v1911_v6, 2  ;;  %v2082_v14 = vadd.s32 1, %v5806_v20 }
 0x1f6   : > { %vm2138_vm9 = vcmp.gt.s32.totalorder %v2137_v39, 0  ;;  %v1977_v35 = vadd.s32 %v5730_v21, %v5727_v8  ;;  %v2079_v43 = vmul.u32 %v5749_v60, %v2063_v52  ;;  %vm5824_vm11 = vcmp.le.f32.partialorder %v1921_v9, 0.7853982 }
 0x1f7   : > { %v3983_v18 = vpop.eup %3982  ;;  %vm3667_vm10 = vcmp.lt.s32.totalorder %v3666_v49, 0  ;;  %v2139_v19 = vsel %vm2138_vm9, %v2137_v39, 0  ;;  %v2007_v15 = vsub.s32 4, %v5774_v22  ;;  %vm2081_vm12 = vc.u32 %v5814_v45, %v5805_v2 }
 0x1f8   : > { %v3985_v36 = vpop.eup %3984  ;;  %v1917_v16 = vxor.u32 2147483648, %v3983_v18  ;;  %v1992_v13 = vsel %vm3667_vm10, 0, %v3666_v49  ;;  %v2083_v51 = vsel %vm2081_vm12, %v2082_v14, %v5806_v20  ;;  %v2134_v9 = vand.u32 8388607, %v2127_v63 }
 0x1f9   : > { %v1914_v24 = vxor.u32 2147483648, %v3985_v36  ;;  %v1993_v8 = vsub.s32 32, %v1992_v13  ;;  %v1994_v21 = vshll.u32 %v5788_v40, %v1992_v13  ;;  %v1997_v60 = vsub.s32 4294967266, %v1992_v13 }
 0x1fa   : > { %v1918_v33 = vsel %vm1916_vm8, %v1917_v16, %v3985_v36  ;;  %v2141_v54 = vand.u32 31, %v2139_v19  ;;  %v2084_v11 = vadd.s32 %v2083_v51, %v2079_v43  ;;  %v5841_v23 = vsel %vm1923_vm6, %v2007_v15, %v5774_v22 }
 0x1fb   : > { %v1915_v62 = vsel %vm1913_vm7, %v3983_v18, %v1914_v24  ;;  %v1995_v53 = vshrl.u32 %v1977_v35, %v1993_v8  ;;  %v1998_v0 = vadd.s32 127, %v1997_v60  ;;  %v2135_v58 = vor.u32 8388608, %v2134_v9 }
 0x1fc   : > { %v1919_v56 = vsel %vm1912_vm5, %v1915_v62, %v1918_v33  ;;  %v2142_v55 = vsub.s32 32, %v2141_v54  ;;  %v2144_v40 = vshll.u32 %v4147_v26, %v2141_v54  ;;  %v2085_v61 = vadd.s32 536870912, %v2084_v11 }
 0x1fd   : > { %v1920_v4 = vsel %vm1910_vm4, nan, %v1919_v56  ;;  %v1996_v12 = vor.u32 %v1995_v53, %v1994_v21  ;;  %v1999_v47 = vshll.u32 %v1998_v0, 23  ;;  %v2147_v37 = vshll.u32 %v4148_v28, %v2141_v54 }
 0x1fe   : > { %v2145_v59 = vshrl.u32 %v4148_v28, %v2142_v55  ;;  %v2148_v5 = vshrl.u32 %v4149_v30, %v2142_v55  ;;  %3482 = vst [vmem:[%s4546_s17 + $0x80] sm:$0xff] %v1920_v4  ;;  %v2086_v57 = vshrl.u32 %v2085_v61, 30  ;;  %v2140_v6 = vshrl.u32 %v2139_v19, 5 }
 0x1ff   : > { %v2000_v22 = vor.u32 4788187, %v1999_v47  ;;  %v2003_v44 = vcvt.s32.f32 %v1996_v12  ;;  %v2150_v1 = vshll.u32 %v4149_v30, %v2141_v54  ;;  %v2151_v46 = vshrl.u32 %v4150_v32, %v2142_v55 }
 0x200   : > { %v2153_v25 = vshll.u32 %v4150_v32, %v2141_v54  ;;  %v2154_v31 = vshrl.u32 %v4151_v34, %v2142_v55  ;;  %v2010_v27 = vsel %vm5824_vm11, 0, %v5841_v23  ;;  %v2087_v29 = vshll.u32 %v2086_v57, 30 }
 0x201   : > { %v2001_v20 = vand.u32 2147483647, %v2000_v22  ;;  %v2146_v10 = vor.u32 %v2145_v59, %v2144_v40  ;;  %v2149_v52 = vor.u32 %v2148_v5, %v2147_v37  ;;  %v2156_v39 = vshll.u32 %v4151_v34, %v2141_v54 }
 0x202   : > { %v2155_v50 = vor.u32 %v2154_v31, %v2153_v25  ;;  %v2157_v49 = vshrl.u32 %v4152_v41, %v2142_v55  ;;  %v5862_v18 = vsub.s32 %v2084_v11, %v2087_v29  ;;  %vm2159_vm13 = vcmp.lt.s32.totalorder %v2140_v6, 1 }
 0x203   : > { %v2004_v14 = vmul.f32 %v2003_v44, %v2001_v20  ;;  %v2233_v35 = vand.u32 2139095040, %v5851_v38  ;;  %v2143_v43 = vshrl.u32 %v4147_v26, %v2142_v55  ;;  %v2152_v19 = vor.u32 %v2151_v46, %v2150_v1 }
 0x204   : > { %vm2162_vm14 = vcmp.lt.s32.totalorder %v2140_v6, 4  ;;  %v5866_v36 = vshll.u32 %v2135_v58, 8  ;;  %vm2026_vm15 = vcmp.lt.s32.totalorder %v5642_v48, 0  ;;  %v2090_v13 = vsub.s32 0, %v5862_v18 }
 0x205   : > { %v2005_v16 = vxor.u32 2147483648, %v2004_v14  ;;  %vm2160_vm0 = vcmp.lt.s32.totalorder %v2140_v6, 2  ;;  %vm2161_vm1 = vcmp.lt.s32.totalorder %v2140_v6, 3  ;;  %v2158_v15 = vor.u32 %v2157_v49, %v2156_v39  ;;  %v5919_v39 = vld [vmem:[%s4276_s30 + $0xa8] sm:$0xff] }
 0x206   : > { %v2164_v24 = vsel %vm2162_vm14, %v2152_v19, 2102212464  ;;  %v2167_v8 = vsel %vm2159_vm13, %v2146_v10, %v2149_v52  ;;  %v2168_v21 = vsel %vm2162_vm14, %v2155_v50, 920167782  ;;  %v3669_v33 = vmin.u32 %v2090_v13, %v5862_v18 }
 0x207   : > { %v2006_v60 = vsel %vm1923_vm6, %v2005_v16, %v2004_v14  ;;  %v2110_v51 = vsub.s32 4, %v2086_v57  ;;  %v2234_v9 = vshrl.u32 %v2233_v35, 23  ;;  %v2163_v62 = vsel %vm2159_vm13, %v2143_v43, %v2146_v10 }
 0x208   : > { %v2009_v54 = vsel %vm5824_vm11, %v5622_v42, %v2006_v60  ;;  %v2165_v53 = vsel %vm2161_vm1, %v2149_v52, %v2164_v24  ;;  %v2169_v0 = vsel %vm2161_vm1, %v2152_v19, %v2168_v21  ;;  %v2092_v11 = vclz %v3669_v33 }
 0x209   : > { %3986 = vcosq.f32 %v2009_v54  ;;  %v2170_v56 = vsel %vm2160_vm0, %v2167_v8, %v2169_v0  ;;  %v2171_v23 = vsel %vm2159_vm13, %v2149_v52, %v2152_v19  ;;  %v2172_v55 = vsel %vm2162_vm14, %v2158_v15, 1326507024 }
 0x20a   : > { %3988 = vsinq.f32 %v2009_v54  ;;  %v5886_v40 = vmul.u32.u64.low %v5866_v36, %v2170_v56  ;;  %v5887_v4 = vmul.u32.u64.high %v5866_v36, %v2170_v56, %v5886_v40  ;;  %v3670_v3 = vadd.s32 4294967294, %v2092_v11 }
 0x20b   : > { %v2166_v12 = vsel %vm2160_vm0, %v2163_v62, %v2165_v53  ;;  %v2173_v47 = vsel %vm2161_vm1, %v2155_v50, %v2172_v55  ;;  %v3676_v61 = vadd.s32 4294967169, %v2234_v9  ;;  %v2014_v58 = vand.u32 3, %v2010_v27 }
 0x20c   : > { %v2080_v59 = vadd.s32 %v5805_v2, %v5814_v45  ;;  %v2174_v37 = vsel %vm2160_vm0, %v2171_v23, %v2173_v47  ;;  %v2230_v5 = vand.u32 2147483647, %v5851_v38  ;;  %vm3671_vm2 = vcmp.lt.s32.totalorder %v3670_v3, 0 }
 0x20d   : > { %v5897_v22 = vmul.u32.u64.low %v5866_v36, %v2174_v37  ;;  %v5898_v44 = vmul.u32.u64.high %v5866_v36, %v2174_v37, %v5897_v22  ;;  %v2240_v1 = vadd.s32 1, %v3676_v61  ;;  %vm2013_vm3 = vweird.f32 %v5622_v42 }
 0x20e   : > { %v2095_v46 = vsel %vm3671_vm2, 0, %v3670_v3  ;;  %v2111_v25 = vsel %vm2026_vm15, %v2110_v51, %v2086_v57  ;;  %v2182_v31 = vmul.u32 %v5866_v36, %v2166_v12  ;;  %v2185_v2 = vadd.s32 1, %v5887_v4 }
 0x20f   : > { %v2096_v45 = vsub.s32 32, %v2095_v46  ;;  %v2097_v6 = vshll.u32 %v5862_v18, %v2095_v46  ;;  %v2100_v20 = vsub.s32 4294967266, %v2095_v46  ;;  %vm2241_vm4 = vcmp.gt.s32.totalorder %v2240_v1, 0 }
 0x210   : > { %vm2015_vm5 = vcmp.lt.s32.totalorder %v2014_v58, 2  ;;  %vm5908_vm6 = vcmp.le.f32.partialorder %v2024_v17, 0.7853982  ;;  %v2237_v29 = vand.u32 8388607, %v2230_v5  ;;  %v2242_v57 = vsel %vm2241_vm4, %v2240_v1, 0 }
 0x211   : > { %v2098_v10 = vshrl.u32 %v2080_v59, %v2096_v45  ;;  %v2101_v52 = vadd.s32 127, %v2100_v20  ;;  %v2113_v50 = vsel %vm5908_vm6, 0, %v2111_v25  ;;  %vm2184_vm7 = vc.u32 %v5898_v44, %v5886_v40 }
 0x212   : > { %vm2016_vm8 = vcmp.eq.s32.totalorder %v2014_v58, 0  ;;  %vm2019_vm9 = vcmp.eq.s32.totalorder %v2014_v58, 2  ;;  %v2186_v17 = vsel %vm2184_vm7, %v2185_v2, %v5887_v4  ;;  %v2244_v49 = vand.u32 31, %v2242_v57 }
 0x213   : > { %v3987_v14 = vpop.eup %3986  ;;  %v2099_v18 = vor.u32 %v2098_v10, %v2097_v6  ;;  %v2102_v35 = vshll.u32 %v2101_v52, 23  ;;  %v2187_v43 = vadd.s32 %v2186_v17, %v2182_v31  ;;  %v2333_v19 = vand.u32 2147483647, %v5919_v39 }
 0x214   : > { %v3989_v36 = vpop.eup %3988  ;;  %v2020_v16 = vxor.u32 2147483648, %v3987_v14  ;;  %v5923_v13 = vand.u32 3, %v2113_v50  ;;  %v2238_v15 = vor.u32 8388608, %v2237_v29  ;;  %v2245_v24 = vsub.s32 32, %v2244_v49 }
 0x215   : > { %v2017_v8 = vxor.u32 2147483648, %v3989_v36  ;;  %v2103_v21 = vor.u32 4788187, %v2102_v35  ;;  %v2106_v60 = vcvt.s32.f32 %v2099_v18  ;;  %v2188_v33 = vadd.s32 536870912, %v2187_v43 }
 0x216   : > { %v2021_v51 = vsel %vm2019_vm9, %v2020_v16, %v3989_v36  ;;  %v2247_v9 = vshll.u32 %v4147_v26, %v2244_v49  ;;  %v2250_v54 = vshll.u32 %v4148_v28, %v2244_v49  ;;  %v2336_v62 = vand.u32 2139095040, %v5919_v39 }
 0x217   : > { %v2018_v53 = vsel %vm2016_vm8, %v3987_v14, %v2017_v8  ;;  %v2104_v0 = vand.u32 2147483647, %v2103_v21  ;;  %v5930_v11 = vshrl.u32 %v2188_v33, 30  ;;  %v2248_v56 = vshrl.u32 %v4148_v28, %v2245_v24 }
 0x218   : > { %v2022_v23 = vsel %vm2015_vm5, %v2018_v53, %v2021_v51  ;;  %v2251_v55 = vshrl.u32 %v4149_v30, %v2245_v24  ;;  %v2253_v4 = vshll.u32 %v4149_v30, %v2244_v49  ;;  %v2254_v3 = vshrl.u32 %v4150_v32, %v2245_v24 }
 0x219   : > { %v2023_v12 = vsel %vm2013_vm3, nan, %v2022_v23  ;;  %v2107_v47 = vmul.f32 %v2106_v60, %v2104_v0  ;;  %v2190_v61 = vshll.u32 %v5930_v11, 30  ;;  %v2243_v59 = vshrl.u32 %v2242_v57, 5 }
 0x21a   : > { %v2256_v37 = vshll.u32 %v4150_v32, %v2244_v49  ;;  %v2257_v22 = vshrl.u32 %v4151_v34, %v2245_v24  ;;  %v2259_v58 = vshll.u32 %v4151_v34, %v2244_v49  ;;  %v2337_v1 = vshrl.u32 %v2336_v62, 23  ;;  %3483 = vst [vmem:[%s4546_s17 + $0x88] sm:$0xff] %v2023_v12 }
 0x21b   : > { %v2108_v46 = vxor.u32 2147483648, %v2107_v47  ;;  %v5944_v25 = vsub.s32 %v2187_v43, %v2190_v61  ;;  %v2260_v31 = vshrl.u32 %v4152_v41, %v2245_v24  ;;  %v5947_v2 = vshll.u32 %v2238_v15, 8 }
 0x21c   : > { %v2246_v42 = vshrl.u32 %v4147_v26, %v2245_v24  ;;  %v2249_v45 = vor.u32 %v2248_v56, %v2247_v9  ;;  %v2252_v6 = vor.u32 %v2251_v55, %v2250_v54  ;;  %v2255_v20 = vor.u32 %v2254_v3, %v2253_v4 }
 0x21d   : > { %v2109_v29 = vsel %vm2026_vm15, %v2108_v46, %v2107_v47  ;;  %v2193_v57 = vsub.s32 0, %v5944_v25  ;;  %v2258_v10 = vor.u32 %v2257_v22, %v2256_v37  ;;  %vm2262_vm10 = vcmp.lt.s32.totalorder %v2243_v59, 1 }
 0x21e   : > { %v2112_v52 = vsel %vm5908_vm6, %v5642_v48, %v2109_v29  ;;  %v2261_v50 = vor.u32 %v2260_v31, %v2259_v58  ;;  %vm2265_vm11 = vcmp.lt.s32.totalorder %v2243_v59, 4  ;;  %v3680_v17 = vadd.s32 4294967169, %v2337_v1 }
 0x21f   : > { %3990 = vcosq.f32 %v2112_v52  ;;  %v3673_v49 = vmin.u32 %v2193_v57, %v5944_v25  ;;  %vm2263_vm12 = vcmp.lt.s32.totalorder %v2243_v59, 2  ;;  %vm2264_vm13 = vcmp.lt.s32.totalorder %v2243_v59, 3 }
 0x220   : > { %3992 = vsinq.f32 %v2112_v52  ;;  %v2266_v14 = vsel %vm2262_vm10, %v2246_v42, %v2249_v45  ;;  %v2267_v18 = vsel %vm2265_vm11, %v2255_v20, 2102212464  ;;  %v2270_v35 = vsel %vm2262_vm10, %v2249_v45, %v2252_v6 }
 0x221   : > { %v2195_v43 = vclz %v3673_v49  ;;  %v2268_v36 = vsel %vm2264_vm13, %v2252_v6, %v2267_v18  ;;  %v2271_v27 = vsel %vm2265_vm11, %v2258_v10, 920167782  ;;  %v2274_v16 = vsel %vm2262_vm10, %v2252_v6, %v2255_v20 }
 0x222   : > { %v2183_v15 = vadd.s32 %v5886_v40, %v5898_v44  ;;  %v2272_v24 = vsel %vm2264_vm13, %v2255_v20, %v2271_v27  ;;  %v2275_v8 = vsel %vm2265_vm11, %v2261_v50, 1326507024  ;;  %v2343_v21 = vadd.s32 1, %v3680_v17 }
 0x223   : > { %v3674_v60 = vadd.s32 4294967294, %v2195_v43  ;;  %v2269_v33 = vsel %vm2263_vm12, %v2266_v14, %v2268_v36  ;;  %v2273_v51 = vsel %vm2263_vm12, %v2270_v35, %v2272_v24  ;;  %v2276_v9 = vsel %vm2264_vm13, %v2258_v10, %v2275_v8 }
 0x224   : > { %vm2116_vm14 = vweird.f32 %v5642_v48  ;;  %v2277_v54 = vsel %vm2263_vm12, %v2274_v16, %v2276_v9  ;;  %v5973_v62 = vmul.u32.u64.low %v5947_v2, %v2273_v51  ;;  %v5974_v53 = vmul.u32.u64.high %v5947_v2, %v2273_v51, %v5973_v62 }
 0x225   : > { %vm2344_vm15 = vcmp.gt.s32.totalorder %v2343_v21, 0  ;;  %vm3675_vm0 = vcmp.lt.s32.totalorder %v3674_v60, 0  ;;  %v5978_v40 = vmul.u32.u64.low %v5947_v2, %v2277_v54  ;;  %v5979_v44 = vmul.u32.u64.high %v5947_v2, %v2277_v54, %v5978_v40 }
 0x226   : > { %v2345_v0 = vsel %vm2344_vm15, %v2343_v21, 0  ;;  %vm2118_vm1 = vcmp.lt.s32.totalorder %v5923_v13, 2  ;;  %vm2119_vm2 = vcmp.eq.s32.totalorder %v5923_v13, 0  ;;  %v2198_v56 = vsel %vm3675_vm0, 0, %v3674_v60 }
 0x227   : > { %v2347_v23 = vand.u32 31, %v2345_v0  ;;  %v2199_v55 = vsub.s32 32, %v2198_v56  ;;  %v2200_v4 = vshll.u32 %v5944_v25, %v2198_v56  ;;  %v2203_v3 = vsub.s32 4294967266, %v2198_v56 }
 0x228   : > { %v2285_v12 = vmul.u32 %v5947_v2, %v2269_v33  ;;  %vm2122_vm3 = vcmp.eq.s32.totalorder %v5923_v13, 2  ;;  %v2288_v47 = vadd.s32 1, %v5974_v53  ;;  %v2340_v61 = vand.u32 8388607, %v2333_v19 }
 0x229   : > { %v2348_v59 = vsub.s32 32, %v2347_v23  ;;  %v3991_v37 = vpop.eup %3990  ;;  %v2201_v22 = vshrl.u32 %v2183_v15, %v2199_v55  ;;  %v2204_v58 = vadd.s32 127, %v2203_v3  ;;  %v2213_v1 = vsub.s32 4, %v5930_v11 }
 0x22a   : > { %vm2287_vm4 = vc.u32 %v5979_v44, %v5973_v62  ;;  %v3993_v46 = vpop.eup %3992  ;;  %v2123_v25 = vxor.u32 2147483648, %v3991_v37  ;;  %vm2129_vm5 = vcmp.lt.s32.totalorder %v5765_v7, 0  ;;  %v5994_v2 = vshrl.u32 %v2345_v0, 5 }
 0x22b   : > { %v2289_v31 = vsel %vm2287_vm4, %v2288_v47, %v5974_v53  ;;  %v2350_v42 = vshll.u32 %v4147_v26, %v2347_v23  ;;  %v2120_v45 = vxor.u32 2147483648, %v3993_v46  ;;  %vm5999_vm6 = vcmp.le.f32.partialorder %v2127_v63, 0.7853982 }
 0x22c   : > { %v2202_v20 = vor.u32 %v2201_v22, %v2200_v4  ;;  %v2205_v29 = vshll.u32 %v2204_v58, 23  ;;  %v2290_v57 = vadd.s32 %v2289_v31, %v2285_v12  ;;  %v2124_v10 = vsel %vm2122_vm3, %v2123_v25, %v3993_v46  ;;  %v6058_v31 = vld [vmem:[%s4276_s30 + $0xb0] sm:$0xff] }
 0x22d   : > { %v2351_v52 = vshrl.u32 %v4148_v28, %v2348_v59  ;;  %v2353_v50 = vshll.u32 %v4148_v28, %v2347_v23  ;;  %v2354_v17 = vshrl.u32 %v4149_v30, %v2348_v59  ;;  %v2121_v49 = vsel %vm2119_vm2, %v3991_v37, %v2120_v45 }
 0x22e   : > { %v2206_v63 = vor.u32 4788187, %v2205_v29  ;;  %v2209_v14 = vcvt.s32.f32 %v2202_v20  ;;  %v2291_v18 = vadd.s32 536870912, %v2290_v57  ;;  %v2125_v35 = vsel %vm2118_vm1, %v2121_v49, %v2124_v10 }
 0x22f   : > { %v2356_v43 = vshll.u32 %v4149_v30, %v2347_v23  ;;  %v2357_v36 = vshrl.u32 %v4150_v32, %v2348_v59  ;;  %v2359_v27 = vshll.u32 %v4150_v32, %v2347_v23  ;;  %v2126_v16 = vsel %vm2116_vm14, nan, %v2125_v35 }
 0x230   : > { %v2207_v15 = vand.u32 2147483647, %v2206_v63  ;;  %v6017_v24 = vshrl.u32 %v2291_v18, 30  ;;  %v2360_v8 = vshrl.u32 %v4151_v34, %v2348_v59  ;;  %v2341_v21 = vor.u32 8388608, %v2340_v61  ;;  %3484 = vst [vmem:[%s4546_s17 + $0x90] sm:$0xff] %v2126_v16 }
 0x231   : > { %v2352_v60 = vor.u32 %v2351_v52, %v2350_v42  ;;  %v2362_v33 = vshll.u32 %v4151_v34, %v2347_v23  ;;  %v2363_v13 = vshrl.u32 %v4152_v41, %v2348_v59  ;;  %v2355_v54 = vor.u32 %v2354_v17, %v2353_v50 }
 0x232   : > { %v2210_v51 = vmul.f32 %v2209_v14, %v2207_v15  ;;  %v2293_v9 = vshll.u32 %v6017_v24, 30  ;;  %v2361_v53 = vor.u32 %v2360_v8, %v2359_v27  ;;  %v2349_v48 = vshrl.u32 %v4147_v26, %v2348_v59 }
 0x233   : > { %v2358_v40 = vor.u32 %v2357_v36, %v2356_v43  ;;  %vm2365_vm7 = vcmp.lt.s32.totalorder %v5994_v2, 1  ;;  %vm2368_vm8 = vcmp.lt.s32.totalorder %v5994_v2, 4  ;;  %v2214_v56 = vsel %vm2129_vm5, %v2213_v1, %v5930_v11  ;;  %v6088_v43 = vld [vmem:[%s4276_s30 + $0xb8] sm:$0xff] }
 0x234   : > { %v2211_v0 = vxor.u32 2147483648, %v2210_v51  ;;  %v6030_v23 = vsub.s32 %v2290_v57, %v2293_v9  ;;  %vm2367_vm9 = vcmp.lt.s32.totalorder %v5994_v2, 3  ;;  %v2364_v55 = vor.u32 %v2363_v13, %v2362_v33 }
 0x235   : > { %v2370_v4 = vsel %vm2368_vm8, %v2358_v40, 2102212464  ;;  %v2374_v3 = vsel %vm2368_vm8, %v2361_v53, 920167782  ;;  %v2381_v12 = vshll.u32 %v2341_v21, 8  ;;  %vm2366_vm10 = vcmp.lt.s32.totalorder %v5994_v2, 2 }
 0x236   : > { %v2212_v47 = vsel %vm2129_vm5, %v2211_v0, %v2210_v51  ;;  %v2296_v61 = vsub.s32 0, %v6030_v23  ;;  %v2373_v11 = vsel %vm2365_vm7, %v2352_v60, %v2355_v54  ;;  %v2216_v37 = vsel %vm5999_vm6, 0, %v2214_v56 }
 0x237   : > { %v2215_v59 = vsel %vm5999_vm6, %v5765_v7, %v2212_v47  ;;  %v2369_v22 = vsel %vm2365_vm7, %v2349_v48, %v2352_v60  ;;  %v2375_v58 = vsel %vm2367_vm9, %v2358_v40, %v2374_v3  ;;  %v2371_v46 = vsel %vm2367_vm9, %v2355_v54, %v2370_v4 }
 0x238   : > { %3994 = vcosq.f32 %v2215_v59  ;;  %v3677_v1 = vmin.u32 %v2296_v61, %v6030_v23  ;;  %v2377_v25 = vsel %vm2365_vm7, %v2355_v54, %v2358_v40  ;;  %v2376_v42 = vsel %vm2366_vm10, %v2373_v11, %v2375_v58 }
 0x239   : > { %3996 = vsinq.f32 %v2215_v59  ;;  %v2378_v45 = vsel %vm2368_vm8, %v2364_v55, 1326507024  ;;  %v6066_v29 = vmul.u32.u64.low %v2381_v12, %v2376_v42  ;;  %v6067_v57 = vmul.u32.u64.high %v2381_v12, %v2376_v42, %v6066_v29 }
 0x23a   : > { %v2298_v6 = vclz %v3677_v1  ;;  %v2379_v20 = vsel %vm2367_vm9, %v2361_v53, %v2378_v45  ;;  %v2220_v10 = vand.u32 3, %v2216_v37  ;;  %v2316_v52 = vsub.s32 4, %v6017_v24 }
 0x23b   : > { %v2372_v50 = vsel %vm2366_vm10, %v2369_v22, %v2371_v46  ;;  %v2380_v17 = vsel %vm2366_vm10, %v2377_v25, %v2379_v20  ;;  %v2439_v18 = vand.u32 2139095040, %v6058_v31  ;;  %vm2219_vm11 = vweird.f32 %v5765_v7 }
 0x23c   : > { %v3678_v49 = vadd.s32 4294967294, %v2298_v6  ;;  %v6075_v63 = vmul.u32.u64.low %v2381_v12, %v2380_v17  ;;  %v6076_v14 = vmul.u32.u64.high %v2381_v12, %v2380_v17, %v6075_v63  ;;  %vm6082_vm12 = vcmp.le.f32.partialorder %v2230_v5, 0.7853982 }
 0x23d   : > { %vm2232_vm13 = vcmp.lt.s32.totalorder %v5851_v38, 0  ;;  %v2286_v2 = vadd.s32 %v5973_v62, %v5979_v44  ;;  %v2391_v36 = vadd.s32 1, %v6067_v57  ;;  %v2440_v27 = vshrl.u32 %v2439_v18, 23 }
 0x23e   : > { %vm3679_vm14 = vcmp.lt.s32.totalorder %v3678_v49, 0  ;;  %vm2221_vm15 = vcmp.lt.s32.totalorder %v2220_v10, 2  ;;  %v2388_v15 = vmul.u32 %v2381_v12, %v2372_v50  ;;  %v2436_v8 = vand.u32 2147483647, %v6058_v31 }
 0x23f   : > { %v2301_v16 = vsel %vm3679_vm14, 0, %v3678_v49  ;;  %v2317_v33 = vsel %vm2232_vm13, %v2316_v52, %v6017_v24  ;;  %vm2222_vm0 = vcmp.eq.s32.totalorder %v2220_v10, 0  ;;  %vm2390_vm1 = vc.u32 %v6076_v14, %v6066_v29 }
 0x240   : > { %v2302_v5 = vsub.s32 32, %v2301_v16  ;;  %v2303_v21 = vshll.u32 %v6030_v23, %v2301_v16  ;;  %v2306_v60 = vsub.s32 4294967266, %v2301_v16  ;;  %v3684_v62 = vadd.s32 4294967169, %v2440_v27 }
 0x241   : > { %v2542_v44 = vand.u32 2139095040, %v6088_v43  ;;  %vm2225_vm2 = vcmp.eq.s32.totalorder %v2220_v10, 2  ;;  %v2392_v54 = vsel %vm2390_vm1, %v2391_v36, %v6067_v57  ;;  %v2319_v40 = vsel %vm6082_vm12, 0, %v2317_v33 }
 0x242   : > { %v3995_v13 = vpop.eup %3994  ;;  %v2304_v51 = vshrl.u32 %v2286_v2, %v2302_v5  ;;  %v2307_v9 = vadd.s32 127, %v2306_v60  ;;  %v2393_v0 = vadd.s32 %v2392_v54, %v2388_v15  ;;  %v2446_v24 = vadd.s32 1, %v3684_v62 }
 0x243   : > { %v3997_v53 = vpop.eup %3996  ;;  %v2226_v48 = vxor.u32 2147483648, %v3995_v13  ;;  %v2443_v4 = vand.u32 8388607, %v2436_v8  ;;  %v2543_v47 = vshrl.u32 %v2542_v44, 23  ;;  %v6112_v42 = vand.u32 3, %v2319_v40 }
 0x244   : > { %v2223_v56 = vxor.u32 2147483648, %v3997_v53  ;;  %v2305_v23 = vor.u32 %v2304_v51, %v2303_v21  ;;  %v2308_v55 = vshll.u32 %v2307_v9, 23  ;;  %v2394_v12 = vadd.s32 536870912, %v2393_v0 }
 0x245   : > { %v2227_v3 = vsel %vm2225_vm2, %v2226_v48, %v3997_v53  ;;  %vm2447_vm3 = vcmp.gt.s32.totalorder %v2446_v24, 0  ;;  %v2444_v6 = vor.u32 8388608, %v2443_v4  ;;  %v2539_v57 = vand.u32 2147483647, %v6088_v43 }
 0x246   : > { %v2224_v61 = vsel %vm2222_vm0, %v3995_v13, %v2223_v56  ;;  %v2309_v11 = vor.u32 4788187, %v2308_v55  ;;  %v2312_v59 = vcvt.s32.f32 %v2305_v23  ;;  %v2448_v37 = vsel %vm2447_vm3, %v2446_v24, 0 }
 0x247   : > { %v2228_v22 = vsel %vm2221_vm15, %v2224_v61, %v2227_v3  ;;  %v6108_v58 = vshrl.u32 %v2394_v12, 30  ;;  %v2450_v1 = vand.u32 31, %v2448_v37  ;;  %v2389_v10 = vadd.s32 %v6066_v29, %v6076_v14 }
 0x248   : > { %v2229_v46 = vsel %vm2219_vm11, nan, %v2228_v22  ;;  %v2310_v25 = vand.u32 2147483647, %v2309_v11  ;;  %v3688_v17 = vadd.s32 4294967169, %v2543_v47  ;;  %v2449_v14 = vshrl.u32 %v2448_v37, 5 }
 0x249   : > { %v2396_v45 = vshll.u32 %v6108_v58, 30  ;;  %v2451_v20 = vsub.s32 32, %v2450_v1  ;;  %3485 = vst [vmem:[%s4546_s17 + $0x98] sm:$0xff] %v2229_v46  ;;  %v2453_v50 = vshll.u32 %v4147_v26, %v2450_v1  ;;  %v2456_v63 = vshll.u32 %v4148_v28, %v2450_v1 }
 0x24a   : > { %v2313_v52 = vmul.f32 %v2312_v59, %v2310_v25  ;;  %v2459_v18 = vshll.u32 %v4149_v30, %v2450_v1  ;;  %v2462_v16 = vshll.u32 %v4150_v32, %v2450_v1  ;;  %v6130_v5 = vshll.u32 %v2444_v6, 8 }
 0x24b   : > { %v6120_v49 = vsub.s32 %v2393_v0, %v2396_v45  ;;  %v2454_v7 = vshrl.u32 %v4148_v28, %v2451_v20  ;;  %v2457_v36 = vshrl.u32 %v4149_v30, %v2451_v20  ;;  %v2460_v27 = vshrl.u32 %v4150_v32, %v2451_v20 }
 0x24c   : > { %v2314_v2 = vxor.u32 2147483648, %v2313_v52  ;;  %v2463_v15 = vshrl.u32 %v4151_v34, %v2451_v20  ;;  %v2452_v60 = vshrl.u32 %v4147_v26, %v2451_v20  ;;  %v2465_v33 = vshll.u32 %v4151_v34, %v2450_v1 }
 0x24d   : > { %v2399_v29 = vsub.s32 0, %v6120_v49  ;;  %v2549_v62 = vadd.s32 1, %v3688_v17  ;;  %v2455_v51 = vor.u32 %v2454_v7, %v2453_v50  ;;  %v2458_v9 = vor.u32 %v2457_v36, %v2456_v63 }
 0x24e   : > { %v2315_v21 = vsel %vm2232_vm13, %v2314_v2, %v2313_v52  ;;  %v2461_v54 = vor.u32 %v2460_v27, %v2459_v18  ;;  %v2464_v53 = vor.u32 %v2463_v15, %v2462_v16  ;;  %v2466_v48 = vshrl.u32 %v4152_v41, %v2451_v20 }
 0x24f   : > { %v2318_v44 = vsel %vm6082_vm12, %v5851_v38, %v2315_v21  ;;  %v3681_v13 = vmin.u32 %v2399_v29, %v6120_v49  ;;  %vm2468_vm4 = vcmp.lt.s32.totalorder %v2449_v14, 1  ;;  %vm2469_vm5 = vcmp.lt.s32.totalorder %v2449_v14, 2 }
 0x250   : > { %3998 = vcosq.f32 %v2318_v44  ;;  %v2467_v0 = vor.u32 %v2466_v48, %v2465_v33  ;;  %vm2470_vm6 = vcmp.lt.s32.totalorder %v2449_v14, 3  ;;  %vm2471_vm7 = vcmp.lt.s32.totalorder %v2449_v14, 4 }
 0x251   : > { %4000 = vsinq.f32 %v2318_v44  ;;  %v2401_v40 = vclz %v3681_v13  ;;  %v2472_v24 = vsel %vm2468_vm4, %v2452_v60, %v2455_v51  ;;  %v2473_v35 = vsel %vm2471_vm7, %v2461_v54, 2102212464 }
 0x252   : > { %v2476_v23 = vsel %vm2468_vm4, %v2455_v51, %v2458_v9  ;;  %v2477_v55 = vsel %vm2471_vm7, %v2464_v53, 920167782  ;;  %v2474_v4 = vsel %vm2470_vm6, %v2458_v9, %v2473_v35  ;;  %v2480_v12 = vsel %vm2468_vm4, %v2458_v9, %v2461_v54 }
 0x253   : > { %v3682_v56 = vadd.s32 4294967294, %v2401_v40  ;;  %v2478_v3 = vsel %vm2470_vm6, %v2461_v54, %v2477_v55  ;;  %v2481_v47 = vsel %vm2471_vm7, %v2467_v0, 1326507024  ;;  %vm2322_vm8 = vweird.f32 %v5851_v38 }
 0x254   : > { %vm2335_vm9 = vcmp.lt.s32.totalorder %v5919_v39, 0  ;;  %v2479_v61 = vsel %vm2469_vm5, %v2476_v23, %v2478_v3  ;;  %v2482_v11 = vsel %vm2470_vm6, %v2464_v53, %v2481_v47  ;;  %vm2550_vm11 = vcmp.gt.s32.totalorder %v2549_v62, 0 }
 0x255   : > { %vm3683_vm10 = vcmp.lt.s32.totalorder %v3682_v56, 0  ;;  %v2483_v37 = vsel %vm2469_vm5, %v2480_v12, %v2482_v11  ;;  %v6146_v22 = vmul.u32.u64.low %v6130_v5, %v2479_v61  ;;  %v6147_v1 = vmul.u32.u64.high %v6130_v5, %v2479_v61, %v6146_v22 }
 0x256   : > { %v2404_v59 = vsel %vm3683_vm10, 0, %v3682_v56  ;;  %v2475_v6 = vsel %vm2469_vm5, %v2472_v24, %v2474_v4  ;;  %v6153_v20 = vmul.u32.u64.low %v6130_v5, %v2483_v37  ;;  %v6154_v52 = vmul.u32.u64.high %v6130_v5, %v2483_v37, %v6153_v20 }
 0x257   : > { %v2405_v46 = vsub.s32 32, %v2404_v59  ;;  %v2406_v25 = vshll.u32 %v6120_v49, %v2404_v59  ;;  %v2409_v45 = vsub.s32 4294967266, %v2404_v59  ;;  %v2546_v50 = vand.u32 8388607, %v2539_v57 }
 0x258   : > { %v2551_v17 = vsel %vm2550_vm11, %v2549_v62, 0  ;;  %vm2325_vm12 = vcmp.eq.s32.totalorder %v6112_v42, 0  ;;  %vm2328_vm13 = vcmp.eq.s32.totalorder %v6112_v42, 2  ;;  %vm6162_vm14 = vcmp.le.f32.partialorder %v2333_v19, 0.7853982 }
 0x259   : > { %v2407_v7 = vshrl.u32 %v2389_v10, %v2405_v46  ;;  %v2410_v63 = vadd.s32 127, %v2409_v45  ;;  %v2553_v18 = vand.u32 31, %v2551_v17  ;;  %v2419_v36 = vsub.s32 4, %v6108_v58 }
 0x25a   : > { %v3999_v2 = vpop.eup %3998  ;;  %v2491_v27 = vmul.u32 %v6130_v5, %v2475_v6  ;;  %v2494_v16 = vadd.s32 1, %v6147_v1  ;;  %vm2324_vm15 = vcmp.lt.s32.totalorder %v6112_v42, 2  ;;  %vm2493_vm0 = vc.u32 %v6154_v52, %v6146_v22 }
 0x25b   : > { %v4001_v29 = vpop.eup %4000  ;;  %v2329_v14 = vxor.u32 2147483648, %v3999_v2  ;;  %v2408_v10 = vor.u32 %v2407_v7, %v2406_v25  ;;  %v2411_v15 = vshll.u32 %v2410_v63, 23  ;;  %v2554_v21 = vsub.s32 32, %v2553_v18 }
 0x25c   : > { %v2326_v60 = vxor.u32 2147483648, %v4001_v29  ;;  %v2547_v19 = vor.u32 8388608, %v2546_v50  ;;  %v2495_v13 = vsel %vm2493_vm0, %v2494_v16, %v6147_v1  ;;  %v2420_v51 = vsel %vm2335_vm9, %v2419_v36, %v6108_v58  ;;  %v6197_v1 = vld [vmem:[%s4276_s30 + $0xc0] sm:$0xff] }
 0x25d   : > { %v2330_v33 = vsel %vm2328_vm13, %v2329_v14, %v4001_v29  ;;  %v2412_v62 = vor.u32 4788187, %v2411_v15  ;;  %v2415_v44 = vcvt.s32.f32 %v2408_v10  ;;  %v2496_v9 = vadd.s32 %v2495_v13, %v2491_v27 }
 0x25e   : > { %v2327_v5 = vsel %vm2325_vm12, %v3999_v2, %v2326_v60  ;;  %v2556_v54 = vshll.u32 %v4147_v26, %v2553_v18  ;;  %v2557_v40 = vshrl.u32 %v4148_v28, %v2554_v21  ;;  %v2559_v0 = vshll.u32 %v4148_v28, %v2553_v18 }
 0x25f   : > { %v2331_v53 = vsel %vm2324_vm15, %v2327_v5, %v2330_v33  ;;  %v2413_v48 = vand.u32 2147483647, %v2412_v62  ;;  %v2497_v56 = vadd.s32 536870912, %v2496_v9  ;;  %v2560_v42 = vshrl.u32 %v4149_v30, %v2554_v21 }
 0x260   : > { %v2332_v24 = vsel %vm2322_vm8, nan, %v2331_v53  ;;  %v2562_v35 = vshll.u32 %v4149_v30, %v2553_v18  ;;  %v2552_v58 = vshrl.u32 %v2551_v17, 5  ;;  %v2563_v55 = vshrl.u32 %v4150_v32, %v2554_v21 }
 0x261   : > { %v2416_v23 = vmul.f32 %v2415_v44, %v2413_v48  ;;  %v2565_v4 = vshll.u32 %v4150_v32, %v2553_v18  ;;  %3486 = vst [vmem:[%s4546_s17 + $0xa0] sm:$0xff] %v2332_v24  ;;  %v2498_v3 = vshrl.u32 %v2497_v56, 30  ;;  %v2566_v12 = vshrl.u32 %v4151_v34, %v2554_v21 }
 0x262   : > { %v2568_v47 = vshll.u32 %v4151_v34, %v2553_v18  ;;  %v2569_v38 = vshrl.u32 %v4152_v41, %v2554_v21  ;;  %v2422_v11 = vsel %vm6162_vm14, 0, %v2420_v51  ;;  %v2555_v59 = vshrl.u32 %v4147_v26, %v2554_v21 }
 0x263   : > { %v2417_v61 = vxor.u32 2147483648, %v2416_v23  ;;  %v6194_v37 = vshll.u32 %v2547_v19, 8  ;;  %v2499_v46 = vshll.u32 %v2498_v3, 30  ;;  %v2558_v25 = vor.u32 %v2557_v40, %v2556_v54 }
 0x264   : > { %v2561_v45 = vor.u32 %v2560_v42, %v2559_v0  ;;  %v2564_v6 = vor.u32 %v2563_v55, %v2562_v35  ;;  %v2567_v50 = vor.u32 %v2566_v12, %v2565_v4  ;;  %v2570_v17 = vor.u32 %v2569_v38, %v2568_v47  ;;  %v6244_v47 = vld [vmem:[%s4276_s30 + $0xc8] sm:$0xff] }
 0x265   : > { %v2418_v20 = vsel %vm2335_vm9, %v2417_v61, %v2416_v23  ;;  %vm2574_vm1 = vcmp.lt.s32.totalorder %v2552_v58, 4  ;;  %v6204_v63 = vsub.s32 %v2496_v9, %v2499_v46  ;;  %vm2571_vm2 = vcmp.lt.s32.totalorder %v2552_v58, 1 }
 0x266   : > { %v2421_v7 = vsel %vm6162_vm14, %v5919_v39, %v2418_v20  ;;  %v2576_v18 = vsel %vm2574_vm1, %v2564_v6, 2102212464  ;;  %vm2572_vm3 = vcmp.lt.s32.totalorder %v2552_v58, 2  ;;  %vm2573_vm4 = vcmp.lt.s32.totalorder %v2552_v58, 3 }
 0x267   : > { %4002 = vcosq.f32 %v2421_v7  ;;  %v2645_v2 = vand.u32 2139095040, %v6197_v1  ;;  %v2502_v36 = vsub.s32 0, %v6204_v63  ;;  %v2575_v27 = vsel %vm2571_vm2, %v2555_v59, %v2558_v25 }
 0x268   : > { %4004 = vsinq.f32 %v2421_v7  ;;  %v2577_v16 = vsel %vm2573_vm4, %v2561_v45, %v2576_v18  ;;  %v2579_v29 = vsel %vm2571_vm2, %v2558_v25, %v2561_v45  ;;  %v2580_v14 = vsel %vm2574_vm1, %v2567_v50, 920167782 }
 0x269   : > { %v2583_v49 = vsel %vm2571_vm2, %v2561_v45, %v2564_v6  ;;  %v2584_v10 = vsel %vm2574_vm1, %v2570_v17, 1326507024  ;;  %vm2438_vm5 = vcmp.lt.s32.totalorder %v6058_v31, 0  ;;  %v3685_v15 = vmin.u32 %v2502_v36, %v6204_v63 }
 0x26a   : > { %v2522_v21 = vsub.s32 4, %v2498_v3  ;;  %v2426_v60 = vand.u32 3, %v2422_v11  ;;  %v2581_v19 = vsel %vm2573_vm4, %v2564_v6, %v2580_v14  ;;  %v2585_v33 = vsel %vm2573_vm4, %v2567_v50, %v2584_v10 }
 0x26b   : > { %v2646_v62 = vshrl.u32 %v2645_v2, 23  ;;  %vm2425_vm6 = vweird.f32 %v5919_v39  ;;  %v2504_v44 = vclz %v3685_v15  ;;  %v2578_v13 = vsel %vm2572_vm3, %v2575_v27, %v2577_v16 }
 0x26c   : > { %v2582_v5 = vsel %vm2572_vm3, %v2579_v29, %v2581_v19  ;;  %v2586_v51 = vsel %vm2572_vm3, %v2583_v49, %v2585_v33  ;;  %vm6228_vm7 = vcmp.le.f32.partialorder %v2436_v8, 0.7853982  ;;  %v2523_v24 = vsel %vm2438_vm5, %v2522_v21, %v2498_v3 }
 0x26d   : > { %v6218_v9 = vmul.u32.u64.low %v6194_v37, %v2586_v51  ;;  %v6219_v54 = vmul.u32.u64.high %v6194_v37, %v2586_v51, %v6218_v9  ;;  %v6222_v53 = vmul.u32.u64.low %v6194_v37, %v2582_v5  ;;  %v6223_v48 = vmul.u32.u64.high %v6194_v37, %v2582_v5, %v6222_v53 }
 0x26e   : > { %v3686_v0 = vadd.s32 4294967294, %v2504_v44  ;;  %v3692_v56 = vadd.s32 4294967169, %v2646_v62  ;;  %vm2427_vm8 = vcmp.lt.s32.totalorder %v2426_v60, 2  ;;  %vm2428_vm9 = vcmp.eq.s32.totalorder %v2426_v60, 0 }
 0x26f   : > { %vm2431_vm10 = vcmp.eq.s32.totalorder %v2426_v60, 2  ;;  %v2642_v42 = vand.u32 2147483647, %v6197_v1  ;;  %v2492_v35 = vadd.s32 %v6146_v22, %v6154_v52  ;;  %v2594_v8 = vmul.u32 %v6194_v37, %v2578_v13 }
 0x270   : > { %vm3687_vm11 = vcmp.lt.s32.totalorder %v3686_v0, 0  ;;  %v2652_v23 = vadd.s32 1, %v3692_v56  ;;  %v2525_v4 = vsel %vm6228_vm7, 0, %v2523_v24  ;;  %vm2596_vm12 = vc.u32 %v6219_v54, %v6222_v53 }
 0x271   : > { %v4003_v58 = vpop.eup %4002  ;;  %v2507_v55 = vsel %vm3687_vm11, 0, %v3686_v0  ;;  %v2597_v3 = vadd.s32 1, %v6223_v48  ;;  %v2649_v37 = vand.u32 8388607, %v2642_v42  ;;  %v2748_v17 = vand.u32 2139095040, %v6244_v47 }
 0x272   : > { %v4005_v12 = vpop.eup %4004  ;;  %v2432_v38 = vxor.u32 2147483648, %v4003_v58  ;;  %v2508_v61 = vsub.s32 32, %v2507_v55  ;;  %v2509_v22 = vshll.u32 %v6204_v63, %v2507_v55  ;;  %v2512_v52 = vsub.s32 4294967266, %v2507_v55 }
 0x273   : > { %v2429_v11 = vxor.u32 2147483648, %v4005_v12  ;;  %v2598_v59 = vsel %vm2596_vm12, %v2597_v3, %v6223_v48  ;;  %vm2653_vm13 = vcmp.gt.s32.totalorder %v2652_v23, 0  ;;  %v6256_v27 = vand.u32 3, %v2525_v4 }
 0x274   : > { %v2433_v46 = vsel %vm2431_vm10, %v2432_v38, %v4005_v12  ;;  %v2510_v25 = vshrl.u32 %v2492_v35, %v2508_v61  ;;  %v2513_v45 = vadd.s32 127, %v2512_v52  ;;  %v2599_v6 = vadd.s32 %v2598_v59, %v2594_v8 }
 0x275   : > { %v2430_v20 = vsel %vm2428_vm9, %v4003_v58, %v2429_v11  ;;  %v2654_v50 = vsel %vm2653_vm13, %v2652_v23, 0  ;;  %v2650_v10 = vor.u32 8388608, %v2649_v37  ;;  %v2745_v60 = vand.u32 2147483647, %v6244_v47 }
 0x276   : > { %v2434_v7 = vsel %vm2427_vm8, %v2430_v20, %v2433_v46  ;;  %v2511_v63 = vor.u32 %v2510_v25, %v2509_v22  ;;  %v2514_v18 = vshll.u32 %v2513_v45, 23  ;;  %v2600_v2 = vadd.s32 536870912, %v2599_v6 }
 0x277   : > { %v2435_v36 = vsel %vm2425_vm6, nan, %v2434_v7  ;;  %v2656_v16 = vand.u32 31, %v2654_v50  ;;  %v6261_v15 = vshrl.u32 %v2654_v50, 5  ;;  %v2749_v19 = vshrl.u32 %v2748_v17, 23 }
 0x278   : > { %v2515_v29 = vor.u32 4788187, %v2514_v18  ;;  %v2518_v14 = vcvt.s32.f32 %v2511_v63  ;;  %v6258_v49 = vshrl.u32 %v2600_v2, 30  ;;  %3487 = vst [vmem:[%s4546_s17 + $0xa8] sm:$0xff] %v2435_v36  ;;  %v2595_v35 = vadd.s32 %v6222_v53, %v6219_v54 }
 0x279   : > { %v2657_v21 = vsub.s32 32, %v2656_v16  ;;  %v2659_v39 = vshll.u32 %v4147_v26, %v2656_v16  ;;  %v2662_v44 = vshll.u32 %v4148_v28, %v2656_v16  ;;  %v2665_v51 = vshll.u32 %v4149_v30, %v2656_v16 }
 0x27a   : > { %v2516_v33 = vand.u32 2147483647, %v2515_v29  ;;  %v2602_v62 = vshll.u32 %v6258_v49, 30  ;;  %v2668_v9 = vshll.u32 %v4150_v32, %v2656_v16  ;;  %v6277_v8 = vshll.u32 %v2650_v10, 8 }
 0x27b   : > { %v2660_v13 = vshrl.u32 %v4148_v28, %v2657_v21  ;;  %v2663_v5 = vshrl.u32 %v4149_v30, %v2657_v21  ;;  %v2666_v24 = vshrl.u32 %v4150_v32, %v2657_v21  ;;  %v2669_v56 = vshrl.u32 %v4151_v34, %v2657_v21 }
 0x27c   : > { %v2519_v48 = vmul.f32 %v2518_v14, %v2516_v33  ;;  %v6271_v0 = vsub.s32 %v2599_v6, %v2602_v62  ;;  %v3696_v23 = vadd.s32 4294967169, %v2749_v19  ;;  %v6281_v58 = vand.u32 8388607, %v2745_v60 }
 0x27d   : > { %v2658_v3 = vshrl.u32 %v4147_v26, %v2657_v21  ;;  %v2661_v12 = vor.u32 %v2660_v13, %v2659_v39  ;;  %v2664_v38 = vor.u32 %v2663_v5, %v2662_v44  ;;  %v2670_v61 = vor.u32 %v2669_v56, %v2668_v9 }
 0x27e   : > { %v2520_v55 = vxor.u32 2147483648, %v2519_v48  ;;  %v2605_v4 = vsub.s32 0, %v6271_v0  ;;  %v2671_v22 = vshll.u32 %v4151_v34, %v2656_v16  ;;  %v2672_v52 = vshrl.u32 %v4152_v41, %v2657_v21 }
 0x27f   : > { %v2667_v11 = vor.u32 %v2666_v24, %v2665_v51  ;;  %vm2674_vm14 = vcmp.lt.s32.totalorder %v6261_v15, 1  ;;  %vm2676_vm15 = vcmp.lt.s32.totalorder %v6261_v15, 3  ;;  %v2755_v46 = vadd.s32 1, %v3696_v23 }
 0x280   : > { %v2521_v54 = vsel %vm2438_vm5, %v2520_v55, %v2519_v48  ;;  %v3689_v53 = vmin.u32 %v2605_v4, %v6271_v0  ;;  %v2673_v37 = vor.u32 %v2672_v52, %v2671_v22  ;;  %vm2675_vm0 = vcmp.lt.s32.totalorder %v6261_v15, 2 }
 0x281   : > { %v2524_v59 = vsel %vm6228_vm7, %v6058_v31, %v2521_v54  ;;  %vm2677_vm1 = vcmp.lt.s32.totalorder %v6261_v15, 4  ;;  %v2682_v6 = vsel %vm2674_vm14, %v2661_v12, %v2664_v38  ;;  %v2678_v40 = vsel %vm2674_vm14, %v2658_v3, %v2661_v12 }
 0x282   : > { %4006 = vcosq.f32 %v2524_v59  ;;  %v2607_v25 = vclz %v3689_v53  ;;  %v2679_v45 = vsel %vm2677_vm1, %v2667_v11, 2102212464  ;;  %v2683_v20 = vsel %vm2677_vm1, %v2670_v61, 920167782 }
 0x283   : > { %4008 = vsinq.f32 %v2524_v59  ;;  %v2684_v17 = vsel %vm2676_vm15, %v2667_v11, %v2683_v20  ;;  %v2686_v7 = vsel %vm2674_vm14, %v2664_v38, %v2667_v11  ;;  %v2680_v63 = vsel %vm2676_vm15, %v2664_v38, %v2679_v45 }
 0x284   : > { %v3690_v50 = vadd.s32 4294967294, %v2607_v25  ;;  %v2685_v18 = vsel %vm2675_vm0, %v2682_v6, %v2684_v17  ;;  %v2687_v2 = vsel %vm2677_vm1, %v2673_v37, 1326507024  ;;  %vm2756_vm2 = vcmp.gt.s32.totalorder %v2755_v46, 0 }
 0x285   : > { %vm2530_vm3 = vcmp.lt.s32.totalorder %v6256_v27, 2  ;;  %v2688_v36 = vsel %vm2676_vm15, %v2670_v61, %v2687_v2  ;;  %v6313_v16 = vmul.u32.u64.low %v6277_v8, %v2685_v18  ;;  %v6314_v29 = vmul.u32.u64.high %v6277_v8, %v2685_v18, %v6313_v16 }
 0x286   : > { %vm3691_vm4 = vcmp.lt.s32.totalorder %v3690_v50, 0  ;;  %vm2528_vm5 = vweird.f32 %v6058_v31  ;;  %vm2531_vm6 = vcmp.eq.s32.totalorder %v6256_v27, 0  ;;  %v2689_v10 = vsel %vm2675_vm0, %v2686_v7, %v2688_v36 }
 0x287   : > { %v2610_v14 = vsel %vm3691_vm4, 0, %v3690_v50  ;;  %v2757_v21 = vsel %vm2756_vm2, %v2755_v46, 0  ;;  %v2681_v39 = vsel %vm2675_vm0, %v2678_v40, %v2680_v63  ;;  %vm2534_vm7 = vcmp.eq.s32.totalorder %v6256_v27, 2 }
 0x288   : > { %v2611_v19 = vsub.s32 32, %v2610_v14  ;;  %v2612_v33 = vshll.u32 %v6271_v0, %v2610_v14  ;;  %v2615_v62 = vsub.s32 4294967266, %v2610_v14  ;;  %v2759_v5 = vand.u32 31, %v2757_v21 }
 0x289   : > { %v6326_v44 = vmul.u32.u64.low %v6277_v8, %v2689_v10  ;;  %v6327_v13 = vmul.u32.u64.high %v6277_v8, %v2689_v10, %v6326_v44  ;;  %vm2541_vm8 = vcmp.lt.s32.totalorder %v6088_v43, 0  ;;  %v2700_v48 = vadd.s32 1, %v6314_v29 }
 0x28a   : > { %v2613_v51 = vshrl.u32 %v2595_v35, %v2611_v19  ;;  %v2616_v9 = vadd.s32 127, %v2615_v62  ;;  %v2753_v24 = vor.u32 8388608, %v6281_v58  ;;  %v2625_v0 = vsub.s32 4, %v6258_v49 }
 0x28b   : > { %v2697_v15 = vmul.u32 %v6277_v8, %v2681_v39  ;;  %v6334_v56 = vshrl.u32 %v2757_v21, 5  ;;  %v2760_v23 = vsub.s32 32, %v2759_v5  ;;  %vm6338_vm9 = vcmp.le.f32.partialorder %v2539_v57, 0.7853982 }
 0x28c   : > { %v4007_v55 = vpop.eup %4006  ;;  %v2614_v35 = vor.u32 %v2613_v51, %v2612_v33  ;;  %v2617_v3 = vshll.u32 %v2616_v9, 23  ;;  %v2762_v12 = vshll.u32 %v4147_v26, %v2759_v5  ;;  %v2765_v58 = vshll.u32 %v4148_v28, %v2759_v5 }
 0x28d   : > { %v4009_v38 = vpop.eup %4008  ;;  %v2535_v61 = vxor.u32 2147483648, %v4007_v55  ;;  %vm2699_vm10 = vc.u32 %v6327_v13, %v6313_v16  ;;  %v2768_v8 = vshll.u32 %v4149_v30, %v2759_v5  ;;  %v2771_v22 = vshll.u32 %v4150_v32, %v2759_v5 }
 0x28e   : > { %v2532_v52 = vxor.u32 2147483648, %v4009_v38  ;;  %v2618_v57 = vor.u32 4788187, %v2617_v3  ;;  %v2621_v54 = vcvt.s32.f32 %v2614_v35  ;;  %v2701_v53 = vsel %vm2699_vm10, %v2700_v48, %v6314_v29 }
 0x28f   : > { %v2536_v11 = vsel %vm2534_vm7, %v2535_v61, %v4009_v38  ;;  %v2702_v59 = vadd.s32 %v2701_v53, %v2697_v15  ;;  %v2763_v37 = vshrl.u32 %v4148_v28, %v2760_v23  ;;  %v2766_v46 = vshrl.u32 %v4149_v30, %v2760_v23 }
 0x290   : > { %v2533_v25 = vsel %vm2531_vm6, %v4007_v55, %v2532_v52  ;;  %v2619_v45 = vand.u32 2147483647, %v2618_v57  ;;  %v2769_v6 = vshrl.u32 %v4150_v32, %v2760_v23  ;;  %v2772_v20 = vshrl.u32 %v4151_v34, %v2760_v23 }
 0x291   : > { %v2537_v50 = vsel %vm2530_vm3, %v2533_v25, %v2536_v11  ;;  %v2703_v40 = vadd.s32 536870912, %v2702_v59  ;;  %v2764_v17 = vor.u32 %v2763_v37, %v2762_v12  ;;  %v2774_v7 = vshll.u32 %v4151_v34, %v2759_v5 }
 0x292   : > { %v2538_v63 = vsel %vm2528_vm5, nan, %v2537_v50  ;;  %v2622_v18 = vmul.f32 %v2621_v54, %v2619_v45  ;;  %v2767_v2 = vor.u32 %v2766_v46, %v2765_v58  ;;  %v2773_v36 = vor.u32 %v2772_v20, %v2771_v22 }
 0x293   : > { %v2626_v29 = vsel %vm2541_vm8, %v2625_v0, %v6258_v49  ;;  %v6365_v14 = vshrl.u32 %v2703_v40, 30  ;;  %v2775_v10 = vshrl.u32 %v4152_v41, %v2760_v23  ;;  %vm2777_vm11 = vcmp.lt.s32.totalorder %v6334_v56, 1  ;;  %3488 = vst [vmem:[%s4546_s17 + $0xb0] sm:$0xff] %v2538_v63 }
 0x294   : > { %v2623_v27 = vxor.u32 2147483648, %v2622_v18  ;;  %v2761_v21 = vshrl.u32 %v4147_v26, %v2760_v23  ;;  %v2770_v19 = vor.u32 %v2769_v6, %v2768_v8  ;;  %vm2780_vm12 = vcmp.lt.s32.totalorder %v6334_v56, 4  ;;  %v6395_v23 = vld [vmem:[%s4276_s30 + $0xd0] sm:$0xff] }
 0x295   : > { %v2705_v31 = vshll.u32 %v6365_v14, 30  ;;  %v2776_v33 = vor.u32 %v2775_v10, %v2774_v7  ;;  %vm2779_vm13 = vcmp.lt.s32.totalorder %v6334_v56, 3  ;;  %v2793_v49 = vshll.u32 %v2753_v24, 8 }
 0x296   : > { %v2624_v62 = vsel %vm2541_vm8, %v2623_v27, %v2622_v18  ;;  %vm2778_vm14 = vcmp.lt.s32.totalorder %v6334_v56, 2  ;;  %v2785_v39 = vsel %vm2777_vm11, %v2764_v17, %v2767_v2  ;;  %v2786_v44 = vsel %vm2780_vm12, %v2773_v36, 920167782 }
 0x297   : > { %v2627_v5 = vsel %vm6338_vm9, %v6088_v43, %v2624_v62  ;;  %v2628_v51 = vsel %vm6338_vm9, 0, %v2626_v29  ;;  %v2706_v9 = vsub.s32 %v2702_v59, %v2705_v31  ;;  %v2782_v48 = vsel %vm2780_vm12, %v2770_v19, 2102212464 }
 0x298   : > { %4010 = vcosq.f32 %v2627_v5  ;;  %v2781_v24 = vsel %vm2777_vm11, %v2761_v21, %v2764_v17  ;;  %v2787_v0 = vsel %vm2779_vm13, %v2770_v19, %v2786_v44  ;;  %v2790_v15 = vsel %vm2780_vm12, %v2776_v33, 1326507024  ;;  %v6430_v33 = vld [vmem:[%s4276_s30 + $0xd8] sm:$0xff] }
 0x299   : > { %4012 = vsinq.f32 %v2627_v5  ;;  %v2708_v55 = vsub.s32 0, %v2706_v9  ;;  %v2788_v4 = vsel %vm2778_vm14, %v2785_v39, %v2787_v0  ;;  %v2789_v35 = vsel %vm2777_vm11, %v2767_v2, %v2770_v19 }
 0x29a   : > { %v2783_v3 = vsel %vm2779_vm13, %v2767_v2, %v2782_v48  ;;  %v2791_v12 = vsel %vm2779_vm13, %v2773_v36, %v2790_v15  ;;  %v6405_v58 = vmul.u32.u64.low %v2793_v49, %v2788_v4  ;;  %v6406_v38 = vmul.u32.u64.high %v2793_v49, %v2788_v4, %v6405_v58 }
 0x29b   : > { %v3693_v61 = vmin.u32 %v2708_v55, %v2706_v9  ;;  %v2632_v8 = vand.u32 3, %v2628_v51  ;;  %v2792_v22 = vsel %vm2778_vm14, %v2789_v35, %v2791_v12  ;;  %v2851_v52 = vand.u32 2139095040, %v6395_v23 }
 0x29c   : > { %v2784_v54 = vsel %vm2778_vm14, %v2781_v24, %v2783_v3  ;;  %v6414_v53 = vmul.u32.u64.low %v2793_v49, %v2792_v22  ;;  %v6415_v11 = vmul.u32.u64.high %v2793_v49, %v2792_v22, %v6414_v53  ;;  %v2803_v59 = vadd.s32 1, %v6406_v38 }
 0x29d   : > { %v2710_v57 = vclz %v3693_v61  ;;  %v2852_v37 = vshrl.u32 %v2851_v52, 23  ;;  %vm2631_vm15 = vweird.f32 %v6088_v43  ;;  %v2848_v25 = vand.u32 2147483647, %v6395_v23 }
 0x29e   : > { %vm2633_vm0 = vcmp.lt.s32.totalorder %v2632_v8, 2  ;;  %vm2634_vm1 = vcmp.eq.s32.totalorder %v2632_v8, 0  ;;  %v2800_v45 = vmul.u32 %v2793_v49, %v2784_v54  ;;  %vm2637_vm2 = vcmp.eq.s32.totalorder %v2632_v8, 2 }
 0x29f   : > { %v3694_v46 = vadd.s32 4294967294, %v2710_v57  ;;  %v3700_v6 = vadd.s32 4294967169, %v2852_v37  ;;  %v2698_v56 = vadd.s32 %v6313_v16, %v6327_v13  ;;  %vm2802_vm4 = vc.u32 %v6415_v11, %v6405_v58 }
 0x2a0   : > { %v2728_v40 = vsub.s32 4, %v6365_v14  ;;  %v2804_v17 = vsel %vm2802_vm4, %v2803_v59, %v6406_v38  ;;  %v2855_v16 = vand.u32 8388607, %v2848_v25  ;;  %vm6435_vm6 = vcmp.le.f32.partialorder %v2642_v42, 0.7853982 }
 0x2a1   : > { %vm3695_vm3 = vcmp.lt.s32.totalorder %v3694_v46, 0  ;;  %v2858_v7 = vadd.s32 1, %v3700_v6  ;;  %v2805_v27 = vadd.s32 %v2804_v17, %v2800_v45  ;;  %vm2644_vm7 = vcmp.lt.s32.totalorder %v6197_v1, 0 }
 0x2a2   : > { %v4011_v20 = vpop.eup %4010  ;;  %v2713_v50 = vsel %vm3695_vm3, 0, %v3694_v46  ;;  %v2729_v24 = vsel %vm2644_vm7, %v2728_v40, %v6365_v14  ;;  %v2856_v4 = vor.u32 8388608, %v2855_v16  ;;  %v2954_v35 = vand.u32 2139095040, %v6430_v33 }
 0x2a3   : > { %v4013_v63 = vpop.eup %4012  ;;  %v2638_v18 = vxor.u32 2147483648, %v4011_v20  ;;  %v2714_v2 = vsub.s32 32, %v2713_v50  ;;  %v2715_v36 = vshll.u32 %v2706_v9, %v2713_v50  ;;  %v2718_v29 = vsub.s32 4294967266, %v2713_v50 }
 0x2a4   : > { %v2635_v10 = vxor.u32 2147483648, %v4013_v63  ;;  %vm2859_vm5 = vcmp.gt.s32.totalorder %v2858_v7, 0  ;;  %v2806_v39 = vadd.s32 536870912, %v2805_v27  ;;  %v2731_v37 = vsel %vm6435_vm6, 0, %v2729_v24 }
 0x2a5   : > { %v2639_v13 = vsel %vm2637_vm2, %v2638_v18, %v4013_v63  ;;  %v2716_v21 = vshrl.u32 %v2698_v56, %v2714_v2  ;;  %v2719_v19 = vadd.s32 127, %v2718_v29  ;;  %v2860_v31 = vsel %vm2859_vm5, %v2858_v7, 0 }
 0x2a6   : > { %v2636_v49 = vsel %vm2634_vm1, %v4011_v20, %v2635_v10  ;;  %v2862_v44 = vand.u32 31, %v2860_v31  ;;  %v6446_v0 = vshrl.u32 %v2806_v39, 30  ;;  %v2861_v12 = vshrl.u32 %v2860_v31, 5 }
 0x2a7   : > { %v2640_v5 = vsel %vm2633_vm0, %v2636_v49, %v2639_v13  ;;  %v2717_v51 = vor.u32 %v2716_v21, %v2715_v36  ;;  %v2720_v9 = vshll.u32 %v2719_v19, 23  ;;  %v2801_v46 = vadd.s32 %v6405_v58, %v6415_v11 }
 0x2a8   : > { %v2641_v48 = vsel %vm2631_vm15, nan, %v2640_v5  ;;  %v2863_v42 = vsub.s32 32, %v2862_v44  ;;  %v2808_v3 = vshll.u32 %v6446_v0, 30  ;;  %v2865_v38 = vshll.u32 %v4147_v26, %v2862_v44 }
 0x2a9   : > { %v2721_v15 = vor.u32 4788187, %v2720_v9  ;;  %v2724_v55 = vcvt.s32.f32 %v2717_v51  ;;  %3489 = vst [vmem:[%s4546_s17 + $0xb8] sm:$0xff] %v2641_v48  ;;  %v2868_v8 = vshll.u32 %v4148_v28, %v2862_v44  ;;  %v2874_v22 = vshll.u32 %v4150_v32, %v2862_v44 }
 0x2aa   : > { %v2866_v43 = vshrl.u32 %v4148_v28, %v2863_v42  ;;  %v2869_v14 = vshrl.u32 %v4149_v30, %v2863_v42  ;;  %v6456_v52 = vsub.s32 %v2805_v27, %v2808_v3  ;;  %v2871_v57 = vshll.u32 %v4149_v30, %v2862_v44 }
 0x2ab   : > { %v2722_v61 = vand.u32 2147483647, %v2721_v15  ;;  %v2872_v54 = vshrl.u32 %v4150_v32, %v2863_v42  ;;  %v2875_v53 = vshrl.u32 %v4151_v34, %v2863_v42  ;;  %v6465_v45 = vshll.u32 %v2856_v4, 8 }
 0x2ac   : > { %v2811_v6 = vsub.s32 0, %v6456_v52  ;;  %v2867_v56 = vor.u32 %v2866_v43, %v2865_v38  ;;  %v2877_v20 = vshll.u32 %v4151_v34, %v2862_v44  ;;  %v2955_v50 = vshrl.u32 %v2954_v35, 23 }
 0x2ad   : > { %v2725_v59 = vmul.f32 %v2724_v55, %v2722_v61  ;;  %v2870_v17 = vor.u32 %v2869_v14, %v2868_v8  ;;  %v2876_v7 = vor.u32 %v2875_v53, %v2874_v22  ;;  %v2878_v63 = vshrl.u32 %v4152_v41, %v2863_v42 }
 0x2ae   : > { %v3697_v18 = vmin.u32 %v2811_v6, %v6456_v52  ;;  %v2864_v2 = vshrl.u32 %v4147_v26, %v2863_v42  ;;  %v2873_v36 = vor.u32 %v2872_v54, %v2871_v57  ;;  %vm2880_vm8 = vcmp.lt.s32.totalorder %v2861_v12, 1 }
 0x2af   : > { %v2726_v40 = vxor.u32 2147483648, %v2725_v59  ;;  %v2879_v11 = vor.u32 %v2878_v63, %v2877_v20  ;;  %vm2882_vm9 = vcmp.lt.s32.totalorder %v2861_v12, 3  ;;  %vm2883_vm10 = vcmp.lt.s32.totalorder %v2861_v12, 4 }
 0x2b0   : > { %v2813_v10 = vclz %v3697_v18  ;;  %vm2881_vm11 = vcmp.lt.s32.totalorder %v2861_v12, 2  ;;  %v2885_v27 = vsel %vm2883_vm10, %v2873_v36, 2102212464  ;;  %v2888_v16 = vsel %vm2880_vm8, %v2867_v56, %v2870_v17 }
 0x2b1   : > { %v2727_v58 = vsel %vm2644_vm7, %v2726_v40, %v2725_v59  ;;  %v2889_v13 = vsel %vm2883_vm10, %v2876_v7, 920167782  ;;  %v3704_v21 = vadd.s32 4294967169, %v2955_v50  ;;  %v2884_v31 = vsel %vm2880_vm8, %v2864_v2, %v2867_v56 }
 0x2b2   : > { %v2730_v29 = vsel %vm6435_vm6, %v6197_v1, %v2727_v58  ;;  %v3698_v19 = vadd.s32 4294967294, %v2813_v10  ;;  %v2890_v49 = vsel %vm2882_vm9, %v2873_v36, %v2889_v13  ;;  %v2886_v39 = vsel %vm2882_vm9, %v2870_v17, %v2885_v27 }
 0x2b3   : > { %4014 = vcosq.f32 %v2730_v29  ;;  %v2891_v62 = vsel %vm2881_vm11, %v2888_v16, %v2890_v49  ;;  %v2892_v44 = vsel %vm2880_vm8, %v2870_v17, %v2873_v36  ;;  %v2893_v5 = vsel %vm2883_vm10, %v2879_v11, 1326507024 }
 0x2b4   : > { %4016 = vsinq.f32 %v2730_v29  ;;  %vm3699_vm12 = vcmp.lt.s32.totalorder %v3698_v19, 0  ;;  %v2894_v51 = vsel %vm2882_vm9, %v2876_v7, %v2893_v5  ;;  %v2735_v24 = vand.u32 3, %v2731_v37 }
 0x2b5   : > { %v6488_v9 = vmul.u32.u64.low %v6465_v45, %v2891_v62  ;;  %v6489_v48 = vmul.u32.u64.high %v6465_v45, %v2891_v62, %v6488_v9  ;;  %v2816_v42 = vsel %vm3699_vm12, 0, %v3698_v19  ;;  %v2895_v15 = vsel %vm2881_vm11, %v2892_v44, %v2894_v51 }
 0x2b6   : > { %v2961_v55 = vadd.s32 1, %v3704_v21  ;;  %v2817_v4 = vsub.s32 32, %v2816_v42  ;;  %v2818_v35 = vshll.u32 %v6456_v52, %v2816_v42  ;;  %v2821_v3 = vsub.s32 4294967266, %v2816_v42  ;;  %v6536_v42 = vld [vmem:[%s4276_s30 + $0xe0] sm:$0xff] }
 0x2b7   : > { %v2887_v38 = vsel %vm2881_vm11, %v2884_v31, %v2886_v39  ;;  %v6496_v43 = vmul.u32.u64.low %v6465_v45, %v2895_v15  ;;  %v6497_v61 = vmul.u32.u64.high %v6465_v45, %v2895_v15, %v6496_v43  ;;  %v2951_v8 = vand.u32 2147483647, %v6430_v33 }
 0x2b8   : > { %vm2962_vm13 = vcmp.gt.s32.totalorder %v2961_v55, 0  ;;  %v2819_v14 = vshrl.u32 %v2801_v46, %v2817_v4  ;;  %v2822_v22 = vadd.s32 127, %v2821_v3  ;;  %v2906_v57 = vadd.s32 1, %v6489_v48 }
 0x2b9   : > { %v2963_v54 = vsel %vm2962_vm13, %v2961_v55, 0  ;;  %vm2734_vm14 = vweird.f32 %v6197_v1  ;;  %vm2747_vm15 = vcmp.lt.s32.totalorder %v6244_v47, 0  ;;  %v2903_v52 = vmul.u32 %v6465_v45, %v2887_v38 }
 0x2ba   : > { %v2965_v12 = vand.u32 31, %v2963_v54  ;;  %vm2736_vm0 = vcmp.lt.s32.totalorder %v2735_v24, 2  ;;  %vm2737_vm1 = vcmp.eq.s32.totalorder %v2735_v24, 0  ;;  %vm6506_vm2 = vcmp.le.f32.partialorder %v2745_v60, 0.7853982 }
 0x2bb   : > { %v2820_v59 = vor.u32 %v2819_v14, %v2818_v35  ;;  %v2823_v37 = vshll.u32 %v2822_v22, 23  ;;  %vm2740_vm3 = vcmp.eq.s32.totalorder %v2735_v24, 2  ;;  %vm2905_vm4 = vc.u32 %v6497_v61, %v6488_v9 }
 0x2bc   : > { %v2958_v6 = vand.u32 8388607, %v2951_v8  ;;  %v2966_v45 = vsub.s32 32, %v2965_v12  ;;  %v2907_v60 = vsel %vm2905_vm4, %v2906_v57, %v6489_v48  ;;  %v2831_v7 = vsub.s32 4, %v6446_v0 }
 0x2bd   : > { %v4015_v46 = vpop.eup %4014  ;;  %v2824_v50 = vor.u32 4788187, %v2823_v37  ;;  %v2827_v40 = vcvt.s32.f32 %v2820_v59  ;;  %v2908_v63 = vadd.s32 %v2907_v60, %v2903_v52  ;;  %v6516_v18 = vshrl.u32 %v2963_v54, 5 }
 0x2be   : > { %v4017_v56 = vpop.eup %4016  ;;  %v2741_v20 = vxor.u32 2147483648, %v4015_v46  ;;  %v2968_v58 = vshll.u32 %v4147_v26, %v2965_v12  ;;  %v2969_v11 = vshrl.u32 %v4148_v28, %v2966_v45  ;;  %v2971_v27 = vshll.u32 %v4148_v28, %v2965_v12 }
 0x2bf   : > { %v2738_v17 = vxor.u32 2147483648, %v4017_v56  ;;  %v2825_v36 = vand.u32 2147483647, %v2824_v50  ;;  %v2909_v10 = vadd.s32 536870912, %v2908_v63  ;;  %v2972_v16 = vshrl.u32 %v4149_v30, %v2966_v45 }
 0x2c0   : > { %v2742_v2 = vsel %vm2740_vm3, %v2741_v20, %v4017_v56  ;;  %v2974_v19 = vshll.u32 %v4149_v30, %v2965_v12  ;;  %v2975_v31 = vshrl.u32 %v4150_v32, %v2966_v45  ;;  %v2977_v62 = vshll.u32 %v4150_v32, %v2965_v12 }
 0x2c1   : > { %v2739_v29 = vsel %vm2737_vm1, %v4015_v46, %v2738_v17  ;;  %v2828_v21 = vmul.f32 %v2827_v40, %v2825_v36  ;;  %v6528_v39 = vshrl.u32 %v2909_v10, 30  ;;  %v2978_v44 = vshrl.u32 %v4151_v34, %v2966_v45 }
 0x2c2   : > { %v2743_v13 = vsel %vm2736_vm0, %v2739_v29, %v2742_v2  ;;  %v2959_v51 = vor.u32 8388608, %v2958_v6  ;;  %v2980_v48 = vshll.u32 %v4151_v34, %v2965_v12  ;;  %v2981_v24 = vshrl.u32 %v4152_v41, %v2966_v45 }
 0x2c3   : > { %v2744_v49 = vsel %vm2734_vm14, nan, %v2743_v13  ;;  %v2829_v5 = vxor.u32 2147483648, %v2828_v21  ;;  %v2832_v1 = vsel %vm2747_vm15, %v2831_v7, %v6446_v0  ;;  %v2911_v15 = vshll.u32 %v6528_v39, 30 }
 0x2c4   : > { %3490 = vst [vmem:[%s4546_s17 + $0xc0] sm:$0xff] %v2744_v49  ;;  %v2967_v55 = vshrl.u32 %v4147_v26, %v2966_v45  ;;  %v2970_v4 = vor.u32 %v2969_v11, %v2968_v58  ;;  %v2973_v3 = vor.u32 %v2972_v16, %v2971_v27  ;;  %v2976_v38 = vor.u32 %v2975_v31, %v2974_v19 }
 0x2c5   : > { %v2830_v35 = vsel %vm2747_vm15, %v2829_v5, %v2828_v21  ;;  %v2979_v43 = vor.u32 %v2978_v44, %v2977_v62  ;;  %v6548_v22 = vsub.s32 %v2908_v63, %v2911_v15  ;;  %vm2983_vm5 = vcmp.lt.s32.totalorder %v6516_v18, 1 }
 0x2c6   : > { %v2833_v14 = vsel %vm6506_vm2, %v6244_v47, %v2830_v35  ;;  %vm2986_vm6 = vcmp.lt.s32.totalorder %v6516_v18, 4  ;;  %v2834_v0 = vsel %vm6506_vm2, 0, %v2832_v1  ;;  %v2982_v57 = vor.u32 %v2981_v24, %v2980_v48 }
 0x2c7   : > { %4018 = vcosq.f32 %v2833_v14  ;;  %v3057_v54 = vand.u32 2139095040, %v6536_v42  ;;  %v2914_v52 = vsub.s32 0, %v6548_v22  ;;  %vm2985_vm7 = vcmp.lt.s32.totalorder %v6516_v18, 3 }
 0x2c8   : > { %4020 = vsinq.f32 %v2833_v14  ;;  %v2988_v12 = vsel %vm2986_vm6, %v2976_v38, 2102212464  ;;  %vm2984_vm8 = vcmp.lt.s32.totalorder %v6516_v18, 2  ;;  %v2991_v59 = vsel %vm2983_vm5, %v2970_v4, %v2973_v3 }
 0x2c9   : > { %v2992_v53 = vsel %vm2986_vm6, %v2979_v43, 920167782  ;;  %v2999_v37 = vshll.u32 %v2959_v51, 8  ;;  %v2838_v46 = vand.u32 3, %v2834_v0  ;;  %v3701_v6 = vmin.u32 %v2914_v52, %v6548_v22 }
 0x2ca   : > { %v2987_v45 = vsel %vm2983_vm5, %v2967_v55, %v2970_v4  ;;  %v2995_v56 = vsel %vm2983_vm5, %v2973_v3, %v2976_v38  ;;  %v2989_v20 = vsel %vm2985_vm7, %v2973_v3, %v2988_v12  ;;  %v2993_v50 = vsel %vm2985_vm7, %v2976_v38, %v2992_v53 }
 0x2cb   : > { %v2996_v40 = vsel %vm2986_vm6, %v2982_v57, 1326507024  ;;  %v3058_v60 = vshrl.u32 %v3057_v54, 23  ;;  %vm2837_vm9 = vweird.f32 %v6244_v47  ;;  %v2916_v17 = vclz %v3701_v6 }
 0x2cc   : > { %v2994_v7 = vsel %vm2984_vm8, %v2991_v59, %v2993_v50  ;;  %v2997_v63 = vsel %vm2985_vm7, %v2979_v43, %v2996_v40  ;;  %v2990_v10 = vsel %vm2984_vm8, %v2987_v45, %v2989_v20  ;;  %vm2840_vm10 = vcmp.eq.s32.totalorder %v2838_v46, 0 }
 0x2cd   : > { %v2998_v2 = vsel %vm2984_vm8, %v2995_v56, %v2997_v63  ;;  %v6582_v36 = vmul.u32.u64.low %v2999_v37, %v2994_v7  ;;  %v6583_v58 = vmul.u32.u64.high %v2999_v37, %v2994_v7, %v6582_v36  ;;  %v3708_v11 = vadd.s32 4294967169, %v3058_v60  ;;  %v6620_v56 = vld [vmem:[%s4276_s30 + $0xe8] sm:$0xff] }
 0x2ce   : > { %v3702_v29 = vadd.s32 4294967294, %v2916_v17  ;;  %v6588_v27 = vmul.u32.u64.low %v2999_v37, %v2998_v2  ;;  %v6589_v16 = vmul.u32.u64.high %v2999_v37, %v2998_v2, %v6588_v27  ;;  %vm2843_vm11 = vcmp.eq.s32.totalorder %v2838_v46, 2 }
 0x2cf   : > { %vm2850_vm12 = vcmp.lt.s32.totalorder %v6395_v23, 0  ;;  %v3064_v13 = vadd.s32 1, %v3708_v11  ;;  %v2904_v21 = vadd.s32 %v6488_v9, %v6497_v61  ;;  %v2934_v19 = vsub.s32 4, %v6528_v39 }
 0x2d0   : > { %vm3703_vm13 = vcmp.lt.s32.totalorder %v3702_v29, 0  ;;  %v3054_v31 = vand.u32 2147483647, %v6536_v42  ;;  %v3006_v18 = vmul.u32 %v2999_v37, %v2990_v10  ;;  %v3009_v44 = vadd.s32 1, %v6583_v58 }
 0x2d1   : > { %v4019_v49 = vpop.eup %4018  ;;  %v2919_v62 = vsel %vm3703_vm13, 0, %v3702_v29  ;;  %vm3065_vm14 = vcmp.gt.s32.totalorder %v3064_v13, 0  ;;  %vm6599_vm15 = vcmp.le.f32.partialorder %v2848_v25, 0.7853982  ;;  %vm2839_vm0 = vcmp.lt.s32.totalorder %v2838_v46, 2 }
 0x2d2   : > { %v4021_v5 = vpop.eup %4020  ;;  %v2844_v51 = vxor.u32 2147483648, %v4019_v49  ;;  %v2920_v9 = vsub.s32 32, %v2919_v62  ;;  %v2921_v61 = vshll.u32 %v6548_v22, %v2919_v62  ;;  %v2924_v24 = vsub.s32 4294967266, %v2919_v62 }
 0x2d3   : > { %v2841_v1 = vxor.u32 2147483648, %v4021_v5  ;;  %vm3008_vm1 = vc.u32 %v6589_v16, %v6582_v36  ;;  %v3066_v15 = vsel %vm3065_vm14, %v3064_v13, 0  ;;  %v3061_v43 = vand.u32 8388607, %v3054_v31 }
 0x2d4   : > { %v2845_v55 = vsel %vm2843_vm11, %v2844_v51, %v4021_v5  ;;  %v2922_v4 = vshrl.u32 %v2904_v21, %v2920_v9  ;;  %v2925_v35 = vadd.s32 127, %v2924_v24  ;;  %v3010_v3 = vsel %vm3008_vm1, %v3009_v44, %v6583_v58 }
 0x2d5   : > { %v2842_v25 = vsel %vm2840_vm10, %v4019_v49, %v2841_v1  ;;  %v3011_v38 = vadd.s32 %v3010_v3, %v3006_v18  ;;  %v3068_v14 = vand.u32 31, %v3066_v15  ;;  %v2935_v54 = vsel %vm2850_vm12, %v2934_v19, %v6528_v39 }
 0x2d6   : > { %v2846_v22 = vsel %vm2839_vm0, %v2842_v25, %v2845_v55  ;;  %v2923_v0 = vor.u32 %v2922_v4, %v2921_v61  ;;  %v2926_v57 = vshll.u32 %v2925_v35, 23  ;;  %v3067_v59 = vshrl.u32 %v3066_v15, 5 }
 0x2d7   : > { %v2847_v52 = vsel %vm2837_vm9, nan, %v2846_v22  ;;  %v3012_v12 = vadd.s32 536870912, %v3011_v38  ;;  %v3069_v53 = vsub.s32 32, %v3068_v14  ;;  %v3071_v6 = vshll.u32 %v4147_v26, %v3068_v14 }
 0x2d8   : > { %v2927_v37 = vor.u32 4788187, %v2926_v57  ;;  %v2930_v46 = vcvt.s32.f32 %v2923_v0  ;;  %v3074_v45 = vshll.u32 %v4148_v28, %v3068_v14  ;;  %3491 = vst [vmem:[%s4546_s17 + $0xc8] sm:$0xff] %v2847_v52  ;;  %v3077_v47 = vshll.u32 %v4149_v30, %v3068_v14 }
 0x2d9   : > { %v3013_v20 = vshrl.u32 %v3012_v12, 30  ;;  %v3072_v50 = vshrl.u32 %v4148_v28, %v3069_v53  ;;  %v3075_v39 = vshrl.u32 %v4149_v30, %v3069_v53  ;;  %v3078_v60 = vshrl.u32 %v4150_v32, %v3069_v53 }
 0x2da   : > { %v2928_v40 = vand.u32 2147483647, %v2927_v37  ;;  %v3080_v17 = vshll.u32 %v4150_v32, %v3068_v14  ;;  %v3081_v7 = vshrl.u32 %v4151_v34, %v3069_v53  ;;  %v2937_v63 = vsel %vm6599_vm15, 0, %v2935_v54 }
 0x2db   : > { %v3014_v2 = vshll.u32 %v3013_v20, 30  ;;  %v3062_v58 = vor.u32 8388608, %v3061_v43  ;;  %v3070_v29 = vshrl.u32 %v4147_v26, %v3069_v53  ;;  %v3083_v10 = vshll.u32 %v4151_v34, %v3068_v14 }
 0x2dc   : > { %v2931_v11 = vmul.f32 %v2930_v46, %v2928_v40  ;;  %v3160_v27 = vand.u32 2139095040, %v6620_v56  ;;  %v3073_v21 = vor.u32 %v3072_v50, %v3071_v6  ;;  %v3076_v19 = vor.u32 %v3075_v39, %v3074_v45 }
 0x2dd   : > { %v6633_v13 = vsub.s32 %v3011_v38, %v3014_v2  ;;  %v3084_v49 = vshrl.u32 %v4152_v41, %v3069_v53  ;;  %v3079_v18 = vor.u32 %v3078_v60, %v3077_v47  ;;  %v3082_v44 = vor.u32 %v3081_v7, %v3080_v17 }
 0x2de   : > { %v2932_v62 = vxor.u32 2147483648, %v2931_v11  ;;  %vm3086_vm2 = vcmp.lt.s32.totalorder %v3067_v59, 1  ;;  %vm2953_vm3 = vcmp.lt.s32.totalorder %v6430_v33, 0  ;;  %vm3087_vm4 = vcmp.lt.s32.totalorder %v3067_v59, 2 }
 0x2df   : > { %v3017_v5 = vsub.s32 0, %v6633_v13  ;;  %vm3089_vm5 = vcmp.lt.s32.totalorder %v3067_v59, 4  ;;  %v3102_v51 = vshll.u32 %v3062_v58, 8  ;;  %v3085_v61 = vor.u32 %v3084_v49, %v3083_v10 }
 0x2e0   : > { %v2933_v9 = vsel %vm2850_vm12, %v2932_v62, %v2931_v11  ;;  %vm3088_vm6 = vcmp.lt.s32.totalorder %v3067_v59, 3  ;;  %v3091_v24 = vsel %vm3089_vm5, %v3079_v18, 2102212464  ;;  %v3090_v55 = vsel %vm3086_vm2, %v3070_v29, %v3073_v21  ;;  %v6670_v59 = vld [vmem:[%s4276_s30 + $0xf0] sm:$0xff] }
 0x2e1   : > { %v2936_v1 = vsel %vm6599_vm15, %v6395_v23, %v2933_v9  ;;  %v3705_v15 = vmin.u32 %v3017_v5, %v6633_v13  ;;  %v3094_v4 = vsel %vm3086_vm2, %v3073_v21, %v3076_v19  ;;  %v3092_v35 = vsel %vm3088_vm6, %v3076_v19, %v3091_v24 }
 0x2e2   : > { %4022 = vcosq.f32 %v2936_v1  ;;  %v3095_v3 = vsel %vm3089_vm5, %v3082_v44, 920167782  ;;  %v3161_v25 = vshrl.u32 %v3160_v27, 23  ;;  %v3037_v43 = vsub.s32 4, %v3013_v20 }
 0x2e3   : > { %4024 = vsinq.f32 %v2936_v1  ;;  %v3019_v38 = vclz %v3705_v15  ;;  %v3096_v14 = vsel %vm3088_vm6, %v3079_v18, %v3095_v3  ;;  %v3093_v48 = vsel %vm3087_vm4, %v3090_v55, %v3092_v35 }
 0x2e4   : > { %v3097_v22 = vsel %vm3087_vm4, %v3094_v4, %v3096_v14  ;;  %v3098_v0 = vsel %vm3086_vm2, %v3076_v19, %v3079_v18  ;;  %v3099_v57 = vsel %vm3089_vm5, %v3085_v61, 1326507024  ;;  %v2941_v37 = vand.u32 3, %v2937_v63 }
 0x2e5   : > { %v3706_v54 = vadd.s32 4294967294, %v3019_v38  ;;  %v3100_v52 = vsel %vm3088_vm6, %v3082_v44, %v3099_v57  ;;  %v6655_v12 = vmul.u32.u64.low %v3102_v51, %v3097_v22  ;;  %v6656_v53 = vmul.u32.u64.high %v3102_v51, %v3097_v22, %v6655_v12 }
 0x2e6   : > { %v3101_v46 = vsel %vm3087_vm4, %v3098_v0, %v3100_v52  ;;  %v3157_v6 = vand.u32 2147483647, %v6620_v56  ;;  %v3712_v45 = vadd.s32 4294967169, %v3161_v25  ;;  %vm2940_vm7 = vweird.f32 %v6395_v23 }
 0x2e7   : > { %v3007_v50 = vadd.s32 %v6582_v36, %v6589_v16  ;;  %vm3707_vm8 = vcmp.lt.s32.totalorder %v3706_v54, 0  ;;  %v6664_v39 = vmul.u32.u64.low %v3102_v51, %v3101_v46  ;;  %v6665_v47 = vmul.u32.u64.high %v3102_v51, %v3101_v46, %v6664_v39 }
 0x2e8   : > { %v3022_v40 = vsel %vm3707_vm8, 0, %v3706_v54  ;;  %v3038_v60 = vsel %vm2953_vm3, %v3037_v43, %v3013_v20  ;;  %v3109_v17 = vmul.u32 %v3102_v51, %v3093_v48  ;;  %v3167_v7 = vadd.s32 1, %v3712_v45 }
 0x2e9   : > { %v3023_v63 = vsub.s32 32, %v3022_v40  ;;  %v3024_v2 = vshll.u32 %v6633_v13, %v3022_v40  ;;  %v3027_v58 = vsub.s32 4294967266, %v3022_v40  ;;  %v3112_v11 = vadd.s32 1, %v6656_v53 }
 0x2ea   : > { %vm2943_vm9 = vcmp.eq.s32.totalorder %v2941_v37, 0  ;;  %vm2946_vm10 = vcmp.eq.s32.totalorder %v2941_v37, 2  ;;  %vm6676_vm11 = vcmp.le.f32.partialorder %v2951_v8, 0.7853982  ;;  %vm3168_vm12 = vcmp.gt.s32.totalorder %v3167_v7, 0 }
 0x2eb   : > { %v3025_v16 = vshrl.u32 %v3007_v50, %v3023_v63  ;;  %v3028_v20 = vadd.s32 127, %v3027_v58  ;;  %v3040_v29 = vsel %vm6676_vm11, 0, %v3038_v60  ;;  %vm3111_vm13 = vc.u32 %v6665_v47, %v6655_v12 }
 0x2ec   : > { %v4023_v10 = vpop.eup %4022  ;;  %v3113_v27 = vsel %vm3111_vm13, %v3112_v11, %v6656_v53  ;;  %v3164_v13 = vand.u32 8388607, %v3157_v6  ;;  %v3169_v21 = vsel %vm3168_vm12, %v3167_v7, 0  ;;  %v3263_v8 = vand.u32 2139095040, %v6670_v59 }
 0x2ed   : > { %v4025_v19 = vpop.eup %4024  ;;  %v2947_v49 = vxor.u32 2147483648, %v4023_v10  ;;  %v3026_v62 = vor.u32 %v3025_v16, %v3024_v2  ;;  %v3029_v18 = vshll.u32 %v3028_v20, 23  ;;  %v3114_v44 = vadd.s32 %v3113_v27, %v3109_v17 }
 0x2ee   : > { %vm2942_vm14 = vcmp.lt.s32.totalorder %v2941_v37, 2  ;;  %v2944_v5 = vxor.u32 2147483648, %v4025_v19  ;;  %v3171_v51 = vand.u32 31, %v3169_v21  ;;  %v3260_v9 = vand.u32 2147483647, %v6670_v59 }
 0x2ef   : > { %v2948_v61 = vsel %vm2946_vm10, %v2947_v49, %v4025_v19  ;;  %v3030_v24 = vor.u32 4788187, %v3029_v18  ;;  %v3033_v1 = vcvt.s32.f32 %v3026_v62  ;;  %v3115_v15 = vadd.s32 536870912, %v3114_v44 }
 0x2f0   : > { %v2945_v55 = vsel %vm2943_vm9, %v4023_v10, %v2944_v5  ;;  %v6691_v4 = vand.u32 3, %v3040_v29  ;;  %v3165_v35 = vor.u32 8388608, %v3164_v13  ;;  %v3172_v3 = vsub.s32 32, %v3171_v51 }
 0x2f1   : > { %v2949_v25 = vsel %vm2942_vm14, %v2945_v55, %v2948_v61  ;;  %v3031_v38 = vand.u32 2147483647, %v3030_v24  ;;  %v6693_v43 = vshrl.u32 %v3115_v15, 30  ;;  %v3264_v14 = vshrl.u32 %v3263_v8, 23 }
 0x2f2   : > { %v2950_v48 = vsel %vm2940_vm7, nan, %v2949_v25  ;;  %v3170_v22 = vshrl.u32 %v3169_v21, 5  ;;  %v3174_v0 = vshll.u32 %v4147_v26, %v3171_v51  ;;  %v3175_v57 = vshrl.u32 %v4148_v28, %v3172_v3 }
 0x2f3   : > { %v3034_v54 = vmul.f32 %v3033_v1, %v3031_v38  ;;  %v3117_v52 = vshll.u32 %v6693_v43, 30  ;;  %v3177_v53 = vshll.u32 %v4148_v28, %v3171_v51  ;;  %v3178_v37 = vshrl.u32 %v4149_v30, %v3172_v3  ;;  %3492 = vst [vmem:[%s4546_s17 + $0xd0] sm:$0xff] %v2950_v48 }
 0x2f4   : > { %v3180_v46 = vshll.u32 %v4149_v30, %v3171_v51  ;;  %v3181_v45 = vshrl.u32 %v4150_v32, %v3172_v3  ;;  %v3183_v23 = vshll.u32 %v4150_v32, %v3171_v51  ;;  %v3184_v50 = vshrl.u32 %v4151_v34, %v3172_v3 }
 0x2f5   : > { %v3035_v39 = vxor.u32 2147483648, %v3034_v54  ;;  %v6707_v40 = vsub.s32 %v3114_v44, %v3117_v52  ;;  %v6709_v60 = vshll.u32 %v3165_v35, 8  ;;  %v3716_v17 = vadd.s32 4294967169, %v3264_v14 }
 0x2f6   : > { %v3173_v7 = vshrl.u32 %v4147_v26, %v3172_v3  ;;  %v3176_v63 = vor.u32 %v3175_v57, %v3174_v0  ;;  %v3186_v2 = vshll.u32 %v4151_v34, %v3171_v51  ;;  %v3187_v58 = vshrl.u32 %v4152_v41, %v3172_v3 }
 0x2f7   : > { %v3036_v11 = vsel %vm2953_vm3, %v3035_v39, %v3034_v54  ;;  %v3120_v16 = vsub.s32 0, %v6707_v40  ;;  %v3179_v20 = vor.u32 %v3178_v37, %v3177_v53  ;;  %v3185_v29 = vor.u32 %v3184_v50, %v3183_v23 }
 0x2f8   : > { %v3039_v10 = vsel %vm6676_vm11, %v6430_v33, %v3036_v11  ;;  %v3182_v27 = vor.u32 %v3181_v45, %v3180_v46  ;;  %v3188_v13 = vor.u32 %v3187_v58, %v3186_v2  ;;  %vm3189_vm15 = vcmp.lt.s32.totalorder %v3170_v22, 1 }
 0x2f9   : > { %4026 = vcosq.f32 %v3039_v10  ;;  %v3709_v21 = vmin.u32 %v3120_v16, %v6707_v40  ;;  %vm3191_vm0 = vcmp.lt.s32.totalorder %v3170_v22, 3  ;;  %v3270_v8 = vadd.s32 1, %v3716_v17 }
 0x2fa   : > { %4028 = vsinq.f32 %v3039_v10  ;;  %vm3190_vm1 = vcmp.lt.s32.totalorder %v3170_v22, 2  ;;  %vm3192_vm2 = vcmp.lt.s32.totalorder %v3170_v22, 4  ;;  %v3193_v19 = vsel %vm3189_vm15, %v3173_v7, %v3176_v63 }
 0x2fb   : > { %v3122_v49 = vclz %v3709_v21  ;;  %v3194_v62 = vsel %vm3192_vm2, %v3182_v27, 2102212464  ;;  %v3197_v18 = vsel %vm3189_vm15, %v3176_v63, %v3179_v20  ;;  %v3198_v44 = vsel %vm3192_vm2, %v3185_v29, 920167782 }
 0x2fc   : > { %v3195_v5 = vsel %vm3191_vm0, %v3179_v20, %v3194_v62  ;;  %v3199_v36 = vsel %vm3191_vm0, %v3182_v27, %v3198_v44  ;;  %v3201_v51 = vsel %vm3189_vm15, %v3179_v20, %v3182_v27  ;;  %v3202_v61 = vsel %vm3192_vm2, %v3188_v13, 1326507024 }
 0x2fd   : > { %v3110_v24 = vadd.s32 %v6655_v12, %v6665_v47  ;;  %v3710_v1 = vadd.s32 4294967294, %v3122_v49  ;;  %v3200_v15 = vsel %vm3190_vm1, %v3197_v18, %v3199_v36  ;;  %v3203_v55 = vsel %vm3191_vm0, %v3185_v29, %v3202_v61 }
 0x2fe   : > { %v3196_v35 = vsel %vm3190_vm1, %v3193_v19, %v3195_v5  ;;  %v3204_v3 = vsel %vm3190_vm1, %v3201_v51, %v3203_v55  ;;  %v6730_v25 = vmul.u32.u64.low %v6709_v60, %v3200_v15  ;;  %v6731_v38 = vmul.u32.u64.high %v6709_v60, %v3200_v15, %v6730_v25 }
 0x2ff   : > { %vm3711_vm3 = vcmp.lt.s32.totalorder %v3710_v1, 0  ;;  %v6735_v14 = vmul.u32.u64.low %v6709_v60, %v3204_v3  ;;  %v6736_v48 = vmul.u32.u64.high %v6709_v60, %v3204_v3, %v6735_v14  ;;  %vm3271_vm4 = vcmp.gt.s32.totalorder %v3270_v8, 0 }
 0x300   : > { %vm3043_vm5 = vweird.f32 %v6430_v33  ;;  %v3125_v12 = vsel %vm3711_vm3, 0, %v3710_v1  ;;  %v3267_v47 = vand.u32 8388607, %v3260_v9  ;;  %v3272_v0 = vsel %vm3271_vm4, %v3270_v8, 0 }
 0x301   : > { %v3126_v22 = vsub.s32 32, %v3125_v12  ;;  %v3127_v57 = vshll.u32 %v6707_v40, %v3125_v12  ;;  %v3130_v54 = vsub.s32 4294967266, %v3125_v12  ;;  %v3212_v52 = vmul.u32 %v6709_v60, %v3196_v35 }
 0x302   : > { %vm3045_vm6 = vcmp.lt.s32.totalorder %v6691_v4, 2  ;;  %vm3046_vm7 = vcmp.eq.s32.totalorder %v6691_v4, 0  ;;  %v3215_v53 = vadd.s32 1, %v6731_v38  ;;  %v3274_v37 = vand.u32 31, %v3272_v0 }
 0x303   : > { %v4027_v46 = vpop.eup %4026  ;;  %vm3049_vm8 = vcmp.eq.s32.totalorder %v6691_v4, 2  ;;  %v3128_v45 = vshrl.u32 %v3110_v24, %v3126_v22  ;;  %v3131_v23 = vadd.s32 127, %v3130_v54  ;;  %vm3214_vm9 = vc.u32 %v6736_v48, %v6730_v25 }
 0x304   : > { %v4029_v50 = vpop.eup %4028  ;;  %v3050_v39 = vxor.u32 2147483648, %v4027_v46  ;;  %vm3056_vm10 = vcmp.lt.s32.totalorder %v6536_v42, 0  ;;  %v3216_v40 = vsel %vm3214_vm9, %v3215_v53, %v6731_v38  ;;  %v3268_v60 = vor.u32 8388608, %v3267_v47 }
 0x305   : > { %v3275_v17 = vsub.s32 32, %v3274_v37  ;;  %v3047_v7 = vxor.u32 2147483648, %v4029_v50  ;;  %v3129_v63 = vor.u32 %v3128_v45, %v3127_v57  ;;  %v3132_v2 = vshll.u32 %v3131_v23, 23 }
 0x306   : > { %v3217_v58 = vadd.s32 %v3216_v40, %v3212_v52  ;;  %v3051_v11 = vsel %vm3049_vm8, %v3050_v39, %v4029_v50  ;;  %v3273_v16 = vshrl.u32 %v3272_v0, 5  ;;  %v3277_v20 = vshll.u32 %v4147_v26, %v3274_v37  ;;  %v6799_v50 = vld [vmem:[%s4276_s30 + $0xf8] sm:$0xff] }
 0x307   : > { %v3278_v29 = vshrl.u32 %v4148_v28, %v3275_v17  ;;  %v3048_v10 = vsel %vm3046_vm7, %v4027_v46, %v3047_v7  ;;  %v3133_v27 = vor.u32 4788187, %v3132_v2  ;;  %v3136_v13 = vcvt.s32.f32 %v3129_v63 }
 0x308   : > { %v3218_v21 = vadd.s32 536870912, %v3217_v58  ;;  %v3052_v8 = vsel %vm3045_vm6, %v3048_v10, %v3051_v11  ;;  %v3280_v19 = vshll.u32 %v4148_v28, %v3274_v37  ;;  %v3281_v49 = vshrl.u32 %v4149_v30, %v3275_v17 }
 0x309   : > { %v3283_v62 = vshll.u32 %v4149_v30, %v3274_v37  ;;  %v3053_v18 = vsel %vm3043_vm5, nan, %v3052_v8  ;;  %v3134_v44 = vand.u32 2147483647, %v3133_v27  ;;  %v3284_v36 = vshrl.u32 %v4150_v32, %v3275_v17 }
 0x30a   : > { %v6762_v5 = vshrl.u32 %v3218_v21, 30  ;;  %vm6767_vm11 = vcmp.le.f32.partialorder %v3054_v31, 0.7853982  ;;  %v3140_v4 = vsub.s32 4, %v6693_v43  ;;  %v3286_v61 = vshll.u32 %v4150_v32, %v3274_v37  ;;  %3493 = vst [vmem:[%s4546_s17 + $0xd8] sm:$0xff] %v3053_v18 }
 0x30b   : > { %v3287_v24 = vshrl.u32 %v4151_v34, %v3275_v17  ;;  %v3137_v33 = vmul.f32 %v3136_v13, %v3134_v44  ;;  %v3289_v15 = vshll.u32 %v4151_v34, %v3274_v37  ;;  %v6777_v55 = vshll.u32 %v3268_v60, 8 }
 0x30c   : > { %v3220_v1 = vshll.u32 %v6762_v5, 30  ;;  %v3279_v35 = vor.u32 %v3278_v29, %v3277_v20  ;;  %v3282_v3 = vor.u32 %v3281_v49, %v3280_v19  ;;  %v3290_v38 = vshrl.u32 %v4152_v41, %v3275_v17 }
 0x30d   : > { %v3288_v31 = vor.u32 %v3287_v24, %v3286_v61  ;;  %v3138_v14 = vxor.u32 2147483648, %v3137_v33  ;;  %v3285_v47 = vor.u32 %v3284_v36, %v3283_v62  ;;  %vm3292_vm12 = vcmp.lt.s32.totalorder %v3273_v16, 1 }
 0x30e   : > { %v6780_v12 = vsub.s32 %v3217_v58, %v3220_v1  ;;  %v3141_v0 = vsel %vm3056_vm10, %v3140_v4, %v6693_v43  ;;  %v3276_v22 = vshrl.u32 %v4147_v26, %v3275_v17  ;;  %vm3294_vm13 = vcmp.lt.s32.totalorder %v3273_v16, 3 }
 0x30f   : > { %vm3295_vm14 = vcmp.lt.s32.totalorder %v3273_v16, 4  ;;  %v3139_v57 = vsel %vm3056_vm10, %v3138_v14, %v3137_v33  ;;  %v3291_v52 = vor.u32 %v3290_v38, %v3289_v15  ;;  %vm3293_vm15 = vcmp.lt.s32.totalorder %v3273_v16, 2 }
 0x310   : > { %v3223_v54 = vsub.s32 0, %v6780_v12  ;;  %v3297_v53 = vsel %vm3295_vm14, %v3285_v47, 2102212464  ;;  %v3142_v37 = vsel %vm6767_vm11, %v6536_v42, %v3139_v57  ;;  %v3300_v46 = vsel %vm3292_vm12, %v3279_v35, %v3282_v3 }
 0x311   : > { %v3301_v43 = vsel %vm3295_vm14, %v3288_v31, 920167782  ;;  %v3143_v45 = vsel %vm6767_vm11, 0, %v3141_v0  ;;  %4030 = vcosq.f32 %v3142_v37  ;;  %v3296_v39 = vsel %vm3292_vm12, %v3276_v22, %v3279_v35 }
 0x312   : > { %v3713_v23 = vmin.u32 %v3223_v54, %v6780_v12  ;;  %4032 = vsinq.f32 %v3142_v37  ;;  %v3298_v40 = vsel %vm3294_vm13, %v3282_v3, %v3297_v53  ;;  %v3302_v60 = vsel %vm3294_vm13, %v3285_v47, %v3301_v43 }
 0x313   : > { %v3303_v7 = vsel %vm3293_vm15, %v3300_v46, %v3302_v60  ;;  %v3304_v63 = vsel %vm3292_vm12, %v3282_v3, %v3285_v47  ;;  %v3305_v2 = vsel %vm3295_vm14, %v3291_v52, 1326507024  ;;  %v3299_v10 = vsel %vm3293_vm15, %v3296_v39, %v3298_v40 }
 0x314   : > { %v3225_v17 = vclz %v3713_v23  ;;  %v3306_v58 = vsel %vm3294_vm13, %v3288_v31, %v3305_v2  ;;  %v6809_v11 = vmul.u32.u64.low %v6777_v55, %v3303_v7  ;;  %v6810_v20 = vmul.u32.u64.high %v6777_v55, %v3303_v7, %v6809_v11 }
 0x315   : > { %v3307_v27 = vsel %vm3293_vm15, %v3304_v63, %v3306_v58  ;;  %v3366_v13 = vand.u32 2139095040, %v6799_v50  ;;  %v3147_v21 = vand.u32 3, %v3143_v45  ;;  %v3213_v49 = vadd.s32 %v6730_v25, %v6736_v48 }
 0x316   : > { %v3714_v29 = vadd.s32 4294967294, %v3225_v17  ;;  %v6817_v8 = vmul.u32.u64.low %v6777_v55, %v3307_v27  ;;  %v6818_v19 = vmul.u32.u64.high %v6777_v55, %v3307_v27, %v6817_v8  ;;  %v3315_v44 = vmul.u32 %v6777_v55, %v3299_v10 }
 0x317   : > { %v3367_v62 = vshrl.u32 %v3366_v13, 23  ;;  %v3318_v36 = vadd.s32 1, %v6810_v20  ;;  %vm3146_vm1 = vweird.f32 %v6536_v42  ;;  %vm3152_vm2 = vcmp.eq.s32.totalorder %v3147_v21, 2 }
 0x318   : > { %vm3715_vm0 = vcmp.lt.s32.totalorder %v3714_v29, 0  ;;  %vm3317_vm3 = vc.u32 %v6818_v19, %v6809_v11  ;;  %v3363_v25 = vand.u32 2147483647, %v6799_v50  ;;  %vm3148_vm4 = vcmp.lt.s32.totalorder %v3147_v21, 2 }
 0x319   : > { %v3228_v18 = vsel %vm3715_vm0, 0, %v3714_v29  ;;  %v3720_v61 = vadd.s32 4294967169, %v3367_v62  ;;  %v3319_v1 = vsel %vm3317_vm3, %v3318_v36, %v6810_v20  ;;  %vm3149_vm5 = vcmp.eq.s32.totalorder %v3147_v21, 0 }
 0x31a   : > { %v3229_v51 = vsub.s32 32, %v3228_v18  ;;  %v3230_v16 = vshll.u32 %v6780_v12, %v3228_v18  ;;  %v3233_v4 = vsub.s32 4294967266, %v3228_v18  ;;  %v3320_v3 = vadd.s32 %v3319_v1, %v3315_v44 }
 0x31b   : > { %v4031_v48 = vpop.eup %4030  ;;  %v3373_v15 = vadd.s32 1, %v3720_v61  ;;  %v3370_v0 = vand.u32 8388607, %v3363_v25  ;;  %v3243_v53 = vsub.s32 4, %v6762_v5  ;;  %vm3159_vm7 = vcmp.lt.s32.totalorder %v6620_v56, 0 }
 0x31c   : > { %v3231_v24 = vshrl.u32 %v3213_v49, %v3229_v51  ;;  %v3234_v33 = vadd.s32 127, %v3233_v4  ;;  %v4033_v55 = vpop.eup %4032  ;;  %v3153_v35 = vxor.u32 2147483648, %v4031_v48  ;;  %v3321_v47 = vadd.s32 536870912, %v3320_v3 }
 0x31d   : > { %v3150_v31 = vxor.u32 2147483648, %v4033_v55  ;;  %vm3374_vm6 = vcmp.gt.s32.totalorder %v3373_v15, 0  ;;  %vm6842_vm8 = vcmp.le.f32.partialorder %v3157_v6, 0.7853982  ;;  %v3371_v60 = vor.u32 8388608, %v3370_v0 }
 0x31e   : > { %v3232_v38 = vor.u32 %v3231_v24, %v3230_v16  ;;  %v3235_v14 = vshll.u32 %v3234_v33, 23  ;;  %v3154_v12 = vsel %vm3152_vm2, %v3153_v35, %v4033_v55  ;;  %v3375_v22 = vsel %vm3374_vm6, %v3373_v15, 0 }
 0x31f   : > { %v3151_v57 = vsel %vm3149_vm5, %v4031_v48, %v3150_v31  ;;  %v6835_v46 = vshrl.u32 %v3321_v47, 30  ;;  %v3377_v43 = vand.u32 31, %v3375_v22  ;;  %v3244_v42 = vsel %vm3159_vm7, %v3243_v53, %v6762_v5 }
 0x320   : > { %v3236_v54 = vor.u32 4788187, %v3235_v14  ;;  %v3239_v52 = vcvt.s32.f32 %v3232_v38  ;;  %v3155_v37 = vsel %vm3148_vm4, %v3151_v57, %v3154_v12  ;;  %v3376_v6 = vshrl.u32 %v3375_v22, 5 }
 0x321   : > { %v3156_v45 = vsel %vm3146_vm1, nan, %v3155_v37  ;;  %v3323_v40 = vshll.u32 %v6835_v46, 30  ;;  %v3378_v17 = vsub.s32 32, %v3377_v43  ;;  %v3380_v63 = vshll.u32 %v4147_v26, %v3377_v43 }
 0x322   : > { %v3237_v23 = vand.u32 2147483647, %v3236_v54  ;;  %3494 = vst [vmem:[%s4546_s17 + $0xe0] sm:$0xff] %v3156_v45  ;;  %v3383_v2 = vshll.u32 %v4148_v28, %v3377_v43  ;;  %v3386_v29 = vshll.u32 %v4149_v30, %v3377_v43  ;;  %v3389_v21 = vshll.u32 %v4150_v32, %v3377_v43 }
 0x323   : > { %v6853_v58 = vsub.s32 %v3320_v3, %v3323_v40  ;;  %v3381_v20 = vshrl.u32 %v4148_v28, %v3378_v17  ;;  %v3384_v27 = vshrl.u32 %v4149_v30, %v3378_v17  ;;  %v3387_v13 = vshrl.u32 %v4150_v32, %v3378_v17 }
 0x324   : > { %v3240_v7 = vmul.f32 %v3239_v52, %v3237_v23  ;;  %v3246_v5 = vsel %vm6842_vm8, 0, %v3244_v42  ;;  %v3390_v49 = vshrl.u32 %v4151_v34, %v3378_v17  ;;  %v6864_v62 = vshll.u32 %v3371_v60, 8 }
 0x325   : > { %v3326_v8 = vsub.s32 0, %v6853_v58  ;;  %v3382_v18 = vor.u32 %v3381_v20, %v3380_v63  ;;  %v3385_v44 = vor.u32 %v3384_v27, %v3383_v2  ;;  %v3392_v30 = vshll.u32 %v4151_v34, %v3377_v43 }
 0x326   : > { %v3241_v10 = vxor.u32 2147483648, %v3240_v7  ;;  %v3388_v51 = vor.u32 %v3387_v13, %v3386_v29  ;;  %vm3395_vm9 = vcmp.lt.s32.totalorder %v3376_v6, 1  ;;  %v3379_v16 = vshrl.u32 %v4147_v26, %v3378_v17 }
 0x327   : > { %v3717_v36 = vmin.u32 %v3326_v8, %v6853_v58  ;;  %v3391_v4 = vor.u32 %v3390_v49, %v3389_v21  ;;  %v3393_v61 = vshrl.u32 %v4152_v41, %v3378_v17  ;;  %vm3397_vm10 = vcmp.lt.s32.totalorder %v3376_v6, 3 }
 0x328   : > { %v3242_v28 = vsel %vm3159_vm7, %v3241_v10, %v3240_v7  ;;  %vm3398_vm11 = vcmp.lt.s32.totalorder %v3376_v6, 4  ;;  %vm3396_vm12 = vcmp.lt.s32.totalorder %v3376_v6, 2  ;;  %v3403_v33 = vsel %vm3395_vm9, %v3382_v18, %v3385_v44 }
 0x329   : > { %v3245_v32 = vsel %vm6842_vm8, %v6620_v56, %v3242_v28  ;;  %v3328_v48 = vclz %v3717_v36  ;;  %v3394_v24 = vor.u32 %v3393_v61, %v3392_v30  ;;  %v3400_v34 = vsel %vm3398_vm11, %v3388_v51, 2102212464 }
 0x32a   : > { %4034 = vcosq.f32 %v3245_v32  ;;  %v3250_v1 = vand.u32 3, %v3246_v5  ;;  %v3404_v55 = vsel %vm3398_vm11, %v3391_v4, 920167782  ;;  %v3407_v35 = vsel %vm3395_vm9, %v3385_v44, %v3388_v51 }
 0x32b   : > { %4036 = vsinq.f32 %v3245_v32  ;;  %v3718_v15 = vadd.s32 4294967294, %v3328_v48  ;;  %v3399_v3 = vsel %vm3395_vm9, %v3379_v16, %v3382_v18  ;;  %v3401_v26 = vsel %vm3397_vm10, %v3385_v44, %v3400_v34 }
 0x32c   : > { %v3405_v41 = vsel %vm3397_vm10, %v3388_v51, %v3404_v55  ;;  %v3408_v31 = vsel %vm3398_vm11, %v3394_v24, 1326507024  ;;  %v3316_v38 = vadd.s32 %v6809_v11, %v6818_v19  ;;  %v3402_v37 = vsel %vm3396_vm12, %v3399_v3, %v3401_v26 }
 0x32d   : > { %vm3719_vm13 = vcmp.lt.s32.totalorder %v3718_v15, 0  ;;  %v3406_v14 = vsel %vm3396_vm12, %v3403_v33, %v3405_v41  ;;  %v3409_v12 = vsel %vm3397_vm10, %v3391_v4, %v3408_v31  ;;  %vm3255_vm14 = vcmp.eq.s32.totalorder %v3250_v1, 2 }
 0x32e   : > { %v3331_v47 = vsel %vm3719_vm13, 0, %v3718_v15  ;;  %v3410_v0 = vsel %vm3396_vm12, %v3407_v35, %v3409_v12  ;;  %v6886_v22 = vmul.u32.u64.low %v6864_v62, %v3406_v14  ;;  %v6887_v57 = vmul.u32.u64.high %v6864_v62, %v3406_v14, %v6886_v22 }
 0x32f   : > { %v3332_v54 = vsub.s32 32, %v3331_v47  ;;  %v3333_v52 = vshll.u32 %v6853_v58, %v3331_v47  ;;  %v3336_v53 = vsub.s32 4294967266, %v3331_v47  ;;  %v3418_v39 = vmul.u32 %v6864_v62, %v3402_v37 }
 0x330   : > { %v6892_v11 = vmul.u32.u64.low %v6864_v62, %v3410_v0  ;;  %v6893_v19 = vmul.u32.u64.high %v6864_v62, %v3410_v0, %v6892_v11  ;;  %v3421_v40 = vadd.s32 1, %v6887_v57  ;;  %vm3252_vm15 = vcmp.eq.s32.totalorder %v3250_v1, 0 }
 0x331   : > { %v3334_v43 = vshrl.u32 %v3316_v38, %v3332_v54  ;;  %v3337_v45 = vadd.s32 127, %v3336_v53  ;;  %vm3249_vm0 = vweird.f32 %v6620_v56  ;;  %vm3251_vm1 = vcmp.lt.s32.totalorder %v3250_v1, 2 }
 0x332   : > { %vm3420_vm2 = vc.u32 %v6893_v19, %v6886_v22  ;;  %vm3262_vm3 = vcmp.lt.s32.totalorder %v6670_v59, 0  ;;  %vm3261_vm4 = vcmp.le.f32.partialorder %v3260_v9, 0.7853982  ;;  %v3346_v62 = vsub.s32 4, %v6835_v46 }
 0x333   : > { %v3335_v7 = vor.u32 %v3334_v43, %v3333_v52  ;;  %v3338_v42 = vshll.u32 %v3337_v45, 23  ;;  %v3422_v20 = vsel %vm3420_vm2, %v3421_v40, %v6887_v57  ;;  %v3419_v9 = vadd.s32 %v6886_v22, %v6893_v19 }
 0x334   : > { %v4035_v23 = vpop.eup %4034  ;;  %v3423_v10 = vadd.s32 %v3422_v20, %v3418_v39  ;;  %v3347_v32 = vsel %vm3262_vm3, %v3346_v62, %v6835_v46  ;;  %vm3352_vm9 = vweird.f32 %v6670_v59  ;;  %vm3365_vm10 = vcmp.lt.s32.totalorder %v6799_v50, 0 }
 0x335   : > { %v4037_v60 = vpop.eup %4036  ;;  %v3256_v17 = vxor.u32 2147483648, %v4035_v23  ;;  %v3339_v58 = vor.u32 4788187, %v3338_v42  ;;  %v3342_v6 = vcvt.s32.f32 %v3335_v7  ;;  %v3349_v51 = vsel %vm3261_vm4, 0, %v3347_v32 }
 0x336   : > { %v3253_v63 = vxor.u32 2147483648, %v4037_v60  ;;  %v3424_v5 = vadd.s32 536870912, %v3423_v10  ;;  %v3353_v61 = vand.u32 3, %v3349_v51  ;;  %vm3364_vm11 = vcmp.le.f32.partialorder %v3363_v25, 0.7853982 }
 0x337   : > { %v3257_v2 = vsel %vm3255_vm14, %v3256_v17, %v4037_v60  ;;  %v3340_v13 = vand.u32 2147483647, %v3339_v58 }
 0x338   : > { %v3254_v29 = vsel %vm3252_vm15, %v4035_v23, %v3253_v63  ;;  %v3425_v56 = vshrl.u32 %v3424_v5, 30  ;;  %vm3355_vm6 = vcmp.eq.s32.totalorder %v3353_v61, 0  ;;  %vm3358_vm7 = vcmp.eq.s32.totalorder %v3353_v61, 2 }
 0x339   : > { %v3258_v27 = vsel %vm3251_vm1, %v3254_v29, %v3257_v2  ;;  %v3343_v8 = vmul.f32 %v3342_v6, %v3340_v13  ;;  %vm3354_vm8 = vcmp.lt.s32.totalorder %v3353_v61, 2  ;;  %vm3455_vm15 = vweird.f32 %v6799_v50 }
 0x33a   : > { %v3259_v21 = vsel %vm3249_vm0, nan, %v3258_v27  ;;  %v3426_v28 = vshll.u32 %v3425_v56, 30  ;;  %v3449_v52 = vsub.s32 4, %v3425_v56 }
 0x33b   : > { %3495 = vst [vmem:[%s4546_s17 + $0xe8] sm:$0xff] %v3259_v21  ;;  %v3344_v49 = vxor.u32 2147483648, %v3343_v8 }
 0x33c   : > { %v3427_v30 = vsub.s32 %v3423_v10, %v3426_v28  ;;  %v3450_v11 = vsel %vm3365_vm10, %v3449_v52, %v3425_v56 }
 0x33d   : > { %v3345_v18 = vsel %vm3262_vm3, %v3344_v49, %v3343_v8  ;;  %v3452_v19 = vsel %vm3364_vm11, 0, %v3450_v11 }
 0x33e   : > { %v3348_v44 = vsel %vm3261_vm4, %v6670_v59, %v3345_v18  ;;  %v3429_v36 = vsub.s32 0, %v3427_v30  ;;  %v3456_v43 = vand.u32 3, %v3452_v19 }
 0x33f   : > { %4038 = vcosq.f32 %v3348_v44 }
 0x340   : > { %4040 = vsinq.f32 %v3348_v44  ;;  %v3721_v16 = vmin.u32 %v3429_v36, %v3427_v30  ;;  %vm3461_vm12 = vcmp.eq.s32.totalorder %v3456_v43, 2  ;;  %vm3458_vm13 = vcmp.eq.s32.totalorder %v3456_v43, 0 }
 0x341   : > { %vm3457_vm14 = vcmp.lt.s32.totalorder %v3456_v43, 2 }
 0x342   : > { %v3431_v4 = vclz %v3721_v16 }
 0x344   : > { %v3722_v48 = vadd.s32 4294967294, %v3431_v4 }
 0x346   : > { %vm3723_vm5 = vcmp.lt.s32.totalorder %v3722_v48, 0 }
 0x347   : > { %v3434_v34 = vsel %vm3723_vm5, 0, %v3722_v48 }
 0x348   : > { %v3435_v15 = vsub.s32 32, %v3434_v34  ;;  %v3436_v46 = vshll.u32 %v3427_v30, %v3434_v34  ;;  %v3439_v55 = vsub.s32 4294967266, %v3434_v34 }
 0x349   : > { %v4039_v24 = vpop.eup %4038 }
 0x34a   : > { %v4041_v33 = vpop.eup %4040  ;;  %v3359_v1 = vxor.u32 2147483648, %v4039_v24  ;;  %v3437_v26 = vshrl.u32 %v3419_v9, %v3435_v15  ;;  %v3440_v41 = vadd.s32 127, %v3439_v55 }
 0x34b   : > { %v3356_v35 = vxor.u32 2147483648, %v4041_v33 }
 0x34c   : > { %v3360_v3 = vsel %vm3358_vm7, %v3359_v1, %v4041_v33  ;;  %v3438_v14 = vor.u32 %v3437_v26, %v3436_v46  ;;  %v3441_v12 = vshll.u32 %v3440_v41, 23 }
 0x34d   : > { %v3357_v31 = vsel %vm3355_vm6, %v4039_v24, %v3356_v35 }
 0x34e   : > { %v3361_v38 = vsel %vm3354_vm8, %v3357_v31, %v3360_v3  ;;  %v3442_v0 = vor.u32 4788187, %v3441_v12  ;;  %v3445_v22 = vcvt.s32.f32 %v3438_v14 }
 0x34f   : > { %v3362_v47 = vsel %vm3352_vm9, nan, %v3361_v38 }
 0x350   : > { %3496 = vst [vmem:[%s4546_s17 + $0xf0] sm:$0xff] %v3362_v47  ;;  %v3443_v57 = vand.u32 2147483647, %v3442_v0 }
 0x352   : > { %v3446_v54 = vmul.f32 %v3445_v22, %v3443_v57 }
 0x354   : > { %v3447_v59 = vxor.u32 2147483648, %v3446_v54 }
 0x356   : > { %v3448_v53 = vsel %vm3365_vm10, %v3447_v59, %v3446_v54 }
 0x357   : > { %v3451_v37 = vsel %vm3364_vm11, %v6799_v50, %v3448_v53 }
 0x358   : > { %4042 = vcosq.f32 %v3451_v37 }
 0x359   : > { %4044 = vsinq.f32 %v3451_v37 }
 0x362   : > { %v4043_v45 = vpop.eup %4042 }
 0x363   : > { %v4045_v23 = vpop.eup %4044  ;;  %v3462_v39 = vxor.u32 2147483648, %v4043_v45 }
 0x364   : > { %v3459_v25 = vxor.u32 2147483648, %v4045_v23 }
 0x365   : > { %v3463_v40 = vsel %vm3461_vm12, %v3462_v39, %v4045_v23 }
 0x366   : > { %v3460_v60 = vsel %vm3458_vm13, %v4043_v45, %v3459_v25 }
 0x367   : > { %v3464_v17 = vsel %vm3457_vm14, %v3460_v60, %v3463_v40 }
 0x368   : > { %v3465_v7 = vsel %vm3455_vm15, nan, %v3464_v17 }
 0x369   : > { %3497 = vst [vmem:[%s4546_s17 + $0xf8] sm:$0xff] %v3465_v7 }
 0x36a   : > { %4089 = shalt.err (!%p4086_p2)
}
 0x36b   : > { %s4090_s13 = scalar_lea.hbm %s6920_s2, 4096  ;;  %s4094_s20 = scalar_lea.hbm %s6968_s1, 8192 }
 0x36c   : > { %p4091_p4 = scmp.ne.s32.totalorder %s6920_s2, %s4090_s13  ;;  %p4095_p9 = scmp.lt.u32.totalorder %s6920_s2, %s6968_s1 }
 0x36d   : > { %p4096_p1 = scmp.lt.u32.totalorder %s4094_s20, %s4090_s13  ;;  %p4098_p6 = scmp.lt.u32.totalorder %s4090_s13, %s6920_s2 }
 0x36e   : > { %p4092_p5 = pnand %p4091_p4, %p7035_p11 }
 0x36f   : > { %p4097_p3 = por %p4096_p1, %p4095_p9 }
 0x370   : > { %p4093_p7 = pneg %p4092_p5 }
 0x371   : > { %p4099_p12 = por %p4098_p6, %p4097_p3 }
 0x373   : > { %p4100_p13 = pnand %p4099_p12, %p4093_p7 }
 0x375   : > { %4103 = shalt.err (!%p4100_p13)
}
 0x376   : > { %s4154_s24 = smov 1024   ;;  %s4155_s26 = smov 64  }
 0x377   : > { %3864 = dma.vmem_to_hbm [thread:$0]  (%p7035_p11), %s6922_s27, 4096, %s6920_s2, %s3499_s10, %s4154_s24, %s4154_s24, %s4155_s26  }
 0x378 PF: > { %s3528_s30 = sand.u32 1, %s4130_s6   ;;  %p7036_p8 = scmp.ne.s32.totalorder %s6973_s19, 0 }
 0x379   : > { %p7037_p10 = scmp.ge.s32.totalorder %s4142_s9, 2  ;;  %s3529_s17 = scalar_lea.sflag [#allocation4], %s3528_s30 }
 0x37b   : > { %p3871_p0 = pnand %p7037_p10, %p7036_p8 }
 0x37d   : > { %4125 = dma.done.wait (!%p3871_p0), %s3529_s17, 4096  }
 0x37e   : > { %4127 = vsyncadd (!%p3871_p0), %s3529_s17, 4294963200  ;;  %p14_p2 = scmp.ge.s32.totalorder %s4191_s12, 4   ;;  %s7038_s6 = smov %s4134_s7 }
 0x37f   : > { %s7039_s7 = smov %s4138_s8  ;;  %s7040_s8 = smov %s4203_s15 }
 0x380   : > { %s7041_s9 = smov %s4191_s12  ;;  %16 = sbr.rel (!%p14_p2) target bundleno = 5 (0x5), region = 69 }
 0x387   :  { %3534 = vsyncpa [#allocation3], 1 }
 0x388   :  { %3536 = vsyncpa [#allocation3 + $0x1], 1 }
 0x389   :  { %3537 = vsyncpa [#allocation4], 1 }
 0x38a   :  { %3539 = vsyncpa [#allocation4 + $0x1], 1 }

</bundles_post_ra>
